<compile_context>
chip_gen: v5e
topology: v5e:2x2
jax: 0.10.0
libtpu: 0.0.40
codegen_flags: <defaults>
</compile_context>

<pallas_src>
import jax
import jax.numpy as jnp
import numpy as np
from jax import lax
from jax.experimental import pallas as pl
from jax.experimental.pallas import tpu as pltpu

FEATURE_SIZE = 256          # PyTorch default is 476; must be even
LATENT_SIZE = 2
NUM_CLASSES = 10
BATCH = 256                 # total batch processed per call (amortizes weights)
BT = 128                    # batch tile per grid step (multiple of 8)

L2 = FEATURE_SIZE // 2      # length after AvgPool1d(2)
FLAT = 4 * L2               # flattened encoder features (= feature_size * 2)

# xy layout: [ x (0:256) | y (256:266) | 1.0 (266) | eps (267:269) | 0 (269:384) ]
YBLK = 2 * L2               # 256: start of the y/extra 128-lane block
ONE_LANE = NUM_CLASSES      # 10 : constant-1 lane (relative to YBLK)
EPS_LANE = NUM_CLASSES + 1  # 11 : eps lanes 11:13 (relative to YBLK)

# rows of the packed (16, 512) f32 slab
ROW_B2, ROW_B3 = 0, 1                     # encoder biases (channel-major slabs)
ROW_D1Z0, ROW_D1Z1 = 2, 3                 # deconv1 z taps (center tap)
ROW_D2 = 4                                 # rows 4..7: deconv2 taps
ROW_DB2 = 8                                # deconv2 bias
ROW_D3_0, ROW_D3_1, ROW_DB3 = 9, 10, 11    # deconv3 taps (128-wide) + bias


# ----------------------------- kernel --------------------------------------
def cvae_kernel(xy_ref, m1_ref, m2_ref, m3_ref, wh_ref, slab_ref, out_ref):
    f32, bf16 = jnp.float32, jnp.bfloat16
    xy = xy_ref[...]                                   # (BT, 384) f32
    s = slab_ref[...]                                  # (16, 512) f32

    # ----- encoder: banded-matmul convs on the MXU (bf16 weights, f32 acc) --
    # conv1 bias is baked into M1 via the constant-1 lane of xy.
    h1 = jnp.maximum(jnp.dot(xy.astype(bf16), m1_ref[...],
                             preferred_element_type=f32), 0.0)        # (BT,256)
    h2 = jnp.maximum(jnp.dot(h1.astype(bf16), m2_ref[...],
                             preferred_element_type=f32)
                     + s[ROW_B2:ROW_B2 + 1, :], 0.0)                   # (BT,512)
    h3 = jnp.maximum(jnp.dot(h2.astype(bf16), m3_ref[...],
                             preferred_element_type=f32)
                     + s[ROW_B3:ROW_B3 + 1, :], 0.0)                   # (BT,512)

    # ----- fused head: [mean | logvar | y-part of deconv1], biases baked ----
    lhs = jnp.concatenate([h3, xy[:, YBLK:]], axis=1)                  # (BT,640)
    ml8 = jnp.dot(lhs, wh_ref[...], preferred_element_type=f32)        # (BT,8)
    mean = ml8[:, 0:2]
    logv = ml8[:, 2:4]
    yd1 = ml8[:, 4:8]                     # y @ dw1_y + db1 (bias already in)

    # ----- reparameterize: z = mean + eps * exp(0.5 * logvar)  (f32) --------
    eps = xy[:, YBLK + EPS_LANE: YBLK + EPS_LANE + LATENT_SIZE]        # (BT,2)
    z = mean + eps * jnp.exp(0.5 * logv)                               # (BT,2)

    # ----- decoder tail on the VPU: length-1 ConvTranspose1d layers as FMAs -
    d1 = jnp.maximum(yd1
                     + z[:, 0:1] * s[ROW_D1Z0:ROW_D1Z0 + 1, 0:4]
                     + z[:, 1:2] * s[ROW_D1Z1:ROW_D1Z1 + 1, 0:4], 0.0)  # (BT,4)
    d2 = jnp.maximum(d1[:, 0:1] * s[ROW_D2 + 0:ROW_D2 + 1, 0:2]
                     + d1[:, 1:2] * s[ROW_D2 + 1:ROW_D2 + 2, 0:2]
                     + d1[:, 2:3] * s[ROW_D2 + 2:ROW_D2 + 3, 0:2]
                     + d1[:, 3:4] * s[ROW_D2 + 3:ROW_D2 + 4, 0:2]
                     + s[ROW_DB2:ROW_DB2 + 1, 0:2], 0.0)                # (BT,2)
    # final ConvTranspose1d(2,1,k=2): weights stored 128 lanes wide (zeros past
    # lane 2) so the output store is a full, unmasked 128-lane write.
    out_ref[...] = (d2[:, 0:1] * s[ROW_D3_0:ROW_D3_0 + 1, 0:128]
                    + d2[:, 1:2] * s[ROW_D3_1:ROW_D3_1 + 1, 0:128]
                    + s[ROW_DB3:ROW_DB3 + 1, 0:128])                    # (BT,128)


# ----------------------- host-side weight packing ---------------------------
def conv1d_band_matrix(w, L):
    """Dense A such that flat_out = flat_in @ A for a stride-1, pad=(K-1)//2
    Conv1d, with channel-major flattening of input and output slabs."""
    w = np.asarray(w, dtype=np.float32)
    c_out, c_in, K = w.shape
    pad = (K - 1) // 2
    A = np.zeros((c_in * L, c_out * L), dtype=np.float32)
    p = np.arange(L)
    for o in range(c_out):
        for i in range(c_in):
            for k in range(K):
                j = p + k - pad
                valid = (j >= 0) & (j < L)
                A[i * L + j[valid], o * L + p[valid]] += w[o, i, k]
    return A


def avgpool_matrix(L):
    P = np.zeros((L, L // 2), dtype=np.float32)
    P[np.arange(L), np.arange(L) // 2] = 0.5
    return P


def pack_weights(params):
    """Runs once on the host; returns the 5 packed weight operands."""
    w1, b1 = np.asarray(params['w1']), np.asarray(params['b1'])
    w2, b2 = np.asarray(params['w2']), np.asarray(params['b2'])
    w3, b3 = np.asarray(params['w3']), np.asarray(params['b3'])
    wm, bm = np.asarray(params['wm']), np.asarray(params['bm'])
    wl, bl = np.asarray(params['wl']), np.asarray(params['bl'])
    dw1, db1 = np.asarray(params['dw1']), np.asarray(params['db1'])
    dw2, db2 = np.asarray(params['dw2']), np.asarray(params['db2'])
    dw3, db3 = np.asarray(params['dw3']), np.asarray(params['db3'])

    # conv1 + avgpool fused into one matrix; bias b1 baked via the ones lane
    A1 = conv1d_band_matrix(w1, FEATURE_SIZE)              # (256, 512)
    P = avgpool_matrix(FEATURE_SIZE)                       # (256, 128)
    Ppool = np.zeros((2 * FEATURE_SIZE, 2 * L2), np.float32)
    Ppool[:FEATURE_SIZE, :L2] = P
    Ppool[FEATURE_SIZE:, L2:] = P
    M1 = np.zeros((FEATURE_SIZE + 128, 2 * L2), np.float32)   # (384, 256)
    M1[:FEATURE_SIZE] = A1 @ Ppool
    M1[FEATURE_SIZE + ONE_LANE] = np.repeat(b1, L2)           # b1 baked in
    M2 = conv1d_band_matrix(w2, L2)                           # (256, 512)
    M3 = conv1d_band_matrix(w3, L2)                           # (512, 512)

    # fused head: cols = [mean0, mean1, logv0, logv1, d1y0..d1y3]
    Wh = np.zeros((FLAT + 128, 8), np.float32)                # (640, 8)
    Wh[:FLAT, 0:2] = wm.T[:FLAT]
    Wh[:FLAT, 2:4] = wl.T[:FLAT]
    Wh[FLAT:FLAT + NUM_CLASSES, 0:2] = wm.T[FLAT:]
    Wh[FLAT:FLAT + NUM_CLASSES, 2:4] = wl.T[FLAT:]
    Wh[FLAT:FLAT + NUM_CLASSES, 4:8] = dw1[LATENT_SIZE:, :, 1]   # y center taps
    Wh[FLAT + ONE_LANE, 0:2] = bm                                 # biases baked
    Wh[FLAT + ONE_LANE, 2:4] = bl
    Wh[FLAT + ONE_LANE, 4:8] = db1
    # eps lanes (FLAT+EPS_LANE .. +1) stay zero so eps never leaks into the head

    # small f32 slab: encoder biases + decoder tail weights
    slab = np.zeros((16, FLAT), np.float32)
    slab[ROW_B2, :] = np.repeat(b2, L2)
    slab[ROW_B3, :] = np.repeat(b3, L2)
    slab[ROW_D1Z0, 0:4] = dw1[0, :, 1]                        # z0 center taps
    slab[ROW_D1Z1, 0:4] = dw1[1, :, 1]                        # z1 center taps
    for i in range(4):
        slab[ROW_D2 + i, 0:2] = dw2[i, :, 1]                  # center taps
    slab[ROW_DB2, 0:2] = db2
    slab[ROW_D3_0, 0:2] = dw3[0, 0, :]                        # both taps
    slab[ROW_D3_1, 0:2] = dw3[1, 0, :]
    slab[ROW_DB3, 0:2] = db3[0]

    return {
        'M1': jnp.asarray(M1, jnp.bfloat16),
        'M2': jnp.asarray(M2, jnp.bfloat16),
        'M3': jnp.asarray(M3, jnp.bfloat16),
        'Wh': jnp.asarray(Wh, jnp.float32),
        'slab': jnp.asarray(slab, jnp.float32),
    }


def make_params(key):
    ks = jax.random.split(key, 16)

    def rn(k, shape, scale=0.1):
        return scale * jax.random.normal(k, shape, dtype=jnp.float32)

    return {
        # encoder convs (PyTorch Conv1d weight layout: (out, in, k))
        'w1': rn(ks[0], (2, 1, 3)), 'b1': rn(ks[1], (2,)),
        'w2': rn(ks[2], (4, 2, 3)), 'b2': rn(ks[3], (4,)),
        'w3': rn(ks[4], (4, 4, 3)), 'b3': rn(ks[5], (4,)),
        # fc_mean / fc_logvar (Linear weight layout: (out, in))
        'wm': rn(ks[6], (LATENT_SIZE, FLAT + NUM_CLASSES)),
        'bm': rn(ks[7], (LATENT_SIZE,)),
        'wl': rn(ks[8], (LATENT_SIZE, FLAT + NUM_CLASSES)),
        'bl': rn(ks[9], (LATENT_SIZE,)),
        # decoder transpose convs (ConvTranspose1d weight: (in, out, k))
        'dw1': rn(ks[10], (LATENT_SIZE + NUM_CLASSES, 4, 3)),
        'db1': rn(ks[11], (4,)),
        'dw2': rn(ks[12], (4, 2, 3)), 'db2': rn(ks[13], (2,)),
        'dw3': rn(ks[14], (2, 1, 2)), 'db3': rn(ks[15], (1,)),
    }


# ------------------------------- wrapper ------------------------------------
def cvae_forward(packed, x, y, eps):
    B = x.shape[0]
    # single activation operand: [x | y | 1 | eps | 0-pad]  -> (B, 384)
    xy = jnp.concatenate(
        [x.astype(jnp.float32), y.astype(jnp.float32),
         jnp.ones((B, 1), jnp.float32), eps.astype(jnp.float32),
         jnp.zeros((B, 128 - NUM_CLASSES - 1 - LATENT_SIZE), jnp.float32)],
        axis=1)
    Bp = ((B + BT - 1) // BT) * BT
    if Bp != B:                                   # pad final partial batch tile
        xy = jnp.pad(xy, ((0, Bp - B), (0, 0)))

    m1, m2, m3, wh, slab = (packed['M1'], packed['M2'], packed['M3'],
                            packed['Wh'], packed['slab'])

    def nbytes(a):
        return int(np.prod(a.shape)) * a.dtype.itemsize

    flops = 2 * Bp * (m1.shape[0] * m1.shape[1] + m2.shape[0] * m2.shape[1]
                      + m3.shape[0] * m3.shape[1] + wh.shape[0] * wh.shape[1])
    bytes_accessed = (nbytes(m1) + nbytes(m2) + nbytes(m3) + nbytes(wh)
                      + nbytes(slab) + Bp * 3 * 128 * 4 + Bp * 128 * 4)

    const = lambda i: (0, 0)                      # weights resident across grid
    out = pl.pallas_call(
        cvae_kernel,
        out_shape=jax.ShapeDtypeStruct((Bp, 128), jnp.float32),
        grid=(Bp // BT,),
        in_specs=[
            pl.BlockSpec((BT, 3 * 128), lambda i: (i, 0)),   # xy: per-step tile
            pl.BlockSpec(m1.shape, const),
            pl.BlockSpec(m2.shape, const),
            pl.BlockSpec(m3.shape, const),
            pl.BlockSpec(wh.shape, const),
            pl.BlockSpec(slab.shape, const),
        ],
        out_specs=pl.BlockSpec((BT, 128), lambda i: (i, 0)),
        compiler_params=pltpu.CompilerParams(
            dimension_semantics=("parallel",)),
        cost_estimate=pl.CostEstimate(
            flops=flops, transcendentals=Bp * LATENT_SIZE,
            bytes_accessed=bytes_accessed),
    )(xy, m1, m2, m3, wh, slab)
    return out[:B, None, 0:2]                     # (B, 1, 2) == PyTorch output


# ----------------------- pure-JAX reference (for checking) ------------------
def conv1d_ref(x, w, b, padding):
    out = lax.conv_general_dilated(
        x, w, window_strides=(1,), padding=[(padding, padding)],
        dimension_numbers=('NCH', 'OIH', 'NCH'))
    return out + b[None, :, None]


def conv_transpose1d_ref(x, w, b, stride, padding):
    bsz, _, lin = x.shape
    _, cout, k = w.shape
    lout = (lin - 1) * stride - 2 * padding + k
    full = jnp.zeros((bsz, cout, (lin - 1) * stride + k), dtype=x.dtype)
    for m in range(lin):
        for kk in range(k):
            contrib = jnp.einsum('bi,io->bo', x[:, :, m], w[:, :, kk])
            full = full.at[:, :, m * stride + kk].add(contrib)
    return full[:, :, padding:padding + lout] + b[None, :, None]


def ref_forward(params, x, y, eps):
    bsz = x.shape[0]
    h = conv1d_ref(x[:, None, :], params['w1'], params['b1'], 1)   # (B,2,F)
    h = h.reshape(bsz, 2, L2, 2).mean(-1)                          # AvgPool1d(2)
    h = jax.nn.relu(h)
    h = jax.nn.relu(conv1d_ref(h, params['w2'], params['b2'], 1))
    h = jax.nn.relu(conv1d_ref(h, params['w3'], params['b3'], 1))
    enc = jnp.concatenate([h.reshape(bsz, -1), y], axis=1)
    mean = enc @ params['wm'].T + params['bm']
    logv = enc @ params['wl'].T + params['bl']
    z = mean + eps * jnp.exp(0.5 * logv)
    zin = jnp.concatenate([z[:, :, None], y[:, :, None]], axis=1)  # (B,12,1)
    d = jax.nn.relu(conv_transpose1d_ref(zin, params['dw1'], params['db1'], 2, 1))
    d = jax.nn.relu(conv_transpose1d_ref(d, params['dw2'], params['db2'], 1, 1))
    d = conv_transpose1d_ref(d, params['dw3'], params['db3'], 1, 0)
    return d                                                        # (B,1,2)


if __name__ == "__main__":
    key = jax.random.PRNGKey(0)
    kp, kx, ke = jax.random.split(key, 3)
    params = make_params(kp)
    packed = pack_weights(params)          # host-side packing, done ONCE

    x = jax.random.normal(kx, (BATCH, FEATURE_SIZE), dtype=jnp.float32)
    y = jax.nn.one_hot(jnp.arange(BATCH) % NUM_CLASSES, NUM_CLASSES,
                       dtype=jnp.float32)
    eps = jax.random.normal(ke, (BATCH, LATENT_SIZE), dtype=jnp.float32)

    forward = jax.jit(cvae_forward)        # no per-call host prep
    out = jax.block_until_ready(forward(packed, x, y, eps))
    ref = jax.block_until_ready(ref_forward(params, x, y, eps))

    assert out.shape == (BATCH, 1, 2), out.shape
    # tolerance loosened vs the f32 reference to absorb bf16 weight rounding
    np.testing.assert_allclose(np.asarray(out), np.asarray(ref),
                               atol=1e-2, rtol=1e-2)
    print("KERNEL_OK")
</pallas_src>

<mosaic_0001>
module attributes {stable_mosaic.version = 11 : i64} {
  func.func @cvae_kernel(%arg0: i32, %arg1: memref<128x384xf32, #tpu.memory_space<vmem>>, %arg2: memref<384x256xbf16, #tpu.memory_space<vmem>>, %arg3: memref<256x512xbf16, #tpu.memory_space<vmem>>, %arg4: memref<512x512xbf16, #tpu.memory_space<vmem>>, %arg5: memref<640x8xf32, #tpu.memory_space<vmem>>, %arg6: memref<16x512xf32, #tpu.memory_space<vmem>>, %arg7: memref<128x128xf32, #tpu.memory_space<vmem>>) attributes {dimension_semantics = [#tpu.dimension_semantics<parallel>], iteration_bounds = array<i64: 2>, scalar_prefetch = 0 : i64, scratch_operands = 0 : i64, tpu.core_type = #tpu.core_type<tc>, window_params = [{transform_indices = @transform_0, window_bounds = array<i64: 128, 384>}, {pipeline_mode = #tpu.pipeline_mode<synchronous>, transform_indices = @transform_1, window_bounds = array<i64: 384, 256>}, {pipeline_mode = #tpu.pipeline_mode<synchronous>, transform_indices = @transform_2, window_bounds = array<i64: 256, 512>}, {pipeline_mode = #tpu.pipeline_mode<synchronous>, transform_indices = @transform_3, window_bounds = array<i64: 512, 512>}, {pipeline_mode = #tpu.pipeline_mode<synchronous>, transform_indices = @transform_4, window_bounds = array<i64: 640, 8>}, {pipeline_mode = #tpu.pipeline_mode<synchronous>, transform_indices = @transform_5, window_bounds = array<i64: 16, 512>}, {transform_indices = @transform_6, window_bounds = array<i64: 128, 128>}]} {
    %c0 = arith.constant 0 : index
    %c0_0 = arith.constant 0 : index
    %0 = vector.load %arg1[%c0, %c0_0] : memref<128x384xf32, #tpu.memory_space<vmem>>, vector<128x384xf32>
    %c0_1 = arith.constant 0 : index
    %c0_2 = arith.constant 0 : index
    %1 = vector.load %arg6[%c0_1, %c0_2] : memref<16x512xf32, #tpu.memory_space<vmem>>, vector<16x512xf32>
    %2 = arith.truncf %0 : vector<128x384xf32> to vector<128x384xbf16>
    %c0_3 = arith.constant 0 : index
    %c0_4 = arith.constant 0 : index
    %3 = vector.load %arg2[%c0_3, %c0_4] : memref<384x256xbf16, #tpu.memory_space<vmem>>, vector<384x256xbf16>
    %cst = arith.constant dense<0.000000e+00> : vector<128x256xf32>
    %4 = tpu.matmul %2, %3, %cst {dimension_numbers = #tpu.dot_dimension_numbers<[1], [0], [0], [1], [0, 0, 1, 1], [], []>} : vector<128x384xbf16>, vector<384x256xbf16>, vector<128x256xf32> -> vector<128x256xf32>
    %cst_5 = arith.constant 0.000000e+00 : f32
    %5 = vector.broadcast %cst_5 : f32 to vector<128x256xf32>
    %6 = arith.maximumf %4, %5 : vector<128x256xf32>
    %7 = arith.truncf %6 : vector<128x256xf32> to vector<128x256xbf16>
    %c0_6 = arith.constant 0 : index
    %c0_7 = arith.constant 0 : index
    %8 = vector.load %arg3[%c0_6, %c0_7] : memref<256x512xbf16, #tpu.memory_space<vmem>>, vector<256x512xbf16>
    %cst_8 = arith.constant dense<0.000000e+00> : vector<128x512xf32>
    %9 = tpu.matmul %7, %8, %cst_8 {dimension_numbers = #tpu.dot_dimension_numbers<[1], [0], [0], [1], [0, 0, 1, 1], [], []>} : vector<128x256xbf16>, vector<256x512xbf16>, vector<128x512xf32> -> vector<128x512xf32>
    %10 = vector.extract_strided_slice %1 {offsets = [0, 0], sizes = [1, 512], strides = [1, 1]} : vector<16x512xf32> to vector<1x512xf32>
    %11 = vector.broadcast %10 : vector<1x512xf32> to vector<128x512xf32>
    %12 = arith.addf %9, %11 : vector<128x512xf32>
    %cst_9 = arith.constant 0.000000e+00 : f32
    %13 = vector.broadcast %cst_9 : f32 to vector<128x512xf32>
    %14 = arith.maximumf %12, %13 : vector<128x512xf32>
    %15 = arith.truncf %14 : vector<128x512xf32> to vector<128x512xbf16>
    %c0_10 = arith.constant 0 : index
    %c0_11 = arith.constant 0 : index
    %16 = vector.load %arg4[%c0_10, %c0_11] : memref<512x512xbf16, #tpu.memory_space<vmem>>, vector<512x512xbf16>
    %cst_12 = arith.constant dense<0.000000e+00> : vector<128x512xf32>
    %17 = tpu.matmul %15, %16, %cst_12 {dimension_numbers = #tpu.dot_dimension_numbers<[1], [0], [0], [1], [0, 0, 1, 1], [], []>} : vector<128x512xbf16>, vector<512x512xbf16>, vector<128x512xf32> -> vector<128x512xf32>
    %18 = vector.extract_strided_slice %1 {offsets = [1, 0], sizes = [1, 512], strides = [1, 1]} : vector<16x512xf32> to vector<1x512xf32>
    %19 = vector.broadcast %18 : vector<1x512xf32> to vector<128x512xf32>
    %20 = arith.addf %17, %19 : vector<128x512xf32>
    %cst_13 = arith.constant 0.000000e+00 : f32
    %21 = vector.broadcast %cst_13 : f32 to vector<128x512xf32>
    %22 = arith.maximumf %20, %21 : vector<128x512xf32>
    %23 = vector.extract_strided_slice %0 {offsets = [0, 256], sizes = [128, 128], strides = [1, 1]} : vector<128x384xf32> to vector<128x128xf32>
    %24 = tpu.concatenate %22, %23 in 1 : vector<128x512xf32>, vector<128x128xf32> -> vector<128x640xf32>
    %c0_14 = arith.constant 0 : index
    %c0_15 = arith.constant 0 : index
    %25 = vector.load %arg5[%c0_14, %c0_15] : memref<640x8xf32, #tpu.memory_space<vmem>>, vector<640x8xf32>
    %cst_16 = arith.constant dense<0.000000e+00> : vector<128x8xf32>
    %26 = tpu.matmul %24, %25, %cst_16 {dimension_numbers = #tpu.dot_dimension_numbers<[1], [0], [0], [1], [0, 0, 1, 1], [], []>} : vector<128x640xf32>, vector<640x8xf32>, vector<128x8xf32> -> vector<128x8xf32>
    %27 = vector.extract_strided_slice %26 {offsets = [0, 0], sizes = [128, 2], strides = [1, 1]} : vector<128x8xf32> to vector<128x2xf32>
    %28 = vector.extract_strided_slice %26 {offsets = [0, 2], sizes = [128, 2], strides = [1, 1]} : vector<128x8xf32> to vector<128x2xf32>
    %29 = vector.extract_strided_slice %26 {offsets = [0, 4], sizes = [128, 4], strides = [1, 1]} : vector<128x8xf32> to vector<128x4xf32>
    %30 = vector.extract_strided_slice %0 {offsets = [0, 267], sizes = [128, 2], strides = [1, 1]} : vector<128x384xf32> to vector<128x2xf32>
    %cst_17 = arith.constant 5.000000e-01 : f32
    %31 = vector.broadcast %cst_17 : f32 to vector<128x2xf32>
    %32 = arith.mulf %31, %28 : vector<128x2xf32>
    %33 = math.exp %32 : vector<128x2xf32>
    %34 = arith.mulf %30, %33 : vector<128x2xf32>
    %35 = arith.addf %27, %34 : vector<128x2xf32>
    %36 = vector.extract_strided_slice %35 {offsets = [0, 0], sizes = [128, 1], strides = [1, 1]} : vector<128x2xf32> to vector<128x1xf32>
    %37 = vector.extract_strided_slice %1 {offsets = [2, 0], sizes = [1, 4], strides = [1, 1]} : vector<16x512xf32> to vector<1x4xf32>
    %38 = vector.broadcast %36 : vector<128x1xf32> to vector<128x4xf32>
    %39 = vector.broadcast %37 : vector<1x4xf32> to vector<128x4xf32>
    %40 = arith.mulf %38, %39 : vector<128x4xf32>
    %41 = arith.addf %29, %40 : vector<128x4xf32>
    %42 = vector.extract_strided_slice %35 {offsets = [0, 1], sizes = [128, 1], strides = [1, 1]} : vector<128x2xf32> to vector<128x1xf32>
    %43 = vector.extract_strided_slice %1 {offsets = [3, 0], sizes = [1, 4], strides = [1, 1]} : vector<16x512xf32> to vector<1x4xf32>
    %44 = vector.broadcast %42 : vector<128x1xf32> to vector<128x4xf32>
    %45 = vector.broadcast %43 : vector<1x4xf32> to vector<128x4xf32>
    %46 = arith.mulf %44, %45 : vector<128x4xf32>
    %47 = arith.addf %41, %46 : vector<128x4xf32>
    %cst_18 = arith.constant 0.000000e+00 : f32
    %48 = vector.broadcast %cst_18 : f32 to vector<128x4xf32>
    %49 = arith.maximumf %47, %48 : vector<128x4xf32>
    %50 = vector.extract_strided_slice %49 {offsets = [0, 0], sizes = [128, 1], strides = [1, 1]} : vector<128x4xf32> to vector<128x1xf32>
    %51 = vector.extract_strided_slice %1 {offsets = [4, 0], sizes = [1, 2], strides = [1, 1]} : vector<16x512xf32> to vector<1x2xf32>
    %52 = vector.broadcast %50 : vector<128x1xf32> to vector<128x2xf32>
    %53 = vector.broadcast %51 : vector<1x2xf32> to vector<128x2xf32>
    %54 = arith.mulf %52, %53 : vector<128x2xf32>
    %55 = vector.extract_strided_slice %49 {offsets = [0, 1], sizes = [128, 1], strides = [1, 1]} : vector<128x4xf32> to vector<128x1xf32>
    %56 = vector.extract_strided_slice %1 {offsets = [5, 0], sizes = [1, 2], strides = [1, 1]} : vector<16x512xf32> to vector<1x2xf32>
    %57 = vector.broadcast %55 : vector<128x1xf32> to vector<128x2xf32>
    %58 = vector.broadcast %56 : vector<1x2xf32> to vector<128x2xf32>
    %59 = arith.mulf %57, %58 : vector<128x2xf32>
    %60 = arith.addf %54, %59 : vector<128x2xf32>
    %61 = vector.extract_strided_slice %49 {offsets = [0, 2], sizes = [128, 1], strides = [1, 1]} : vector<128x4xf32> to vector<128x1xf32>
    %62 = vector.extract_strided_slice %1 {offsets = [6, 0], sizes = [1, 2], strides = [1, 1]} : vector<16x512xf32> to vector<1x2xf32>
    %63 = vector.broadcast %61 : vector<128x1xf32> to vector<128x2xf32>
    %64 = vector.broadcast %62 : vector<1x2xf32> to vector<128x2xf32>
    %65 = arith.mulf %63, %64 : vector<128x2xf32>
    %66 = arith.addf %60, %65 : vector<128x2xf32>
    %67 = vector.extract_strided_slice %49 {offsets = [0, 3], sizes = [128, 1], strides = [1, 1]} : vector<128x4xf32> to vector<128x1xf32>
    %68 = vector.extract_strided_slice %1 {offsets = [7, 0], sizes = [1, 2], strides = [1, 1]} : vector<16x512xf32> to vector<1x2xf32>
    %69 = vector.broadcast %67 : vector<128x1xf32> to vector<128x2xf32>
    %70 = vector.broadcast %68 : vector<1x2xf32> to vector<128x2xf32>
    %71 = arith.mulf %69, %70 : vector<128x2xf32>
    %72 = arith.addf %66, %71 : vector<128x2xf32>
    %73 = vector.extract_strided_slice %1 {offsets = [8, 0], sizes = [1, 2], strides = [1, 1]} : vector<16x512xf32> to vector<1x2xf32>
    %74 = vector.broadcast %73 : vector<1x2xf32> to vector<128x2xf32>
    %75 = arith.addf %72, %74 : vector<128x2xf32>
    %cst_19 = arith.constant 0.000000e+00 : f32
    %76 = vector.broadcast %cst_19 : f32 to vector<128x2xf32>
    %77 = arith.maximumf %75, %76 : vector<128x2xf32>
    %78 = vector.extract_strided_slice %77 {offsets = [0, 0], sizes = [128, 1], strides = [1, 1]} : vector<128x2xf32> to vector<128x1xf32>
    %79 = vector.extract_strided_slice %1 {offsets = [9, 0], sizes = [1, 128], strides = [1, 1]} : vector<16x512xf32> to vector<1x128xf32>
    %80 = vector.broadcast %78 : vector<128x1xf32> to vector<128x128xf32>
    %81 = vector.broadcast %79 : vector<1x128xf32> to vector<128x128xf32>
    %82 = arith.mulf %80, %81 : vector<128x128xf32>
    %83 = vector.extract_strided_slice %77 {offsets = [0, 1], sizes = [128, 1], strides = [1, 1]} : vector<128x2xf32> to vector<128x1xf32>
    %84 = vector.extract_strided_slice %1 {offsets = [10, 0], sizes = [1, 128], strides = [1, 1]} : vector<16x512xf32> to vector<1x128xf32>
    %85 = vector.broadcast %83 : vector<128x1xf32> to vector<128x128xf32>
    %86 = vector.broadcast %84 : vector<1x128xf32> to vector<128x128xf32>
    %87 = arith.mulf %85, %86 : vector<128x128xf32>
    %88 = arith.addf %82, %87 : vector<128x128xf32>
    %89 = vector.extract_strided_slice %1 {offsets = [11, 0], sizes = [1, 128], strides = [1, 1]} : vector<16x512xf32> to vector<1x128xf32>
    %90 = vector.broadcast %89 : vector<1x128xf32> to vector<128x128xf32>
    %91 = arith.addf %88, %90 : vector<128x128xf32>
    %c0_20 = arith.constant 0 : index
    %c0_21 = arith.constant 0 : index
    %92 = vector.load %arg7[%c0_20, %c0_21] : memref<128x128xf32, #tpu.memory_space<vmem>>, vector<128x128xf32>
    tpu.vector_store %arg7[%c0_20, %c0_21], %91 {strides = array<i32>} : memref<128x128xf32, #tpu.memory_space<vmem>>, vector<128x128xf32>,
    return
  }
  func.func @transform_0(%arg0: i32) -> (i32, i32) {
    %c0_i32 = arith.constant 0 : i32
    %c0_i32_0 = arith.constant 0 : i32
    return %arg0, %c0_i32 : i32, i32
  }
  func.func @transform_1(%arg0: i32) -> (i32, i32) {
    %c0_i32 = arith.constant 0 : i32
    %c0_i32_0 = arith.constant 0 : i32
    %c0_i32_1 = arith.constant 0 : i32
    return %c0_i32, %c0_i32_0 : i32, i32
  }
  func.func @transform_2(%arg0: i32) -> (i32, i32) {
    %c0_i32 = arith.constant 0 : i32
    %c0_i32_0 = arith.constant 0 : i32
    %c0_i32_1 = arith.constant 0 : i32
    return %c0_i32, %c0_i32_0 : i32, i32
  }
  func.func @transform_3(%arg0: i32) -> (i32, i32) {
    %c0_i32 = arith.constant 0 : i32
    %c0_i32_0 = arith.constant 0 : i32
    %c0_i32_1 = arith.constant 0 : i32
    return %c0_i32, %c0_i32_0 : i32, i32
  }
  func.func @transform_4(%arg0: i32) -> (i32, i32) {
    %c0_i32 = arith.constant 0 : i32
    %c0_i32_0 = arith.constant 0 : i32
    %c0_i32_1 = arith.constant 0 : i32
    return %c0_i32, %c0_i32_0 : i32, i32
  }
  func.func @transform_5(%arg0: i32) -> (i32, i32) {
    %c0_i32 = arith.constant 0 : i32
    %c0_i32_0 = arith.constant 0 : i32
    %c0_i32_1 = arith.constant 0 : i32
    return %c0_i32, %c0_i32_0 : i32, i32
  }
  func.func @transform_6(%arg0: i32) -> (i32, i32) {
    %c0_i32 = arith.constant 0 : i32
    %c0_i32_0 = arith.constant 0 : i32
    return %arg0, %c0_i32 : i32, i32
  }
}

</mosaic_0001>

<bundles_post_ra>
// kernel: cvae_forward.1
= control target key start
LH: loop header
LB: loop body
LE: loop exit
PB: predicated region body
PF: predicated region fallthrough
CT: control target
= control target key end

     0   :  { %s6617_s21 = smov 0   ;;  %s10276_s0 = inlined_call_operand.vmem [shape: f32[256,384], index: 0, kind: input, shape index: {}]   ;;  %s10277_s1 = inlined_call_operand.vmem [shape: bf16[384,256], index: 1, kind: input, shape index: {}]   ;;  %s10278_s2 = inlined_call_operand.vmem [shape: bf16[256,512], index: 2, kind: input, shape index: {}]   ;;  %s10279_s3 = inlined_call_operand.vmem [shape: bf16[512,512], index: 3, kind: input, shape index: {}]   ;;  %s10280_s4 = inlined_call_operand.vmem [shape: f32[640,8], index: 4, kind: input, shape index: {}]   ;;  %s10281_s5 = inlined_call_operand.vmem [shape: f32[16,512], index: 5, kind: input, shape index: {}]   ;;  %s10282_s6 = inlined_call_operand.vmem [shape: f32[256,128], index: 6, kind: output, shape index: {}]  }
   0x1 LB: > { %s5132_s22 = sadd.s32 4294967295, %s6571_s21   ;;  %p5136_p0 = scmp.ge.s32.totalorder %s6571_s21, 1  ;;  %s6571_s21 = sphi %s6617_s21, %s16_s21  }
   0x2   : > { %p214_p1 = scmp.lt.s32.totalorder %s6571_s21, 3 }
   0x4   : > { %p215_p2 = pnand %p5136_p0, %p214_p1 }
   0x6   : > { %218 = sbr.rel (%p215_p2) target bundleno = 2216 (0x8a8), region = 44 }
   0xb   : > { %v5199_v0 = vld [vmem:[%s10277_s1 + $0x70] sm:$0xf]  ;;  %v6118_v1 = vld [vmem:[%s10277_s1 + $0x74] sm:$0xf0]  ;;  %v5191_v2 = vld [vmem:[%s10277_s1 + $0x60] sm:$0xf] }
   0xc   : > { %v5200_v3 = vor.u32 %v6118_v1, %v5199_v0  ;;  %v6116_v4 = vld [vmem:[%s10277_s1 + $0x64] sm:$0xf0]  ;;  %v5263_v5 = vld [vmem:[%s10277_s1 + $0xf0] sm:$0xf]  ;;  %v6134_v6 = vld [vmem:[%s10277_s1 + $0xf4] sm:$0xf0] }
   0xd   : > { %v5192_v7 = vor.u32 %v6116_v4, %v5191_v2  ;;  %v6643_v8 = vor.u32 %v6134_v6, %v5263_v5  ;;  %v5255_v9 = vld [vmem:[%s10277_s1 + $0xe0] sm:$0xf]  ;;  %v6132_v10 = vld [vmem:[%s10277_s1 + $0xe4] sm:$0xf0]  ;;  %v5183_v11 = vld [vmem:[%s10277_s1 + $0x50] sm:$0xf] }
   0xe   : > { %623 = vmatpush.bf16.msra.mxu0 %v5200_v3  ;;  %6343 = vmatpush.bf16.msra.mxu3 %v5200_v3  ;;  %v6114_v12 = vld [vmem:[%s10277_s1 + $0x54] sm:$0xf0]  ;;  %v6658_v13 = vor.u32 %v6132_v10, %v5255_v9  ;;  %v5247_v14 = vld [vmem:[%s10277_s1 + $0xd0] sm:$0xf]  ;;  %v5175_v17 = vld [vmem:[%s10277_s1 + $0x40] sm:$0xf] }
   0xf   : > { %6351 = vmatpush.bf16.msra.mxu1 %v6643_v8  ;;  %v6130_v15 = vld [vmem:[%s10277_s1 + $0xd4] sm:$0xf0]  ;;  %v5184_v16 = vor.u32 %v6114_v12, %v5183_v11  ;;  %v6112_v18 = vld [vmem:[%s10277_s1 + $0x44] sm:$0xf0]  ;;  %s5137_s29 = sshll.u32 %s5132_s22, 4  ;;  %s6574_s26 = smov 117  }
  0x10   : > { %v6673_v19 = vor.u32 %v6130_v15, %v5247_v14  ;;  %v5239_v20 = vld [vmem:[%s10277_s1 + $0xc0] sm:$0xf]  ;;  %v6128_v21 = vld [vmem:[%s10277_s1 + $0xc4] sm:$0xf0]  ;;  %v5176_v22 = vor.u32 %v6112_v18, %v5175_v17  ;;  %p246_p3 = scmp.lt.s32.totalorder %s5137_s29, 31  ;;  %s6577_s30 = smov 4  }
  0x11   : > { %v5167_v23 = vld [vmem:[%s10277_s1 + $0x30] sm:$0xf]  ;;  %v6110_v24 = vld [vmem:[%s10277_s1 + $0x34] sm:$0xf0]  ;;  %v6690_v25 = vor.u32 %v6128_v21, %v5239_v20  ;;  %v5159_v29 = vld [vmem:[%s10277_s1 + $0x20] sm:$0xf] }
  0x12   : > { %624 = vmatpush.bf16.msra.mxu0 %v5192_v7  ;;  %6344 = vmatpush.bf16.msra.mxu3 %v5192_v7  ;;  %v5231_v26 = vld [vmem:[%s10277_s1 + $0xb0] sm:$0xf]  ;;  %v6126_v27 = vld [vmem:[%s10277_s1 + $0xb4] sm:$0xf0]  ;;  %v5168_v28 = vor.u32 %v6110_v24, %v5167_v23  ;;  %s10316_s29 = smov (!%p246_p3, %s5137_s29), 31 }
  0x13   : > { %6352 = vmatpush.bf16.msra.mxu1 %v6658_v13  ;;  %v6108_v30 = vld [vmem:[%s10277_s1 + $0x24] sm:$0xf0]  ;;  %v6707_v31 = vor.u32 %v6126_v27, %v5231_v26  ;;  %v5223_v32 = vld [vmem:[%s10277_s1 + $0xa0] sm:$0xf]  ;;  %s6367_s27 = smul.u32 24, %s10316_s29  ;;  %s5140_s9 = sshll.u32 %s10316_s29, 3 }
  0x14   : > { %v6124_v33 = vld [vmem:[%s10277_s1 + $0xa4] sm:$0xf0]  ;;  %v5160_v34 = vor.u32 %v6108_v30, %v5159_v29  ;;  %v5151_v35 = vld [vmem:[%s10277_s1 + $0x10] sm:$0xf]  ;;  %v6106_v36 = vld [vmem:[%s10277_s1 + $0x14] sm:$0xf0]  ;;  %s10192_s12 = scalar_lea.vmem %s10282_s6, %s5140_s9 }
  0x15   : > { %v6723_v37 = vor.u32 %v6124_v33, %v5223_v32  ;;  %v5215_v38 = vld [vmem:[%s10277_s1 + $0x90] sm:$0xf]  ;;  %v6122_v39 = vld [vmem:[%s10277_s1 + $0x94] sm:$0xf0]  ;;  %v5152_v40 = vor.u32 %v6106_v36, %v5151_v35  ;;  %s6734_s14 = scalar_lea.vmem %s10276_s0, %s6367_s27  ;;  %v5143_v41 = vld [vmem:[%s10277_s1] sm:$0xf] }
  0x16   : > { %625 = vmatpush.bf16.msra.mxu0 %v5184_v16  ;;  %6345 = vmatpush.bf16.msra.mxu3 %v5184_v16  ;;  %v6104_v42 = vld [vmem:[%s10277_s1 + $0x4] sm:$0xf0]  ;;  %v6743_v43 = vor.u32 %v6122_v39, %v5215_v38  ;;  %v258_v44 = vld [vmem:[%s6734_s14] sm:$0xff]  ;;  %v261_v48 = vld [vmem:[%s6734_s14 + $0x18] sm:$0xff] }
  0x17   : > { %6353 = vmatpush.bf16.msra.mxu1 %v6673_v19  ;;  %v5207_v45 = vld [vmem:[%s10277_s1 + $0x80] sm:$0xf]  ;;  %v6120_v46 = vld [vmem:[%s10277_s1 + $0x84] sm:$0xf0]  ;;  %v5144_v47 = vor.u32 %v6104_v42, %v5143_v41  ;;  %v273_v50 = vld [vmem:[%s6734_s14 + $0x78] sm:$0xff]  ;;  %v6760_v54 = vpack.c.bf16 %v261_v48, %v258_v44 }
  0x18   : > { %v270_v49 = vld [vmem:[%s6734_s14 + $0x60] sm:$0xff]  ;;  %v6756_v51 = vor.u32 %v6120_v46, %v5207_v45  ;;  %v271_v52 = vld [vmem:[%s6734_s14 + $0x68] sm:$0xff]  ;;  %v5327_v57 = vld [vmem:[%s10277_s1 + $0x170] sm:$0xf] }
  0x19   : > { %v274_v53 = vld [vmem:[%s6734_s14 + $0x80] sm:$0xff]  ;;  %v6762_v55 = vpack.c.bf16 %v273_v50, %v270_v49  ;;  %v6150_v58 = vld [vmem:[%s10277_s1 + $0x174] sm:$0xf0]  ;;  %v6148_v61 = vld [vmem:[%s10277_s1 + $0x164] sm:$0xf0] }
  0x1a   : > { %626 = vmatpush.bf16.msra.mxu0 %v5176_v22  ;;  %6346 = vmatpush.bf16.msra.mxu3 %v5176_v22  ;;  %v6765_v56 = vpack.c.bf16 %v274_v53, %v271_v52  ;;  %v5328_v59 = vor.u32 %v6150_v58, %v5327_v57  ;;  %v5319_v60 = vld [vmem:[%s10277_s1 + $0x160] sm:$0xf]  ;;  %v5311_v63 = vld [vmem:[%s10277_s1 + $0x150] sm:$0xf]  ;;  %v6146_v0 = vld [vmem:[%s10277_s1 + $0x154] sm:$0xf0] }
  0x1b   : > { %6354 = vmatpush.bf16.msra.mxu1 %v6690_v25  ;;  %v5320_v62 = vor.u32 %v6148_v61, %v5319_v60  ;;  %v6790_v1 = vor.u32 %v6146_v0, %v5311_v63  ;;  %v5303_v2 = vld [vmem:[%s10277_s1 + $0x140] sm:$0xf]  ;;  %v6144_v3 = vld [vmem:[%s10277_s1 + $0x144] sm:$0xf0]  ;;  %v264_v4 = vld [vmem:[%s6734_s14 + $0x30] sm:$0xff] }
  0x1c   : > { %6359 = vmatpush.bf16.msra.mxu2 %v5328_v59  ;;  %v267_v5 = vld [vmem:[%s6734_s14 + $0x48] sm:$0xff]  ;;  %v276_v6 = vld [vmem:[%s6734_s14 + $0x90] sm:$0xff]  ;;  %v277_v9 = vld [vmem:[%s6734_s14 + $0x98] sm:$0xff] }
  0x1d   : > { %v279_v7 = vld [vmem:[%s6734_s14 + $0xa8] sm:$0xff]  ;;  %v280_v10 = vld [vmem:[%s6734_s14 + $0xb0] sm:$0xff]  ;;  %v6809_v11 = vpack.c.bf16 %v267_v5, %v264_v4  ;;  %v6142_v15 = vld [vmem:[%s10277_s1 + $0x134] sm:$0xf0] }
  0x1e   : > { %627 = vmatpush.bf16.msra.mxu0 %v5168_v28  ;;  %6347 = vmatpush.bf16.msra.mxu3 %v5168_v28  ;;  %v6811_v12 = vpack.c.bf16 %v279_v7, %v276_v6  ;;  %v5295_v14 = vld [vmem:[%s10277_s1 + $0x130] sm:$0xf]  ;;  %v5287_v17 = vld [vmem:[%s10277_s1 + $0x120] sm:$0xf]  ;;  %v6140_v18 = vld [vmem:[%s10277_s1 + $0x124] sm:$0xf0] }
  0x1f   : > { %6355 = vmatpush.bf16.msra.mxu1 %v6707_v31  ;;  %v6823_v16 = vor.u32 %v6142_v15, %v5295_v14  ;;  %v5279_v20 = vld [vmem:[%s10277_s1 + $0x110] sm:$0xf]  ;;  %v6138_v21 = vld [vmem:[%s10277_s1 + $0x114] sm:$0xf0]  ;;  %v5271_v23 = vld [vmem:[%s10277_s1 + $0x100] sm:$0xf] }
  0x20   : > { %6360 = vmatpush.bf16.msra.mxu2 %v5320_v62  ;;  %v6845_v22 = vor.u32 %v6138_v21, %v5279_v20  ;;  %v6136_v24 = vld [vmem:[%s10277_s1 + $0x104] sm:$0xf0]  ;;  %v285_v26 = vld [vmem:[%s6734_s14 + $0xd8] sm:$0xff]  ;;  %v262_v28 = vld [vmem:[%s6734_s14 + $0x20] sm:$0xff] }
  0x21   : > { %v259_v27 = vld [vmem:[%s6734_s14 + $0x8] sm:$0xff]  ;;  %v6859_v29 = vor.u32 %v6136_v24, %v5271_v23  ;;  %v5201_v38 = vld [vmem:[%s10277_s1 + $0x78] sm:$0xf0]  ;;  %v6115_v41 = vld [vmem:[%s10277_s1 + $0x64] sm:$0xf] }
  0x22   : > { %628 = vmatpush.bf16.msra.mxu0 %v5160_v34  ;;  %6348 = vmatpush.bf16.msra.mxu3 %v5160_v34  ;;  %v283_v30 = vld [vmem:[%s6734_s14 + $0xc8] sm:$0xff]  ;;  %v6866_v33 = vpack.c.bf16 %v262_v28, %v259_v27  ;;  %v272_v34 = vld [vmem:[%s6734_s14 + $0x70] sm:$0xff]  ;;  %v5185_v45 = vld [vmem:[%s10277_s1 + $0x58] sm:$0xf0] }
  0x23   : > { %6356 = vmatpush.bf16.msra.mxu1 %v6723_v37  ;;  %v275_v36 = vld [vmem:[%s6734_s14 + $0x88] sm:$0xff]  ;;  %v6113_v44 = vld [vmem:[%s10277_s1 + $0x54] sm:$0xf]  ;;  %v6147_v50 = vld [vmem:[%s10277_s1 + $0x164] sm:$0xf] }
  0x24   : > { %6361 = vmatpush.bf16.msra.mxu2 %v6790_v1  ;;  %v6879_v39 = vpack.c.bf16 %v275_v36, %v272_v34  ;;  %v5193_v42 = vld [vmem:[%s10277_s1 + $0x68] sm:$0xf0]  ;;  %v6149_v46 = vld [vmem:[%s10277_s1 + $0x174] sm:$0xf]  ;;  %v5188_v49 = vor.u32 %v6113_v44, %v5185_v45  ;;  %v6111_v52 = vld [vmem:[%s10277_s1 + $0x44] sm:$0xf] }
  0x25   : > { %v5177_v53 = vld [vmem:[%s10277_s1 + $0x48] sm:$0xf0]  ;;  %v288_v58 = vld [vmem:[%s6734_s14 + $0xf0] sm:$0xff]  ;;  %v265_v60 = vld [vmem:[%s6734_s14 + $0x38] sm:$0xff] }
  0x26   : > { %629 = vmatpush.bf16.msra.mxu0 %v5152_v40  ;;  %6349 = vmatpush.bf16.msra.mxu3 %v5152_v40  ;;  %v268_v61 = vld [vmem:[%s6734_s14 + $0x50] sm:$0xff]  ;;  %v289_v63 = vld [vmem:[%s6734_s14 + $0xf8] sm:$0xff]  ;;  %v6107_v15 = vld [vmem:[%s10277_s1 + $0x24] sm:$0xf] }
  0x27   : > { %6357 = vmatpush.bf16.msra.mxu1 %v6743_v43  ;;  %v292_v0 = vld [vmem:[%s6734_s14 + $0x110] sm:$0xff]  ;;  %v281_v5 = vld [vmem:[%s6734_s14 + $0xb8] sm:$0xff]  ;;  %v6143_v21 = vld [vmem:[%s10277_s1 + $0x144] sm:$0xf] }
  0x28   : > { %v6929_v4 = vpack.c.bf16 %v292_v0, %v289_v63  ;;  %v6109_v6 = vld [vmem:[%s10277_s1 + $0x34] sm:$0xf]  ;;  %v5169_v7 = vld [vmem:[%s10277_s1 + $0x38] sm:$0xf0]  ;;  %v5305_v23 = vld [vmem:[%s10277_s1 + $0x148] sm:$0xf0] }
  0x29   : > { %v5313_v14 = vld [vmem:[%s10277_s1 + $0x158] sm:$0xf0]  ;;  %v5308_v24 = vor.u32 %v6143_v21, %v5305_v23  ;;  %v6141_v28 = vld [vmem:[%s10277_s1 + $0x134] sm:$0xf]  ;;  %v6103_v36 = vld [vmem:[%s10277_s1 + $0x4] sm:$0xf] }
  0x2a   : > { %630 = vmatpush.bf16.msra.mxu0 %v5144_v47  ;;  %6350 = vmatpush.bf16.msra.mxu3 %v5144_v47  ;;  %v5329_v47 = vld [vmem:[%s10277_s1 + $0x178] sm:$0xf0]  ;;  %v5289_v44 = vld [vmem:[%s10277_s1 + $0x128] sm:$0xf0]  ;;  %v260_v45 = vld [vmem:[%s6734_s14 + $0x10] sm:$0xff] }
  0x2b   : > { %6358 = vmatpush.bf16.msra.mxu1 %v6756_v51  ;;  %v5332_v48 = vor.u32 %v6149_v46, %v5329_v47  ;;  %v263_v46 = vld [vmem:[%s6734_s14 + $0x28] sm:$0xff]  ;;  %v6137_v0 = vld [vmem:[%s10277_s1 + $0x114] sm:$0xf] }
  0x2c   : > { %v5241_v63 = vld [vmem:[%s10277_s1 + $0xc8] sm:$0xf0]  ;;  %v300_v23 = vld [vmem:[%s6734_s14 + $0x150] sm:$0xff] }
  0x2d   : > { %631 = vmatmul.bf16.vlgmr.msra.gmra.mxu0 %v6760_v54  ;;  %641 = vmatmul.bf16.vlgmr.msra.gmra.mxu3 %v6762_v55  ;;  %v5225_v21 = vld [vmem:[%s10277_s1 + $0xa8] sm:$0xf0] }
  0x2e   : > { %672 = vmatpush.bf16.msrb.mxu0 %v6643_v8  ;;  %690 = vmatmul.bf16.vlgmr.msra.gmra.mxu1 %v6765_v56  ;;  %v6804_v8 = vor.u32 %v6144_v3, %v5303_v2  ;;  %v6926_v2 = vpack.c.bf16 %v268_v61, %v265_v60  ;;  %v278_v3 = vld [vmem:[%s6734_s14 + $0xa0] sm:$0xff] }
  0x2f   : > { %868 = vmatpush.bf16.msrb.mxu1 %v5332_v48  ;;  %v5249_v48 = vld [vmem:[%s10277_s1 + $0xd8] sm:$0xf0]  ;;  %v6127_v60 = vld [vmem:[%s10277_s1 + $0xc4] sm:$0xf] }
  0x30   : > { %6362 = vmatpush.bf16.msra.mxu2 %v6804_v8 }
  0x32   : > { %673 = vmatpush.bf16.msrb.mxu0 %v6658_v13  ;;  %v6815_v13 = vpack.c.bf16 %v280_v10, %v277_v9  ;;  %v5172_v9 = vor.u32 %v6109_v6, %v5169_v7  ;;  %v6145_v10 = vld [vmem:[%s10277_s1 + $0x154] sm:$0xf]  ;;  %v6135_v6 = vld [vmem:[%s10277_s1 + $0x104] sm:$0xf]  ;;  %v5273_v7 = vld [vmem:[%s10277_s1 + $0x108] sm:$0xf0] }
  0x34   : > { %6363 = vmatpush.bf16.msra.mxu2 %v6823_v16 }
  0x36   : > { %674 = vmatpush.bf16.msrb.mxu0 %v6673_v19  ;;  %v6834_v19 = vor.u32 %v6140_v18, %v5287_v17  ;;  %v6133_v17 = vld [vmem:[%s10277_s1 + $0xf4] sm:$0xf]  ;;  %v5265_v18 = vld [vmem:[%s10277_s1 + $0xf8] sm:$0xf0] }
  0x37   : > { %v5268_v27 = vor.u32 %v6133_v17, %v5265_v18  ;;  %v5276_v17 = vor.u32 %v6135_v6, %v5273_v7 }
  0x38   : > { %6364 = vmatpush.bf16.msra.mxu2 %v6834_v19 }
  0x3a   : > { %675 = vmatpush.bf16.msrb.mxu0 %v6690_v25  ;;  %v282_v25 = vld [vmem:[%s6734_s14 + $0xc0] sm:$0xff] }
  0x3b   : > { %v6864_v32 = vpack.c.bf16 %v285_v26, %v282_v25  ;;  %v6105_v25 = vld [vmem:[%s10277_s1 + $0x14] sm:$0xf]  ;;  %v5153_v26 = vld [vmem:[%s10277_s1 + $0x18] sm:$0xf0] }
  0x3c   : > { %6365 = vmatpush.bf16.msra.mxu2 %v6845_v22  ;;  %v5156_v34 = vor.u32 %v6105_v25, %v5153_v26  ;;  %v266_v25 = vld [vmem:[%s6734_s14 + $0x40] sm:$0xff]  ;;  %v269_v26 = vld [vmem:[%s6734_s14 + $0x58] sm:$0xff] }
  0x3d   : > { %636 = vmatmul.bf16.gmra.mxu0 %v6809_v11  ;;  %646 = vmatmul.bf16.gmra.mxu3 %v6811_v12 }
  0x3e   : > { %676 = vmatpush.bf16.msrb.mxu0 %v6707_v31  ;;  %695 = vmatmul.bf16.gmra.mxu1 %v6815_v13  ;;  %v286_v31 = vld [vmem:[%s6734_s14 + $0xe0] sm:$0xff] }
  0x3f   : > { %v6870_v35 = vpack.c.bf16 %v286_v31, %v283_v30  ;;  %v6131_v30 = vld [vmem:[%s10277_s1 + $0xe4] sm:$0xf]  ;;  %v5257_v31 = vld [vmem:[%s10277_s1 + $0xe8] sm:$0xf0] }
  0x40   : > { %6366 = vmatpush.bf16.msra.mxu2 %v6859_v29 }
  0x42   : > { %677 = vmatpush.bf16.msrb.mxu0 %v6723_v37  ;;  %v6117_v37 = vld [vmem:[%s10277_s1 + $0x74] sm:$0xf] }
  0x43   : > { %v5204_v40 = vor.u32 %v6117_v37, %v5201_v38  ;;  %739 = vmatmul.bf16.vlgmr.msra.gmra.mxu2 %v6879_v39  ;;  %v5145_v37 = vld [vmem:[%s10277_s1 + $0x8] sm:$0xf0]  ;;  %v294_v38 = vld [vmem:[%s6734_s14 + $0x120] sm:$0xff] }
  0x44   : > { %v5148_v47 = vor.u32 %v6103_v36, %v5145_v37  ;;  %v304_v36 = vld [vmem:[%s6734_s14 + $0x170] sm:$0xff] }
  0x45   : > { %770 = vmatpush.bf16.msrb.mxu3 %v5204_v40 }
  0x46   : > { %678 = vmatpush.bf16.msrb.mxu0 %v6743_v43  ;;  %v5196_v43 = vor.u32 %v6115_v41, %v5193_v42  ;;  %v297_v41 = vld [vmem:[%s6734_s14 + $0x138] sm:$0xff]  ;;  %v5260_v42 = vor.u32 %v6131_v30, %v5257_v31  ;;  %v290_v30 = vld [vmem:[%s6734_s14 + $0x100] sm:$0xff] }
  0x47   : > { %v293_v31 = vld [vmem:[%s6734_s14 + $0x118] sm:$0xff] }
  0x49   : > { %771 = vmatpush.bf16.msrb.mxu3 %v5196_v43  ;;  %v6139_v43 = vld [vmem:[%s10277_s1 + $0x124] sm:$0xf] }
  0x4a   : > { %679 = vmatpush.bf16.msrb.mxu0 %v6756_v51  ;;  %v5321_v51 = vld [vmem:[%s10277_s1 + $0x168] sm:$0xf0] }
  0x4b   : > { %v5324_v57 = vor.u32 %v6147_v50, %v5321_v51  ;;  %v287_v50 = vld [vmem:[%s6734_s14 + $0xe8] sm:$0xff] }
  0x4c   : > { %v295_v51 = vld [vmem:[%s6734_s14 + $0x128] sm:$0xff] }
  0x4d   : > { %651 = vmatmul.bf16.gmra.mxu3 %v6864_v32  ;;  %680 = vmatmul.bf16.vlgmr.msrb.gmra.mxu0 %v6866_v33 }
  0x4e   : > { %721 = vmatpush.bf16.msra.mxu0 %v5328_v59  ;;  %700 = vmatmul.bf16.gmra.mxu1 %v6870_v35  ;;  %v291_v59 = vld [vmem:[%s6734_s14 + $0x108] sm:$0xff] }
  0x4f   : > { %772 = vmatpush.bf16.msrb.mxu3 %v5188_v49  ;;  %869 = vmatpush.bf16.msrb.mxu1 %v5324_v57  ;;  %v284_v49 = vld [vmem:[%s6734_s14 + $0xd0] sm:$0xff]  ;;  %v7015_v57 = vpack.c.bf16 %v297_v41, %v294_v38  ;;  %v316_v38 = vpack.c.bf16 %v269_v26, %v266_v25  ;;  %v7079_v41 = vpack.c.bf16 %v293_v31, %v290_v30 }
  0x50   : > { %v7022_v61 = vpack.c.bf16 %v287_v50, %v284_v49  ;;  %v299_v49 = vld [vmem:[%s6734_s14 + $0x148] sm:$0xff]  ;;  %v5449_v30 = vld [vmem:[%s10278_s2 + $0xf0] sm:$0xf0] }
  0x52   : > { %722 = vmatpush.bf16.msra.mxu0 %v5320_v62  ;;  %v5180_v62 = vor.u32 %v6111_v52, %v5177_v53  ;;  %v298_v52 = vld [vmem:[%s6734_s14 + $0x140] sm:$0xff]  ;;  %v5292_v53 = vor.u32 %v6139_v43, %v5289_v44  ;;  %v5209_v44 = vld [vmem:[%s10277_s1 + $0x88] sm:$0xf0] }
  0x53   : > { %v6119_v43 = vld [vmem:[%s10277_s1 + $0x84] sm:$0xf] }
  0x54   : > { %773 = vmatpush.bf16.msrb.mxu3 %v5180_v62  ;;  %v7024_v62 = vpack.c.bf16 %v298_v52, %v295_v51  ;;  %v5415_v51 = vld [vmem:[%s10278_s2 + $0xa0] sm:$0xf]  ;;  %v6173_v52 = vld [vmem:[%s10278_s2 + $0xac] sm:$0xf0] }
  0x56   : > { %723 = vmatpush.bf16.msra.mxu0 %v6790_v1  ;;  %v6924_v1 = vpack.c.bf16 %v291_v59, %v288_v58  ;;  %v7017_v58 = vpack.c.bf16 %v263_v46, %v260_v45  ;;  %v5212_v45 = vor.u32 %v6119_v43, %v5209_v44  ;;  %v5431_v46 = vld [vmem:[%s10278_s2 + $0xc0] sm:$0xf]  ;;  %v6175_v44 = vld [vmem:[%s10278_s2 + $0xc4] sm:$0xf] }
  0x58   : > { %774 = vmatpush.bf16.msrb.mxu3 %v5172_v9  ;;  %v5244_v9 = vor.u32 %v6127_v60, %v5241_v63  ;;  %v305_v60 = vld [vmem:[%s6734_s14 + $0x178] sm:$0xff] }
  0x5a   : > { %724 = vmatpush.bf16.msra.mxu0 %v6804_v8  ;;  %v6939_v8 = vpack.c.bf16 %v281_v5, %v278_v3  ;;  %v5281_v3 = vld [vmem:[%s10277_s1 + $0x118] sm:$0xf0] }
  0x5b   : > { %v5284_v5 = vor.u32 %v6137_v0, %v5281_v3  ;;  %v5383_v0 = vld [vmem:[%s10278_s2 + $0x60] sm:$0xf] }
  0x5c   : > { %744 = vmatmul.bf16.gmra.mxu2 %v6939_v8 }
  0x5d   : > { %656 = vmatmul.bf16.gmra.mxu3 %v6924_v1  ;;  %685 = vmatmul.bf16.gmra.mxu0 %v6926_v2 }
  0x5e   : > { %725 = vmatpush.bf16.msra.mxu0 %v6823_v16  ;;  %v5161_v16 = vld [vmem:[%s10277_s1 + $0x28] sm:$0xf0]  ;;  %705 = vmatmul.bf16.gmra.mxu1 %v6929_v4 }
  0x5f   : > { %v5164_v20 = vor.u32 %v6107_v15, %v5161_v16  ;;  %v5447_v15 = vld [vmem:[%s10278_s2 + $0xe0] sm:$0xf]  ;;  %v6181_v16 = vld [vmem:[%s10278_s2 + $0xec] sm:$0xf0] }
  0x60   : > { %v5448_v18 = vor.u32 %v6181_v16, %v5447_v15 }
  0x61   : > { %775 = vmatpush.bf16.msrb.mxu3 %v5164_v20  ;;  %v6123_v20 = vld [vmem:[%s10277_s1 + $0xa4] sm:$0xf] }
  0x62   : > { %726 = vmatpush.bf16.msra.mxu0 %v6834_v19  ;;  %v5316_v19 = vor.u32 %v6145_v10, %v5313_v14  ;;  %v6125_v10 = vld [vmem:[%s10277_s1 + $0xb4] sm:$0xf]  ;;  %v5233_v14 = vld [vmem:[%s10277_s1 + $0xb8] sm:$0xf0]  ;;  %1353 = vmatpush.bf16.msrb.mxu2 %v5448_v18 }
  0x64   : > { %870 = vmatpush.bf16.msrb.mxu1 %v5316_v19  ;;  %v5236_v19 = vor.u32 %v6125_v10, %v5233_v14  ;;  %v5367_v10 = vld [vmem:[%s10278_s2 + $0x40] sm:$0xf]  ;;  %v6161_v14 = vld [vmem:[%s10278_s2 + $0x4c] sm:$0xf0] }
  0x65   : > { %776 = vmatpush.bf16.msrb.mxu3 %v5156_v34  ;;  %v301_v34 = vld [vmem:[%s6734_s14 + $0x158] sm:$0xff]  ;;  %v5368_v16 = vor.u32 %v6161_v14, %v5367_v10 }
  0x66   : > { %727 = vmatpush.bf16.msra.mxu0 %v6845_v22  ;;  %v5297_v22 = vld [vmem:[%s10277_s1 + $0x138] sm:$0xf0] }
  0x67   : > { %v5300_v40 = vor.u32 %v6141_v28, %v5297_v22  ;;  %v6121_v28 = vld [vmem:[%s10277_s1 + $0x94] sm:$0xf]  ;;  %v5217_v22 = vld [vmem:[%s10277_s1 + $0x98] sm:$0xf0] }
  0x68   : > { %871 = vmatpush.bf16.msrb.mxu1 %v5308_v24  ;;  %v303_v24 = vld [vmem:[%s6734_s14 + $0x168] sm:$0xff] }
  0x69   : > { %777 = vmatpush.bf16.msrb.mxu3 %v5148_v47  ;;  %v7077_v37 = vpack.c.bf16 %v303_v24, %v300_v23 }
  0x6a   : > { %728 = vmatpush.bf16.msra.mxu0 %v6859_v29  ;;  %v6129_v29 = vld [vmem:[%s10277_s1 + $0xd4] sm:$0xf] }
  0x6b   : > { %v5252_v59 = vor.u32 %v6129_v29, %v5249_v48  ;;  %v6177_v29 = vld [vmem:[%s10278_s2 + $0xcc] sm:$0xf0] }
  0x6c   : > { %872 = vmatpush.bf16.msrb.mxu1 %v5300_v40  ;;  %749 = vmatmul.bf16.gmra.mxu2 %v7022_v61  ;;  %v5220_v40 = vor.u32 %v6121_v28, %v5217_v22  ;;  %v5432_v47 = vor.u32 %v6177_v29, %v5431_v46  ;;  %v296_v48 = vld [vmem:[%s6734_s14 + $0x130] sm:$0xff]  ;;  %v6179_v22 = vld [vmem:[%s10278_s2 + $0xe4] sm:$0xf] }
  0x6d   : > { %661 = vmatmul.bf16.gmra.mxu3 %v7015_v57  ;;  %729 = vmatmul.bf16.vlgmr.msra.gmra.mxu0 %v7017_v58  ;;  %v7100_v50 = vpack.c.bf16 %v299_v49, %v296_v48 }
  0x6e   : > { %819 = vmatpush.bf16.msrb.mxu0 %v5268_v27  ;;  %710 = vmatmul.bf16.gmra.mxu1 %v7024_v62  ;;  %v5228_v27 = vor.u32 %v6123_v20, %v5225_v21  ;;  %v6157_v20 = vld [vmem:[%s10278_s2 + $0x2c] sm:$0xf0] }
  0x6f   : > { %1354 = vmatpush.bf16.msrb.mxu2 %v5432_v47 }
  0x70   : > { %873 = vmatpush.bf16.msrb.mxu1 %v5292_v53  ;;  %v5416_v53 = vor.u32 %v6173_v52, %v5415_v51  ;;  %v5417_v51 = vld [vmem:[%s10278_s2 + $0xb0] sm:$0xf0] }
  0x72   : > { %820 = vmatpush.bf16.msrb.mxu0 %v5260_v42  ;;  %v7081_v42 = vpack.c.bf16 %v304_v36, %v301_v34  ;;  %v5452_v34 = vor.u32 %v6179_v22, %v5449_v30  ;;  %v5335_v36 = vld [vmem:[%s10278_s2] sm:$0xf] }
  0x73   : > { %1355 = vmatpush.bf16.msrb.mxu2 %v5416_v53 }
  0x74   : > { %874 = vmatpush.bf16.msrb.mxu1 %v5284_v5 }
  0x76   : > { %821 = vmatpush.bf16.msrb.mxu0 %v5252_v59  ;;  %v302_v59 = vld [vmem:[%s6734_s14 + $0x160] sm:$0xff] }
  0x77   : > { %v7114_v63 = vpack.c.bf16 %v305_v60, %v302_v59  ;;  %v5559_v60 = vld [vmem:[%s10278_s2 + $0x1c0] sm:$0xf] }
  0x78   : > { %875 = vmatpush.bf16.msrb.mxu1 %v5276_v17 }
  0x7a   : > { %822 = vmatpush.bf16.msrb.mxu0 %v5244_v9 }
  0x7c   : > { %754 = vmatmul.bf16.gmra.mxu2 %v7079_v41 }
  0x7d   : > { %666 = vmatmul.bf16.gmra.mxu3 %v7077_v37  ;;  %734 = vmatmul.bf16.gmra.mxu0 %v316_v38 }
  0x7e   : > { %823 = vmatpush.bf16.msrb.mxu0 %v5236_v19  ;;  %715 = vmatmul.bf16.gmra.mxu1 %v7081_v42  ;;  %v5351_v19 = vld [vmem:[%s10278_s2 + $0x20] sm:$0xf] }
  0x7f   : > { %v5352_v23 = vor.u32 %v6157_v20, %v5351_v19 }
  0x82   : > { %824 = vmatpush.bf16.msrb.mxu0 %v5228_v27 }
  0x86   : > { %825 = vmatpush.bf16.msrb.mxu0 %v5220_v40  ;;  %v6211_v40 = vld [vmem:[%s10278_s2 + $0x1e4] sm:$0xf] }
  0x8a   : > { %826 = vmatpush.bf16.msrb.mxu0 %v5212_v45  ;;  %v5433_v45 = vld [vmem:[%s10278_s2 + $0xd0] sm:$0xf0] }
  0x8b   : > { %v5436_v29 = vor.u32 %v6175_v44, %v5433_v45  ;;  %v6203_v45 = vld [vmem:[%s10278_s2 + $0x1a4] sm:$0xf] }
  0x8c   : > { %759 = vmatmul.bf16.gmra.mxu2 %v7100_v50 }
  0x8d   : > { %778 = vmatmul.bf16.vlgmr.msrb.gmra.mxu3 %v6760_v54  ;;  %827 = vmatmul.bf16.vlgmr.msrb.gmra.mxu0 %v6866_v33  ;;  %v5399_v54 = vld [vmem:[%s10278_s2 + $0x80] sm:$0xf]  ;;  %v6169_v33 = vld [vmem:[%s10278_s2 + $0x8c] sm:$0xf0] }
  0x8e   : > { %876 = vmatmul.bf16.vlgmr.msrb.gmra.mxu1 %v7017_v58  ;;  %v5400_v58 = vor.u32 %v6169_v33, %v5399_v54  ;;  %1451 = vmatpush.bf16.msra.mxu0 %v5452_v34  ;;  %v6209_v54 = vld [vmem:[%s10278_s2 + $0x1cc] sm:$0xf0]  ;;  %v6167_v33 = vld [vmem:[%s10278_s2 + $0x84] sm:$0xf] }
  0x90   : > { %1356 = vmatpush.bf16.msrb.mxu2 %v5400_v58 }
  0x92   : > { %1452 = vmatpush.bf16.msra.mxu0 %v5436_v29 }
  0x9c   : > { %764 = vmatmul.bf16.gmra.mxu2 %v7114_v63 }
  0x9d   : > { %783 = vmatmul.bf16.gmra.mxu3 %v6809_v11  ;;  %832 = vmatmul.bf16.gmra.mxu0 %v6926_v2  ;;  %v6165_v11 = vld [vmem:[%s10278_s2 + $0x6c] sm:$0xf0] }
  0x9e   : > { %881 = vmatmul.bf16.gmra.mxu1 %v316_v38  ;;  %v5384_v2 = vor.u32 %v6165_v11, %v5383_v0  ;;  %v6153_v38 = vld [vmem:[%s10278_s2 + $0xc] sm:$0xf0]  ;;  %v5560_v0 = vor.u32 %v6209_v54, %v5559_v60  ;;  %v5401_v11 = vld [vmem:[%s10278_s2 + $0x90] sm:$0xf0] }
  0x9f   : > { %v5336_v43 = vor.u32 %v6153_v38, %v5335_v36 }
  0xa0   : > { %1357 = vmatpush.bf16.msrb.mxu2 %v5384_v2 }
  0xa4   : > { %1358 = vmatpush.bf16.msrb.mxu2 %v5368_v16 }
  0xa8   : > { %1359 = vmatpush.bf16.msrb.mxu2 %v5352_v23  ;;  %v5561_v23 = vld [vmem:[%s10278_s2 + $0x1d0] sm:$0xf0] }
  0xaa   : > { %v7131_v3 = vpop.f32.mrf.mxu0 }
  0xab   : > { %v691_v5 = vpop.f32.mrf.mxu1 }
  0xac   : > { %1360 = vmatpush.bf16.msrb.mxu2 %v5336_v43  ;;  %v6205_v43 = vld [vmem:[%s10278_s2 + $0x1ac] sm:$0xf0] }
  0xad   : > { %788 = vmatmul.bf16.gmra.mxu3 %v6762_v55  ;;  %837 = vmatmul.bf16.gmra.mxu0 %v6765_v56 }
  0xae   : > { %886 = vmatmul.bf16.gmra.mxu1 %v6879_v39 }
  0xb0   : > { %v642_v6 = vpop.f32.mrf.mxu3 }
  0xb1   : > { %v692_v7 = vadd.f32 %v691_v5, %v642_v6  ;;  %v5455_v5 = vld [vmem:[%s10278_s2 + $0xe8] sm:$0xf]  ;;  %v6182_v6 = vld [vmem:[%s10278_s2 + $0xf4] sm:$0xf0] }
  0xb2   : > { %v7136_v9 = vpop.f32.mrf.mxu0  ;;  %v5456_v16 = vor.u32 %v6182_v6, %v5455_v5 }
  0xb3   : > { %v693_v15 = vpop.f32.mrf.mxu1 }
  0xb4   : > { %1549 = vmatpush.bf16.msra.mxu2 %v5456_v16 }
  0xb8   : > { %v644_v55 = vpop.f32.mrf.mxu3 }
  0xb9   : > { %v7144_v17 = vadd.f32 %v693_v15, %v644_v55  ;;  %v6163_v55 = vld [vmem:[%s10278_s2 + $0x64] sm:$0xf] }
  0xba   : > { %v7146_v56 = vpop.f32.mrf.mxu0 }
  0xbb   : > { %v696_v39 = vpop.f32.mrf.mxu1 }
  0xbd   : > { %793 = vmatmul.bf16.gmra.mxu3 %v6811_v12  ;;  %842 = vmatmul.bf16.gmra.mxu0 %v6815_v13  ;;  %v5575_v12 = vld [vmem:[%s10278_s2 + $0x1e0] sm:$0xf]  ;;  %v6213_v13 = vld [vmem:[%s10278_s2 + $0x1ec] sm:$0xf0] }
  0xbe   : > { %891 = vmatmul.bf16.gmra.mxu1 %v6939_v8  ;;  %v5576_v25 = vor.u32 %v6213_v13, %v5575_v12 }
  0xc0   : > { %v647_v18 = vpop.f32.mrf.mxu3  ;;  %1402 = vmatpush.bf16.msra.mxu3 %v5576_v25 }
  0xc1   : > { %v7157_v21 = vadd.f32 %v696_v39, %v647_v18  ;;  %v5385_v39 = vld [vmem:[%s10278_s2 + $0x70] sm:$0xf0] }
  0xc2   : > { %v7159_v24 = vpop.f32.mrf.mxu0  ;;  %v5388_v20 = vor.u32 %v6163_v55, %v5385_v39  ;;  %v5511_v55 = vld [vmem:[%s10278_s2 + $0x160] sm:$0xf]  ;;  %v6197_v39 = vld [vmem:[%s10278_s2 + $0x16c] sm:$0xf0] }
  0xc3   : > { %v698_v8 = vpop.f32.mrf.mxu1 }
  0xc4   : > { %1403 = vmatpush.bf16.msra.mxu3 %v5560_v0  ;;  %v5527_v0 = vld [vmem:[%s10278_s2 + $0x180] sm:$0xf] }
  0xc6   : > { %v740_v48 = vpop.f32.mrf.mxu2 }
  0xc7   : > { %v741_v59 = vadd.f32 %v740_v48, %v692_v7  ;;  %v5404_v7 = vor.u32 %v6167_v33, %v5401_v11  ;;  %v5439_v48 = vld [vmem:[%s10278_s2 + $0xc8] sm:$0xf]  ;;  %v6201_v11 = vld [vmem:[%s10278_s2 + $0x18c] sm:$0xf0] }
  0xc8   : > { %v649_v26 = vpop.f32.mrf.mxu3 }
  0xc9   : > { %v7167_v27 = vadd.f32 %v698_v8, %v649_v26  ;;  %v925_v14 = vmax.f32 %v741_v59, 0.0 }
  0xca   : > { %v7169_v28 = vpop.f32.mrf.mxu0 }
  0xcb   : > { %v701_v31 = vpop.f32.mrf.mxu1  ;;  %v682_v16 = vadd.f32 %v7169_v28, %v7131_v3  ;;  %v5513_v3 = vld [vmem:[%s10278_s2 + $0x170] sm:$0xf0] }
  0xcd   : > { %798 = vmatmul.bf16.gmra.mxu3 %v6864_v32  ;;  %847 = vmatmul.bf16.gmra.mxu0 %v6870_v35  ;;  %v5577_v32 = vld [vmem:[%s10278_s2 + $0x1f0] sm:$0xf0] }
  0xce   : > { %896 = vmatmul.bf16.gmra.mxu1 %v7022_v61  ;;  %v5580_v35 = vor.u32 %v6211_v40, %v5577_v32  ;;  %v6171_v61 = vld [vmem:[%s10278_s2 + $0xa4] sm:$0xf]  ;;  %v742_v2 = vpop.f32.mrf.mxu2  ;;  %v5543_v40 = vld [vmem:[%s10278_s2 + $0x1a0] sm:$0xf] }
  0xcf   : > { %v5420_v53 = vor.u32 %v6171_v61, %v5417_v51  ;;  %v743_v15 = vadd.f32 %v742_v2, %v7144_v17  ;;  %v6207_v17 = vld [vmem:[%s10278_s2 + $0x1c4] sm:$0xf]  ;;  %v5544_v44 = vor.u32 %v6205_v43, %v5543_v40  ;;  %v6178_v61 = vld [vmem:[%s10278_s2 + $0xd4] sm:$0xf0] }
  0xd0   : > { %v652_v46 = vpop.f32.mrf.mxu3  ;;  %1500 = vmatpush.bf16.msra.mxu1 %v5580_v35  ;;  %v5564_v13 = vor.u32 %v6207_v17, %v5561_v23  ;;  %v6151_v32 = vld [vmem:[%s10278_s2 + $0x4] sm:$0xf]  ;;  %v5440_v33 = vor.u32 %v6178_v61, %v5439_v48  ;;  %v5463_v61 = vld [vmem:[%s10278_s2 + $0x100] sm:$0xf] }
  0xd1   : > { %v7198_v47 = vadd.f32 %v701_v31, %v652_v46  ;;  %1453 = vmatpush.bf16.msra.mxu0 %v5420_v53  ;;  %v927_v19 = vmax.f32 %v743_v15, 0.0  ;;  %v5353_v31 = vld [vmem:[%s10278_s2 + $0x30] sm:$0xf0]  ;;  %1404 = vmatpush.bf16.msra.mxu3 %v5544_v44  ;;  %v6199_v2 = vld [vmem:[%s10278_s2 + $0x184] sm:$0xf] }
  0xd2   : > { %v7200_v49 = vpop.f32.mrf.mxu0  ;;  %v5545_v46 = vld [vmem:[%s10278_s2 + $0x1b0] sm:$0xf0]  ;;  %1550 = vmatpush.bf16.msra.mxu2 %v5440_v33  ;;  %v6187_v40 = vld [vmem:[%s10278_s2 + $0x124] sm:$0xf] }
  0xd3   : > { %v7208_v52 = vpop.f32.mrf.mxu1  ;;  %v7247_v12 = vpack.c.bf16 %v927_v19, %v925_v14  ;;  %v5548_v53 = vor.u32 %v6203_v45, %v5545_v46  ;;  %v5481_v44 = vld [vmem:[%s10278_s2 + $0x130] sm:$0xf0]  ;;  %v6174_v45 = vld [vmem:[%s10278_s2 + $0xb4] sm:$0xf0] }
  0xd4   : > { %1501 = vmatpush.bf16.msra.mxu1 %v5564_v13  ;;  %v5495_v13 = vld [vmem:[%s10278_s2 + $0x140] sm:$0xf]  ;;  %v5484_v46 = vor.u32 %v6187_v40, %v5481_v44 }
  0xd5   : > { %1454 = vmatpush.bf16.msra.mxu0 %v5404_v7  ;;  %v5528_v7 = vor.u32 %v6201_v11, %v5527_v0 }
  0xd7   : > { %1405 = vmatpush.bf16.msra.mxu3 %v5528_v7 }
  0xd8   : > { %v7219_v58 = vpop.f32.mrf.mxu3  ;;  %1502 = vmatpush.bf16.msra.mxu1 %v5548_v53  ;;  %v6183_v53 = vld [vmem:[%s10278_s2 + $0x104] sm:$0xf] }
  0xd9   : > { %1455 = vmatpush.bf16.msra.mxu0 %v5388_v20 }
  0xda   : > { %v7230_v10 = vpop.f32.mrf.mxu0 }
  0xdb   : > { %v706_v18 = vpop.f32.mrf.mxu1  ;;  %v687_v0 = vadd.f32 %v7230_v10, %v7146_v56  ;;  %v6170_v56 = vld [vmem:[%s10278_s2 + $0x94] sm:$0xf0] }
  0xdd   : > { %803 = vmatmul.bf16.gmra.mxu3 %v6924_v1  ;;  %852 = vmatmul.bf16.gmra.mxu0 %v6929_v4  ;;  %v6159_v1 = vld [vmem:[%s10278_s2 + $0x44] sm:$0xf]  ;;  %v5369_v4 = vld [vmem:[%s10278_s2 + $0x50] sm:$0xf0] }
  0xde   : > { %901 = vmatmul.bf16.gmra.mxu1 %v7079_v41  ;;  %v5372_v25 = vor.u32 %v6159_v1, %v5369_v4  ;;  %v6155_v41 = vld [vmem:[%s10278_s2 + $0x24] sm:$0xf]  ;;  %v6193_v1 = vld [vmem:[%s10278_s2 + $0x14c] sm:$0xf0] }
  0xdf   : > { %v745_v22 = vpop.f32.mrf.mxu2  ;;  %v5356_v36 = vor.u32 %v6155_v41, %v5353_v31  ;;  %v6191_v4 = vld [vmem:[%s10278_s2 + $0x144] sm:$0xf] }
  0xe0   : > { %v657_v8 = vpop.f32.mrf.mxu3  ;;  %1456 = vmatpush.bf16.msra.mxu0 %v5372_v25  ;;  %v746_v38 = vadd.f32 %v745_v22, %v7157_v21  ;;  %v5337_v21 = vld [vmem:[%s10278_s2 + $0x10] sm:$0xf0] }
  0xe1   : > { %v7256_v26 = vadd.f32 %v706_v18, %v657_v8  ;;  %v5340_v51 = vor.u32 %v6151_v32, %v5337_v21  ;;  %v5512_v18 = vor.u32 %v6197_v39, %v5511_v55  ;;  %v5497_v8 = vld [vmem:[%s10278_s2 + $0x150] sm:$0xf0]  ;;  %v5423_v21 = vld [vmem:[%s10278_s2 + $0xa8] sm:$0xf] }
  0xe2   : > { %v7258_v30 = vpop.f32.mrf.mxu0  ;;  %v929_v60 = vmax.f32 %v746_v38, 0.0  ;;  %v5500_v41 = vor.u32 %v6191_v4, %v5497_v8  ;;  %v6189_v38 = vld [vmem:[%s10278_s2 + $0x12c] sm:$0xf0]  ;;  %v5424_v48 = vor.u32 %v6174_v45, %v5423_v21 }
  0xe3   : > { %v7266_v34 = vpop.f32.mrf.mxu1  ;;  %1406 = vmatpush.bf16.msra.mxu3 %v5512_v18 }
  0xe4   : > { %1457 = vmatpush.bf16.msra.mxu0 %v5356_v36  ;;  %v5479_v36 = vld [vmem:[%s10278_s2 + $0x120] sm:$0xf]  ;;  %1551 = vmatpush.bf16.msra.mxu2 %v5424_v48 }
  0xe5   : > { %v5480_v32 = vor.u32 %v6189_v38, %v5479_v36 }
  0xe7   : > { %v747_v29 = vpop.f32.mrf.mxu2 }
  0xe8   : > { %v7278_v35 = vpop.f32.mrf.mxu3  ;;  %v748_v54 = vadd.f32 %v747_v29, %v7167_v27  ;;  %1458 = vmatpush.bf16.msra.mxu0 %v5340_v51  ;;  %v5529_v27 = vld [vmem:[%s10278_s2 + $0x190] sm:$0xf0]  ;;  %v6185_v51 = vld [vmem:[%s10278_s2 + $0x10c] sm:$0xf0] }
  0xe9   : > { %v5532_v14 = vor.u32 %v6199_v2, %v5529_v27  ;;  %v689_v2 = vadd.f32 %v7258_v30, %v7159_v24 }
  0xea   : > { %v730_v59 = vpop.f32.mrf.mxu0  ;;  %v931_v6 = vmax.f32 %v748_v54, 0.0  ;;  %v5465_v54 = vld [vmem:[%s10278_s2 + $0x110] sm:$0xf0] }
  0xeb   : > { %v711_v5 = vpop.f32.mrf.mxu1  ;;  %1503 = vmatpush.bf16.msra.mxu1 %v5532_v14  ;;  %v731_v28 = vadd.f32 %v730_v59, %v682_v16  ;;  %v5468_v33 = vor.u32 %v6183_v53, %v5465_v54  ;;  %v704_v53 = vadd.f32 %v7208_v52, %v7219_v58 }
  0xec   : > { %v7310_v15 = vpack.c.bf16 %v931_v6, %v929_v60  ;;  %v5464_v60 = vor.u32 %v6185_v51, %v5463_v61 }
  0xed   : > { %808 = vmatmul.bf16.gmra.mxu3 %v7015_v57  ;;  %857 = vmatmul.bf16.gmra.mxu0 %v7024_v62  ;;  %v6195_v57 = vld [vmem:[%s10278_s2 + $0x164] sm:$0xf]  ;;  %v917_v25 = vmax.f32 %v731_v28, 0.0 }
  0xee   : > { %906 = vmatmul.bf16.gmra.mxu1 %v7100_v50  ;;  %v684_v50 = vadd.f32 %v7200_v49, %v7136_v9  ;;  %v5516_v20 = vor.u32 %v6195_v57, %v5513_v3  ;;  %v5496_v49 = vor.u32 %v6193_v1, %v5495_v13 }
  0xef   : > { %v750_v3 = vpop.f32.mrf.mxu2 }
  0xf0   : > { %v662_v62 = vpop.f32.mrf.mxu3  ;;  %1504 = vmatpush.bf16.msra.mxu1 %v5516_v20  ;;  %1407 = vmatpush.bf16.msra.mxu3 %v5496_v49 }
  0xf1   : > { %v7329_v19 = vadd.f32 %v711_v5, %v662_v62 }
  0xf2   : > { %v732_v17 = vpop.f32.mrf.mxu0 }
  0xf3   : > { %v733_v23 = vadd.f32 %v732_v17, %v684_v50  ;;  %v7340_v9 = vpop.f32.mrf.mxu1  ;;  %v5391_v17 = vld [vmem:[%s10278_s2 + $0x68] sm:$0xf] }
  0xf4   : > { %1505 = vmatpush.bf16.msra.mxu1 %v5500_v41  ;;  %1408 = vmatpush.bf16.msra.mxu3 %v5480_v32 }
  0xf5   : > { %v919_v22 = vmax.f32 %v733_v23, 0.0  ;;  %v6166_v23 = vld [vmem:[%s10278_s2 + $0x74] sm:$0xf0] }
  0xf6   : > { %v5392_v1 = vor.u32 %v6166_v23, %v5391_v17 }
  0xf7   : > { %v7345_v31 = vpack.c.bf16 %v919_v22, %v917_v25  ;;  %v752_v41 = vpop.f32.mrf.mxu2 }
  0xf8   : > { %v7356_v43 = vpop.f32.mrf.mxu3  ;;  %1506 = vmatpush.bf16.msra.mxu1 %v5484_v46  ;;  %1409 = vmatpush.bf16.msra.mxu3 %v5464_v60  ;;  %v5375_v46 = vld [vmem:[%s10278_s2 + $0x48] sm:$0xf] }
  0xf9   : > { %1361 = vmatmul.bf16.vlgmr.msrb.gmra.mxu2 %v7345_v31 }
  0xfa   : > { %v735_v29 = vpop.f32.mrf.mxu0 }
  0xfb   : > { %v716_v59 = vpop.f32.mrf.mxu1  ;;  %v736_v5 = vadd.f32 %v735_v29, %v687_v0  ;;  %v6162_v29 = vld [vmem:[%s10278_s2 + $0x54] sm:$0xf0]  ;;  %v751_v0 = vadd.f32 %v750_v3, %v7198_v47  ;;  %v5359_v47 = vld [vmem:[%s10278_s2 + $0x28] sm:$0xf] }
  0xfc   : > { %1507 = vmatpush.bf16.msra.mxu1 %v5468_v33  ;;  %v5376_v51 = vor.u32 %v6162_v29, %v5375_v46 }
  0xfd   : > { %813 = vmatmul.bf16.gmra.mxu3 %v7077_v37  ;;  %862 = vmatmul.bf16.gmra.mxu0 %v7081_v42  ;;  %v921_v42 = vmax.f32 %v736_v5, 0.0 }
  0xfe   : > { %911 = vmatmul.bf16.gmra.mxu1 %v7114_v63  ;;  %v5407_v63 = vld [vmem:[%s10278_s2 + $0x88] sm:$0xf] }
  0xff   : > { %v5408_v10 = vor.u32 %v6170_v56, %v5407_v63  ;;  %v755_v48 = vpop.f32.mrf.mxu2 }
 0x100   : > { %v667_v11 = vpop.f32.mrf.mxu3  ;;  %v756_v17 = vadd.f32 %v755_v48, %v7256_v26  ;;  %v6214_v26 = vld [vmem:[%s10278_s2 + $0x1f4] sm:$0xf0]  ;;  %v714_v48 = vadd.f32 %v7340_v9, %v7356_v43 }
 0x101   : > { %v7387_v6 = vadd.f32 %v716_v59, %v667_v11  ;;  %1552 = vmatpush.bf16.msra.mxu2 %v5408_v10  ;;  %v753_v11 = vadd.f32 %v752_v41, %v704_v53  ;;  %v6180_v53 = vld [vmem:[%s10278_s2 + $0xec] sm:$0xf] }
 0x102   : > { %v737_v7 = vpop.f32.mrf.mxu0 }
 0x103   : > { %v738_v27 = vadd.f32 %v737_v7, %v689_v2  ;;  %v7389_v37 = vpop.f32.mrf.mxu1  ;;  %v935_v52 = vmax.f32 %v753_v11, 0.0  ;;  %v6212_v11 = vld [vmem:[%s10278_s2 + $0x1ec] sm:$0xf] }
 0x105   : > { %v923_v14 = vmax.f32 %v738_v27, 0.0  ;;  %1553 = vmatpush.bf16.msra.mxu2 %v5392_v1  ;;  %v933_v27 = vmax.f32 %v751_v0, 0.0 }
 0x107   : > { %v7391_v16 = vpack.c.bf16 %v923_v14, %v921_v42  ;;  %v757_v42 = vpop.f32.mrf.mxu2  ;;  %v7430_v63 = vpack.c.bf16 %v935_v52, %v933_v27 }
 0x108   : > { %v7393_v55 = vpop.f32.mrf.mxu3 }
 0x109   : > { %1366 = vmatmul.bf16.gmra.mxu2 %v7391_v16 }
 0x10a   : > { %v828_v24 = vpop.f32.mrf.mxu0  ;;  %1554 = vmatpush.bf16.msra.mxu2 %v5376_v51 }
 0x10b   : > { %v877_v30 = vpop.f32.mrf.mxu1 }
 0x10d   : > { %1459 = vmatmul.bf16.vlgmr.msra.gmra.mxu0 %v7345_v31 }
 0x110   : > { %v779_v39 = vpop.f32.mrf.mxu3 }
 0x111   : > { %v829_v62 = vadd.f32 %v828_v24, %v779_v39 }
 0x112   : > { %v830_v57 = vpop.f32.mrf.mxu0 }
 0x113   : > { %v879_v18 = vpop.f32.mrf.mxu1  ;;  %v878_v50 = vadd.f32 %v877_v30, %v829_v62  ;;  %v6158_v30 = vld [vmem:[%s10278_s2 + $0x34] sm:$0xf0]  ;;  %v709_v62 = vadd.f32 %v7266_v34, %v7278_v35  ;;  %v937_v34 = vmax.f32 %v756_v17, 0.0  ;;  %v5409_v17 = vld [vmem:[%s10278_s2 + $0x98] sm:$0xf0] }
 0x115   : > { %v918_v4 = vmax.f32 %v878_v50, 0.0  ;;  %v758_v23 = vadd.f32 %v757_v42, %v709_v62  ;;  %v5567_v62 = vld [vmem:[%s10278_s2 + $0x1c8] sm:$0xf] }
 0x117   : > { %v939_v35 = vmax.f32 %v758_v23, 0.0 }
 0x118   : > { %v781_v28 = vpop.f32.mrf.mxu3 }
 0x119   : > { %v831_v20 = vadd.f32 %v830_v57, %v781_v28  ;;  %1371 = vmatmul.bf16.gmra.mxu2 %v7247_v12  ;;  %v5360_v57 = vor.u32 %v6158_v30, %v5359_v47  ;;  %v6172_v47 = vld [vmem:[%s10278_s2 + $0xac] sm:$0xf]  ;;  %v5425_v30 = vld [vmem:[%s10278_s2 + $0xb8] sm:$0xf0] }
 0x11a   : > { %v833_v13 = vpop.f32.mrf.mxu0 }
 0x11b   : > { %v880_v49 = vadd.f32 %v879_v18, %v831_v20  ;;  %v882_v8 = vpop.f32.mrf.mxu1  ;;  %1555 = vmatpush.bf16.msra.mxu2 %v5360_v57  ;;  %v760_v20 = vpop.f32.mrf.mxu2  ;;  %v5428_v57 = vor.u32 %v6172_v47, %v5425_v30  ;;  %v5553_v30 = vld [vmem:[%s10278_s2 + $0x1b8] sm:$0xf0] }
 0x11c   : > { %v761_v0 = vadd.f32 %v760_v20, %v7329_v19  ;;  %v5441_v19 = vld [vmem:[%s10278_s2 + $0xd8] sm:$0xf0]  ;;  %v6168_v20 = vld [vmem:[%s10278_s2 + $0x8c] sm:$0xf] }
 0x11d   : > { %v920_v25 = vmax.f32 %v880_v49, 0.0  ;;  %1464 = vmatmul.bf16.gmra.mxu0 %v7391_v16 }
 0x11f   : > { %v7411_v22 = vpack.c.bf16 %v920_v25, %v918_v4  ;;  %v5583_v25 = vld [vmem:[%s10278_s2 + $0x1e8] sm:$0xf] }
 0x120   : > { %v784_v36 = vpop.f32.mrf.mxu3  ;;  %v5584_v41 = vor.u32 %v6214_v26, %v5583_v25  ;;  %v719_v25 = vadd.f32 %v7389_v37, %v7393_v55 }
 0x121   : > { %1410 = vmatmul.bf16.vlgmr.msra.gmra.mxu3 %v7411_v22  ;;  %1508 = vmatmul.bf16.vlgmr.msra.gmra.mxu1 %v7411_v22  ;;  %v834_v40 = vadd.f32 %v833_v13, %v784_v36  ;;  %v7453_v36 = vpack.c.bf16 %v939_v35, %v937_v34  ;;  %v5703_v34 = vld [vmem:[%s10279_s3 + $0xe0] sm:$0xf]  ;;  %v6245_v35 = vld [vmem:[%s10279_s3 + $0xec] sm:$0xf0] }
 0x122   : > { %v835_v38 = vpop.f32.mrf.mxu0  ;;  %1598 = vmatpush.bf16.msrb.mxu3 %v5584_v41 }
 0x123   : > { %v884_v32 = vpop.f32.mrf.mxu1  ;;  %v883_v44 = vadd.f32 %v882_v8, %v834_v40  ;;  %v762_v40 = vpop.f32.mrf.mxu2 }
 0x124   : > { %v763_v9 = vadd.f32 %v762_v40, %v714_v48  ;;  %v5393_v40 = vld [vmem:[%s10278_s2 + $0x78] sm:$0xf0] }
 0x125   : > { %v922_v59 = vmax.f32 %v883_v44, 0.0  ;;  %v5569_v48 = vld [vmem:[%s10278_s2 + $0x1d8] sm:$0xf0] }
 0x128   : > { %v786_v21 = vpop.f32.mrf.mxu3 }
 0x129   : > { %v836_v45 = vadd.f32 %v835_v38, %v786_v21  ;;  %1376 = vmatmul.bf16.gmra.mxu2 %v7310_v15  ;;  %v5343_v21 = vld [vmem:[%s10278_s2 + $0x8] sm:$0xf] }
 0x12a   : > { %v838_v61 = vpop.f32.mrf.mxu0 }
 0x12b   : > { %v885_v60 = vadd.f32 %v884_v32, %v836_v45  ;;  %v887_v54 = vpop.f32.mrf.mxu1  ;;  %v6154_v45 = vld [vmem:[%s10278_s2 + $0x14] sm:$0xf0]  ;;  %v765_v42 = vpop.f32.mrf.mxu2 }
 0x12c   : > { %v5344_v29 = vor.u32 %v6154_v45, %v5343_v21  ;;  %v766_v37 = vadd.f32 %v765_v42, %v7387_v6  ;;  %v5377_v6 = vld [vmem:[%s10278_s2 + $0x58] sm:$0xf0] }
 0x12d   : > { %v924_v33 = vmax.f32 %v885_v60, 0.0  ;;  %1469 = vmatmul.bf16.gmra.mxu0 %v7247_v12 }
 0x12e   : > { %1556 = vmatpush.bf16.msra.mxu2 %v5344_v29  ;;  %v6208_v29 = vld [vmem:[%s10278_s2 + $0x1cc] sm:$0xf] }
 0x12f   : > { %v7426_v2 = vpack.c.bf16 %v924_v33, %v922_v59  ;;  %v5457_v59 = vld [vmem:[%s10278_s2 + $0xf8] sm:$0xf0] }
 0x130   : > { %v789_v5 = vpop.f32.mrf.mxu3 }
 0x131   : > { %1415 = vmatmul.bf16.gmra.mxu3 %v7426_v2  ;;  %1513 = vmatmul.bf16.gmra.mxu1 %v7426_v2  ;;  %v839_v58 = vadd.f32 %v838_v61, %v789_v5  ;;  %v5585_v5 = vld [vmem:[%s10278_s2 + $0x1f8] sm:$0xf0] }
 0x132   : > { %v840_v7 = vpop.f32.mrf.mxu0  ;;  %v5588_v52 = vor.u32 %v6212_v11, %v5585_v5  ;;  %v5361_v11 = vld [vmem:[%s10278_s2 + $0x38] sm:$0xf0] }
 0x133   : > { %v889_v14 = vpop.f32.mrf.mxu1  ;;  %v888_v56 = vadd.f32 %v887_v54, %v839_v58  ;;  %v5460_v54 = vor.u32 %v6180_v53, %v5457_v59  ;;  %v5572_v53 = vor.u32 %v6208_v29, %v5569_v48  ;;  %v5503_v29 = vld [vmem:[%s10278_s2 + $0x148] sm:$0xf]  ;;  %v6194_v48 = vld [vmem:[%s10278_s2 + $0x154] sm:$0xf0] }
 0x134   : > { %1696 = vmatpush.bf16.msrb.mxu1 %v5588_v52  ;;  %v6206_v52 = vld [vmem:[%s10278_s2 + $0x1b4] sm:$0xf0] }
 0x135   : > { %v926_v18 = vmax.f32 %v888_v56, 0.0  ;;  %1647 = vmatpush.bf16.msrb.mxu0 %v5460_v54  ;;  %v941_v56 = vmax.f32 %v761_v0, 0.0 }
 0x138   : > { %v791_v24 = vpop.f32.mrf.mxu3  ;;  %1697 = vmatpush.bf16.msrb.mxu1 %v5572_v53  ;;  %v5504_v53 = vor.u32 %v6194_v48, %v5503_v29  ;;  %v307_v48 = vld [vmem:[%s10281_s5 + $0x8] sm:$0xff] }
 0x139   : > { %v841_v10 = vadd.f32 %v840_v7, %v791_v24  ;;  %1381 = vmatmul.bf16.gmra.mxu2 %v7430_v63  ;;  %v6176_v7 = vld [vmem:[%s10278_s2 + $0xcc] sm:$0xf]  ;;  %v943_v24 = vmax.f32 %v763_v9, 0.0 }
 0x13a   : > { %v843_v39 = vpop.f32.mrf.mxu0  ;;  %v5444_v58 = vor.u32 %v6176_v7, %v5441_v19  ;;  %v6156_v9 = vld [vmem:[%s10278_s2 + $0x2c] sm:$0xf] }
 0x13b   : > { %v890_v3 = vadd.f32 %v889_v14, %v841_v10  ;;  %v892_v50 = vpop.f32.mrf.mxu1  ;;  %v5364_v7 = vor.u32 %v6156_v9, %v5361_v11 }
 0x13c   : > { %1648 = vmatpush.bf16.msrb.mxu0 %v5444_v58 }
 0x13d   : > { %v928_v28 = vmax.f32 %v890_v3, 0.0  ;;  %1474 = vmatmul.bf16.gmra.mxu0 %v7310_v15 }
 0x13f   : > { %v7443_v13 = vpack.c.bf16 %v928_v28, %v926_v18  ;;  %v6210_v18 = vld [vmem:[%s10278_s2 + $0x1d4] sm:$0xf0] }
 0x140   : > { %v794_v1 = vpop.f32.mrf.mxu3  ;;  %v5568_v3 = vor.u32 %v6210_v18, %v5567_v62  ;;  %1649 = vmatpush.bf16.msrb.mxu0 %v5428_v57  ;;  %v5687_v57 = vld [vmem:[%s10279_s3 + $0xc0] sm:$0xf]  ;;  %v6241_v62 = vld [vmem:[%s10279_s3 + $0xcc] sm:$0xf0] }
 0x141   : > { %1420 = vmatmul.bf16.gmra.mxu3 %v7443_v13  ;;  %1518 = vmatmul.bf16.gmra.mxu1 %v7443_v13  ;;  %v844_v49 = vadd.f32 %v843_v39, %v794_v1  ;;  %v5412_v1 = vor.u32 %v6168_v20, %v5409_v17  ;;  %v5688_v20 = vor.u32 %v6241_v62, %v5687_v57  ;;  %v5473_v62 = vld [vmem:[%s10278_s2 + $0x118] sm:$0xf0] }
 0x142   : > { %v845_v4 = vpop.f32.mrf.mxu0  ;;  %1599 = vmatpush.bf16.msrb.mxu3 %v5568_v3 }
 0x143   : > { %v894_v8 = vpop.f32.mrf.mxu1  ;;  %v893_v38 = vadd.f32 %v892_v50, %v844_v49  ;;  %v7500_v50 = vpack.c.bf16 %v943_v24, %v941_v56  ;;  %v5345_v56 = vld [vmem:[%s10278_s2 + $0x18] sm:$0xf0]  ;;  %v6204_v24 = vld [vmem:[%s10278_s2 + $0x1ac] sm:$0xf] }
 0x144   : > { %1650 = vmatpush.bf16.msrb.mxu0 %v5412_v1  ;;  %v5556_v18 = vor.u32 %v6204_v24, %v5553_v30  ;;  %v6202_v1 = vld [vmem:[%s10278_s2 + $0x194] sm:$0xf0]  ;;  %v6184_v30 = vld [vmem:[%s10278_s2 + $0x10c] sm:$0xf] }
 0x145   : > { %v930_v61 = vmax.f32 %v893_v38, 0.0  ;;  %v6164_v38 = vld [vmem:[%s10278_s2 + $0x6c] sm:$0xf] }
 0x146   : > { %v5396_v21 = vor.u32 %v6164_v38, %v5393_v40  ;;  %1698 = vmatpush.bf16.msrb.mxu1 %v5556_v18  ;;  %v6198_v38 = vld [vmem:[%s10278_s2 + $0x174] sm:$0xf0]  ;;  %v6196_v40 = vld [vmem:[%s10278_s2 + $0x16c] sm:$0xf] }
 0x148   : > { %v796_v32 = vpop.f32.mrf.mxu3  ;;  %1651 = vmatpush.bf16.msrb.mxu0 %v5396_v21  ;;  %v5521_v21 = vld [vmem:[%s10278_s2 + $0x178] sm:$0xf0] }
 0x149   : > { %v846_v44 = vadd.f32 %v845_v4, %v796_v32  ;;  %1386 = vmatmul.bf16.gmra.mxu2 %v7453_v36  ;;  %v767_v32 = vpop.f32.mrf.mxu2 }
 0x14a   : > { %v848_v46 = vpop.f32.mrf.mxu0  ;;  %v768_v55 = vadd.f32 %v767_v32, %v719_v25 }
 0x14b   : > { %v895_v51 = vadd.f32 %v894_v8, %v846_v44  ;;  %v897_v60 = vpop.f32.mrf.mxu1  ;;  %v5704_v8 = vor.u32 %v6245_v35, %v5703_v34 }
 0x14c   : > { %v947_v0 = vmax.f32 %v768_v55, 0.0 }
 0x14d   : > { %v932_v33 = vmax.f32 %v895_v51, 0.0  ;;  %1479 = vmatmul.bf16.gmra.mxu0 %v7430_v63  ;;  %2613 = vmatpush.bf16.msrb.mxu2 %v5704_v8 }
 0x14f   : > { %v7472_v43 = vpack.c.bf16 %v932_v33, %v930_v61  ;;  %v6160_v61 = vld [vmem:[%s10278_s2 + $0x4c] sm:$0xf]  ;;  %v945_v33 = vmax.f32 %v766_v37, 0.0 }
 0x150   : > { %v799_v27 = vpop.f32.mrf.mxu3  ;;  %v5380_v59 = vor.u32 %v6160_v61, %v5377_v6  ;;  %v6192_v61 = vld [vmem:[%s10278_s2 + $0x14c] sm:$0xf]  ;;  %v5505_v6 = vld [vmem:[%s10278_s2 + $0x158] sm:$0xf0] }
 0x151   : > { %1425 = vmatmul.bf16.gmra.mxu3 %v7472_v43  ;;  %1523 = vmatmul.bf16.gmra.mxu1 %v7472_v43  ;;  %v849_v10 = vadd.f32 %v848_v46, %v799_v27  ;;  %v5551_v27 = vld [vmem:[%s10278_s2 + $0x1a8] sm:$0xf]  ;;  %v7553_v42 = vpack.c.bf16 %v947_v0, %v945_v33  ;;  %v6190_v33 = vld [vmem:[%s10278_s2 + $0x134] sm:$0xf0]  ;;  %v6188_v0 = vld [vmem:[%s10278_s2 + $0x12c] sm:$0xf] }
 0x152   : > { %v850_v14 = vpop.f32.mrf.mxu0  ;;  %1652 = vmatpush.bf16.msrb.mxu0 %v5380_v59  ;;  %v5552_v58 = vor.u32 %v6206_v52, %v5551_v27  ;;  %2614 = vmatpush.bf16.msrb.mxu2 %v5688_v20  ;;  %v5508_v59 = vor.u32 %v6192_v61, %v5505_v6  ;;  %v5671_v27 = vld [vmem:[%s10279_s3 + $0xa0] sm:$0xf]  ;;  %v6237_v52 = vld [vmem:[%s10279_s3 + $0xac] sm:$0xf0]  ;;  %v7666_v61 = vperm.slane %v307_v48, 0 }
 0x153   : > { %v899_v39 = vpop.f32.mrf.mxu1  ;;  %v898_v28 = vadd.f32 %v897_v60, %v849_v10  ;;  %v306_v6 = vld [vmem:[%s10281_s5] sm:$0xff] }
 0x154   : > { %1600 = vmatpush.bf16.msrb.mxu3 %v5552_v58 }
 0x155   : > { %v934_v26 = vmax.f32 %v898_v28, 0.0 }
 0x156   : > { %1653 = vmatpush.bf16.msrb.mxu0 %v5364_v7 }
 0x158   : > { %v801_v23 = vpop.f32.mrf.mxu3 }
 0x159   : > { %v851_v4 = vadd.f32 %v850_v14, %v801_v23  ;;  %1391 = vmatmul.bf16.gmra.mxu2 %v7500_v50  ;;  %v6152_v14 = vld [vmem:[%s10278_s2 + $0xc] sm:$0xf]  ;;  %v5535_v23 = vld [vmem:[%s10278_s2 + $0x188] sm:$0xf] }
 0x15a   : > { %v853_v49 = vpop.f32.mrf.mxu0  ;;  %v5348_v47 = vor.u32 %v6152_v14, %v5345_v56  ;;  %v5536_v35 = vor.u32 %v6202_v1, %v5535_v23  ;;  %v5672_v56 = vor.u32 %v6237_v52, %v5671_v27 }
 0x15b   : > { %v900_v41 = vadd.f32 %v899_v39, %v851_v4  ;;  %v902_v44 = vpop.f32.mrf.mxu1  ;;  %v6200_v4 = vld [vmem:[%s10278_s2 + $0x18c] sm:$0xf] }
 0x15c   : > { %1654 = vmatpush.bf16.msrb.mxu0 %v5348_v47  ;;  %1601 = vmatpush.bf16.msrb.mxu3 %v5536_v35  ;;  %v6186_v47 = vld [vmem:[%s10278_s2 + $0x114] sm:$0xf0] }
 0x15d   : > { %v936_v45 = vmax.f32 %v900_v41, 0.0  ;;  %1484 = vmatmul.bf16.gmra.mxu0 %v7453_v36  ;;  %v5519_v41 = vld [vmem:[%s10278_s2 + $0x168] sm:$0xf]  ;;  %2615 = vmatpush.bf16.msrb.mxu2 %v5672_v56 }
 0x15f   : > { %v7525_v46 = vpack.c.bf16 %v936_v45, %v934_v26  ;;  %v5524_v45 = vor.u32 %v6196_v40, %v5521_v21  ;;  %v5655_v40 = vld [vmem:[%s10279_s3 + $0x80] sm:$0xf] }
 0x160   : > { %v804_v51 = vpop.f32.mrf.mxu3 }
 0x161   : > { %1430 = vmatmul.bf16.gmra.mxu3 %v7525_v46  ;;  %1528 = vmatmul.bf16.gmra.mxu1 %v7525_v46  ;;  %v854_v60 = vadd.f32 %v853_v49, %v804_v51  ;;  %v5537_v49 = vld [vmem:[%s10278_s2 + $0x198] sm:$0xf0] }
 0x162   : > { %v855_v54 = vpop.f32.mrf.mxu0  ;;  %v5540_v25 = vor.u32 %v6200_v4, %v5537_v49 }
 0x163   : > { %v904_v5 = vpop.f32.mrf.mxu1  ;;  %v903_v19 = vadd.f32 %v902_v44, %v854_v60  ;;  %v5520_v44 = vor.u32 %v6198_v38, %v5519_v41 }
 0x164   : > { %1699 = vmatpush.bf16.msrb.mxu1 %v5540_v25 }
 0x165   : > { %v938_v3 = vmax.f32 %v903_v19, 0.0  ;;  %1602 = vmatpush.bf16.msrb.mxu3 %v5520_v44 }
 0x168   : > { %v806_v10 = vpop.f32.mrf.mxu3  ;;  %1700 = vmatpush.bf16.msrb.mxu1 %v5524_v45 }
 0x169   : > { %v856_v39 = vadd.f32 %v855_v54, %v806_v10  ;;  %1396 = vmatmul.bf16.gmra.mxu2 %v7553_v42  ;;  %1603 = vmatpush.bf16.msrb.mxu3 %v5504_v53  ;;  %v5487_v54 = vld [vmem:[%s10278_s2 + $0x128] sm:$0xf]  ;;  %v6229_v53 = vld [vmem:[%s10279_s3 + $0x6c] sm:$0xf0] }
 0x16a   : > { %v858_v28 = vpop.f32.mrf.mxu0  ;;  %v5488_v11 = vor.u32 %v6190_v33, %v5487_v54  ;;  %v5471_v10 = vld [vmem:[%s10278_s2 + $0x108] sm:$0xf] }
 0x16b   : > { %v905_v17 = vadd.f32 %v904_v5, %v856_v39  ;;  %v907_v34 = vpop.f32.mrf.mxu1  ;;  %v5489_v5 = vld [vmem:[%s10278_s2 + $0x138] sm:$0xf0]  ;;  %v5472_v57 = vor.u32 %v6186_v47, %v5471_v10 }
 0x16c   : > { %1701 = vmatpush.bf16.msrb.mxu1 %v5508_v59  ;;  %v5492_v19 = vor.u32 %v6188_v0, %v5489_v5  ;;  %v7682_v0 = vperm.slane %v306_v6, 0 }
 0x16d   : > { %v940_v8 = vmax.f32 %v905_v17, 0.0  ;;  %1489 = vmatmul.bf16.gmra.mxu0 %v7500_v50  ;;  %1604 = vmatpush.bf16.msrb.mxu3 %v5488_v11 }
 0x16f   : > { %v7587_v26 = vpack.c.bf16 %v940_v8, %v938_v3  ;;  %v5476_v3 = vor.u32 %v6184_v30, %v5473_v62  ;;  %v6225_v30 = vld [vmem:[%s10279_s3 + $0x4c] sm:$0xf0] }
 0x170   : > { %v809_v32 = vpop.f32.mrf.mxu3  ;;  %1702 = vmatpush.bf16.msrb.mxu1 %v5492_v19 }
 0x171   : > { %1435 = vmatmul.bf16.gmra.mxu3 %v7587_v26  ;;  %1533 = vmatmul.bf16.gmra.mxu1 %v7587_v26  ;;  %v859_v37 = vadd.f32 %v858_v28, %v809_v32  ;;  %v6233_v32 = vld [vmem:[%s10279_s3 + $0x8c] sm:$0xf0] }
 0x172   : > { %v860_v55 = vpop.f32.mrf.mxu0  ;;  %1605 = vmatpush.bf16.msrb.mxu3 %v5472_v57  ;;  %v5656_v21 = vor.u32 %v6233_v32, %v5655_v40 }
 0x173   : > { %v909_v51 = vpop.f32.mrf.mxu1  ;;  %v908_v60 = vadd.f32 %v907_v34, %v859_v37 }
 0x174   : > { %1703 = vmatpush.bf16.msrb.mxu1 %v5476_v3  ;;  %2616 = vmatpush.bf16.msrb.mxu2 %v5656_v21 }
 0x175   : > { %v942_v58 = vmax.f32 %v908_v60, 0.0 }
 0x178   : > { %v811_v9 = vpop.f32.mrf.mxu3 }
 0x179   : > { %v861_v7 = vadd.f32 %v860_v55, %v811_v9  ;;  %1557 = vmatmul.bf16.vlgmr.msra.gmra.mxu2 %v7345_v31 }
 0x17a   : > { %v863_v14 = vpop.f32.mrf.mxu0 }
 0x17b   : > { %v910_v24 = vadd.f32 %v909_v51, %v861_v7  ;;  %v912_v28 = vpop.f32.mrf.mxu1 }
 0x17c   : > { %v1362_v39 = vpop.f32.mrf.mxu2 }
 0x17d   : > { %v944_v18 = vmax.f32 %v910_v24, 0.0  ;;  %1494 = vmatmul.bf16.gmra.mxu0 %v7553_v42  ;;  %v1363_v5 = vadd.f32 %v1362_v39, %v7682_v0 }
 0x17f   : > { %v7647_v20 = vpack.c.bf16 %v944_v18, %v942_v58 }
 0x180   : > { %v814_v17 = vpop.f32.mrf.mxu3 }
 0x181   : > { %1440 = vmatmul.bf16.gmra.mxu3 %v7647_v20  ;;  %1538 = vmatmul.bf16.gmra.mxu1 %v7647_v20  ;;  %v864_v1 = vadd.f32 %v863_v14, %v814_v17 }
 0x182   : > { %v865_v23 = vpop.f32.mrf.mxu0 }
 0x183   : > { %v913_v34 = vadd.f32 %v912_v28, %v864_v1  ;;  %v914_v49 = vpop.f32.mrf.mxu1 }
 0x184   : > { %v1364_v4 = vpop.f32.mrf.mxu2 }
 0x185   : > { %v946_v41 = vmax.f32 %v913_v34, 0.0  ;;  %v1365_v10 = vadd.f32 %v1364_v4, %v7682_v0 }
 0x188   : > { %v816_v35 = vpop.f32.mrf.mxu3 }
 0x189   : > { %v866_v8 = vadd.f32 %v865_v23, %v816_v35  ;;  %1562 = vmatmul.bf16.gmra.mxu2 %v7391_v16 }
 0x18a   : > { %v1460_v25 = vpop.f32.mrf.mxu0 }
 0x18b   : > { %v915_v38 = vadd.f32 %v914_v49, %v866_v8  ;;  %v1461_v54 = vadd.f32 %v1460_v25, %v7666_v61 }
 0x18c   : > { %v1367_v44 = vpop.f32.mrf.mxu2 }
 0x18d   : > { %v948_v45 = vmax.f32 %v915_v38, 0.0  ;;  %1655 = vmatmul.bf16.vlgmr.msrb.gmra.mxu0 %v7345_v31  ;;  %v5639_v31 = vld [vmem:[%s10279_s3 + $0x60] sm:$0xf]  ;;  %v1368_v35 = vadd.f32 %v1367_v44, %v7682_v0  ;;  %v6221_v44 = vld [vmem:[%s10279_s3 + $0x2c] sm:$0xf0] }
 0x18e   : > { %v5640_v60 = vor.u32 %v6229_v53, %v5639_v31 }
 0x18f   : > { %v7659_v37 = vpack.c.bf16 %v948_v45, %v946_v41 }
 0x190   : > { %2617 = vmatpush.bf16.msrb.mxu2 %v5640_v60 }
 0x191   : > { %1445 = vmatmul.bf16.gmra.mxu3 %v7659_v37  ;;  %1543 = vmatmul.bf16.gmra.mxu1 %v7659_v37 }
 0x192   : > { %v1462_v55 = vpop.f32.mrf.mxu0 }
 0x193   : > { %v1463_v52 = vadd.f32 %v1462_v55, %v7666_v61 }
 0x194   : > { %v1369_v29 = vpop.f32.mrf.mxu2 }
 0x195   : > { %v1370_v45 = vadd.f32 %v1369_v29, %v7682_v0 }
 0x199   : > { %1567 = vmatmul.bf16.gmra.mxu2 %v7247_v12 }
 0x19a   : > { %v1465_v51 = vpop.f32.mrf.mxu0 }
 0x19b   : > { %v1466_v18 = vadd.f32 %v1465_v51, %v7666_v61 }
 0x19c   : > { %v7678_v59 = vpop.f32.mrf.mxu2 }
 0x19d   : > { %1660 = vmatmul.bf16.gmra.mxu0 %v7391_v16 }
 0x19e   : > { %v1509_v33 = vpop.f32.mrf.mxu1 }
 0x19f   : > { %v1510_v9 = vadd.f32 %v1509_v33, %v1461_v54 }
 0x1a1   : > { %1606 = vmatmul.bf16.vlgmr.msrb.gmra.mxu3 %v7411_v22  ;;  %1704 = vmatmul.bf16.vlgmr.msrb.gmra.mxu1 %v7411_v22  ;;  %v1746_v14 = vmax.f32 %v1510_v9, 0.0  ;;  %v5623_v22 = vld [vmem:[%s10279_s3 + $0x40] sm:$0xf] }
 0x1a2   : > { %v1467_v11 = vpop.f32.mrf.mxu0  ;;  %v5624_v62 = vor.u32 %v6225_v30, %v5623_v22  ;;  %v6217_v22 = vld [vmem:[%s10279_s3 + $0xc] sm:$0xf0] }
 0x1a3   : > { %v1468_v25 = vadd.f32 %v1467_v11, %v7666_v61 }
 0x1a4   : > { %v7687_v7 = vpop.f32.mrf.mxu2  ;;  %v1411_v27 = vpop.f32.mrf.mxu3  ;;  %2618 = vmatpush.bf16.msrb.mxu2 %v5624_v62 }
 0x1a5   : > { %v1412_v19 = vadd.f32 %v1411_v27, %v1363_v5  ;;  %v1373_v5 = vadd.f32 %v7678_v59, %v7682_v0  ;;  %v5591_v59 = vld [vmem:[%s10279_s3] sm:$0xf] }
 0x1a6   : > { %v1511_v58 = vpop.f32.mrf.mxu1  ;;  %v5592_v62 = vor.u32 %v6217_v22, %v5591_v59 }
 0x1a7   : > { %v1512_v16 = vadd.f32 %v1511_v58, %v1463_v52  ;;  %v1745_v17 = vmax.f32 %v1412_v19, 0.0 }
 0x1a9   : > { %v1750_v56 = vmax.f32 %v1512_v16, 0.0  ;;  %1572 = vmatmul.bf16.gmra.mxu2 %v7310_v15 }
 0x1aa   : > { %v1470_v24 = vpop.f32.mrf.mxu0 }
 0x1ab   : > { %v7692_v47 = vpack.c.bf16 %v1750_v56, %v1746_v14  ;;  %v1471_v53 = vadd.f32 %v1470_v24, %v7666_v61 }
 0x1ac   : > { %v7700_v39 = vpop.f32.mrf.mxu2  ;;  %v1413_v57 = vpop.f32.mrf.mxu3 }
 0x1ad   : > { %v1414_v3 = vadd.f32 %v1413_v57, %v1365_v10  ;;  %1665 = vmatmul.bf16.gmra.mxu0 %v7247_v12 }
 0x1ae   : > { %v1514_v28 = vpop.f32.mrf.mxu1 }
 0x1af   : > { %v1749_v23 = vmax.f32 %v1414_v3, 0.0  ;;  %v1515_v1 = vadd.f32 %v1514_v28, %v1466_v18 }
 0x1b1   : > { %v7704_v4 = vpack.c.bf16 %v1749_v23, %v1745_v17  ;;  %1611 = vmatmul.bf16.gmra.mxu3 %v7426_v2  ;;  %1709 = vmatmul.bf16.gmra.mxu1 %v7426_v2  ;;  %v1754_v40 = vmax.f32 %v1515_v1, 0.0  ;;  %v5607_v2 = vld [vmem:[%s10279_s3 + $0x20] sm:$0xf] }
 0x1b2   : > { %v1472_v34 = vpop.f32.mrf.mxu0  ;;  %v5608_v31 = vor.u32 %v6221_v44, %v5607_v2 }
 0x1b4   : > { %v7709_v49 = vpop.f32.mrf.mxu2  ;;  %v1416_v8 = vpop.f32.mrf.mxu3  ;;  %2619 = vmatpush.bf16.msrb.mxu2 %v5608_v31  ;;  %v6309_v31 = vld [vmem:[%s10279_s3 + $0x2ec] sm:$0xf0] }
 0x1b5   : > { %v1417_v12 = vadd.f32 %v1416_v8, %v1368_v35  ;;  %v6277_v35 = vld [vmem:[%s10279_s3 + $0x1ec] sm:$0xf0]  ;;  %v1380_v44 = vadd.f32 %v7709_v49, %v7682_v0  ;;  %v5705_v49 = vld [vmem:[%s10279_s3 + $0xf0] sm:$0xf0] }
 0x1b6   : > { %v1516_v41 = vpop.f32.mrf.mxu1 }
 0x1b7   : > { %v1517_v38 = vadd.f32 %v1516_v41, %v1468_v25  ;;  %v1753_v60 = vmax.f32 %v1417_v12, 0.0  ;;  %v1378_v25 = vadd.f32 %v7700_v39, %v7682_v0  ;;  %v5959_v39 = vld [vmem:[%s10279_s3 + $0x2e0] sm:$0xf] }
 0x1b8   : > { %2620 = vmatpush.bf16.msrb.mxu2 %v5592_v62 }
 0x1b9   : > { %v1758_v32 = vmax.f32 %v1517_v38, 0.0  ;;  %1577 = vmatmul.bf16.gmra.mxu2 %v7430_v63 }
 0x1ba   : > { %v1475_v21 = vpop.f32.mrf.mxu0 }
 0x1bb   : > { %v7714_v55 = vpack.c.bf16 %v1758_v32, %v1754_v40  ;;  %v1476_v18 = vadd.f32 %v1475_v21, %v7666_v61 }
 0x1bc   : > { %v7722_v48 = vpop.f32.mrf.mxu2  ;;  %v1418_v51 = vpop.f32.mrf.mxu3 }
 0x1bd   : > { %v1419_v6 = vadd.f32 %v1418_v51, %v1370_v45  ;;  %1670 = vmatmul.bf16.gmra.mxu0 %v7310_v15  ;;  %v1473_v15 = vadd.f32 %v1472_v34, %v7666_v61  ;;  %v5831_v34 = vld [vmem:[%s10279_s3 + $0x1e0] sm:$0xf]  ;;  %v1383_v22 = vadd.f32 %v7722_v48, %v7682_v0 }
 0x1be   : > { %v1519_v29 = vpop.f32.mrf.mxu1  ;;  %v5832_v8 = vor.u32 %v6277_v35, %v5831_v34  ;;  %v6305_v34 = vld [vmem:[%s10279_s3 + $0x2cc] sm:$0xf0]  ;;  %v6239_v35 = vld [vmem:[%s10279_s3 + $0xc4] sm:$0xf] }
 0x1bf   : > { %v1757_v54 = vmax.f32 %v1419_v6, 0.0  ;;  %v1520_v33 = vadd.f32 %v1519_v29, %v1471_v53  ;;  %v6243_v53 = vld [vmem:[%s10279_s3 + $0xe4] sm:$0xf] }
 0x1c0   : > { %2662 = vmatpush.bf16.msra.mxu3 %v5832_v8 }
 0x1c1   : > { %v7726_v9 = vpack.c.bf16 %v1757_v54, %v1753_v60  ;;  %1616 = vmatmul.bf16.gmra.mxu3 %v7443_v13  ;;  %1714 = vmatmul.bf16.gmra.mxu1 %v7443_v13  ;;  %v1762_v14 = vmax.f32 %v1520_v33, 0.0  ;;  %v1375_v13 = vadd.f32 %v7687_v7, %v7682_v0  ;;  %v5960_v60 = vor.u32 %v6309_v31, %v5959_v39  ;;  %v6087_v54 = vld [vmem:[%s10279_s3 + $0x3e0] sm:$0xf]  ;;  %v6341_v33 = vld [vmem:[%s10279_s3 + $0x3ec] sm:$0xf0] }
 0x1c2   : > { %v1477_v11 = vpop.f32.mrf.mxu0  ;;  %v6265_v39 = vld [vmem:[%s10279_s3 + $0x18c] sm:$0xf0] }
 0x1c3   : > { %2711 = vmatpush.bf16.msra.mxu0 %v5960_v60 }
 0x1c4   : > { %v7732_v27 = vpop.f32.mrf.mxu2  ;;  %v1421_v52 = vpop.f32.mrf.mxu3 }
 0x1c5   : > { %v1422_v19 = vadd.f32 %v1421_v52, %v1373_v5  ;;  %v5708_v52 = vor.u32 %v6243_v53, %v5705_v49  ;;  %v1385_v48 = vadd.f32 %v7732_v27, %v7682_v0  ;;  %v5689_v27 = vld [vmem:[%s10279_s3 + $0xd0] sm:$0xf0] }
 0x1c6   : > { %v1521_v58 = vpop.f32.mrf.mxu1 }
 0x1c7   : > { %v1522_v16 = vadd.f32 %v1521_v58, %v1473_v15  ;;  %v1761_v28 = vmax.f32 %v1422_v19, 0.0  ;;  %v6088_v15 = vor.u32 %v6341_v33, %v6087_v54  ;;  %2809 = vmatpush.bf16.msra.mxu2 %v5708_v52  ;;  %v5751_v52 = vld [vmem:[%s10279_s3 + $0x140] sm:$0xf] }
 0x1c9   : > { %v1766_v56 = vmax.f32 %v1522_v16, 0.0  ;;  %1582 = vmatmul.bf16.gmra.mxu2 %v7453_v36  ;;  %2760 = vmatpush.bf16.msra.mxu1 %v6088_v15  ;;  %v6257_v15 = vld [vmem:[%s10279_s3 + $0x14c] sm:$0xf0] }
 0x1ca   : > { %v1480_v24 = vpop.f32.mrf.mxu0 }
 0x1cb   : > { %v7738_v10 = vpack.c.bf16 %v1766_v56, %v1762_v14 }
 0x1cc   : > { %v7746_v30 = vpop.f32.mrf.mxu2  ;;  %v1423_v57 = vpop.f32.mrf.mxu3 }
 0x1cd   : > { %v1424_v3 = vadd.f32 %v1423_v57, %v1375_v13  ;;  %1675 = vmatmul.bf16.gmra.mxu0 %v7430_v63 }
 0x1ce   : > { %v1524_v7 = vpop.f32.mrf.mxu1 }
 0x1cf   : > { %v1765_v17 = vmax.f32 %v1424_v3, 0.0  ;;  %v1525_v23 = vadd.f32 %v1524_v7, %v1476_v18  ;;  %v5799_v3 = vld [vmem:[%s10279_s3 + $0x1a0] sm:$0xf]  ;;  %v6269_v7 = vld [vmem:[%s10279_s3 + $0x1ac] sm:$0xf0] }
 0x1d1   : > { %v7750_v1 = vpack.c.bf16 %v1765_v17, %v1761_v28  ;;  %1621 = vmatmul.bf16.gmra.mxu3 %v7472_v43  ;;  %1719 = vmatmul.bf16.gmra.mxu1 %v7472_v43  ;;  %v1478_v43 = vadd.f32 %v1477_v11, %v7666_v61  ;;  %v1770_v21 = vmax.f32 %v1525_v23, 0.0  ;;  %v1481_v11 = vadd.f32 %v1480_v24, %v7666_v61  ;;  %v6273_v24 = vld [vmem:[%s10279_s3 + $0x1cc] sm:$0xf0]  ;;  %v5943_v23 = vld [vmem:[%s10279_s3 + $0x2c0] sm:$0xf] }
 0x1d2   : > { %v7760_v63 = vpop.f32.mrf.mxu0  ;;  %v5800_v28 = vor.u32 %v6269_v7, %v5799_v3  ;;  %v6039_v3 = vld [vmem:[%s10279_s3 + $0x380] sm:$0xf]  ;;  %v6329_v7 = vld [vmem:[%s10279_s3 + $0x38c] sm:$0xf0] }
 0x1d4   : > { %v7764_v12 = vpop.f32.mrf.mxu2  ;;  %v1426_v41 = vpop.f32.mrf.mxu3 }
 0x1d5   : > { %v1427_v38 = vadd.f32 %v1426_v41, %v1378_v25  ;;  %v5944_v41 = vor.u32 %v6305_v34, %v5943_v23  ;;  %v6040_v23 = vor.u32 %v6329_v7, %v6039_v3 }
 0x1d6   : > { %v1526_v40 = vpop.f32.mrf.mxu1 }
 0x1d7   : > { %v1527_v32 = vadd.f32 %v1526_v40, %v1478_v43  ;;  %v1769_v58 = vmax.f32 %v1427_v38, 0.0  ;;  %v6071_v43 = vld [vmem:[%s10279_s3 + $0x3c0] sm:$0xf]  ;;  %v6337_v38 = vld [vmem:[%s10279_s3 + $0x3cc] sm:$0xf0]  ;;  %2712 = vmatpush.bf16.msra.mxu0 %v5944_v41 }
 0x1d8   : > { %v6235_v41 = vld [vmem:[%s10279_s3 + $0xa4] sm:$0xf] }
 0x1d9   : > { %v1774_v45 = vmax.f32 %v1527_v32, 0.0  ;;  %1587 = vmatmul.bf16.gmra.mxu2 %v7500_v50 }
 0x1da   : > { %v1485_v2 = vpop.f32.mrf.mxu0 }
 0x1db   : > { %v7770_v51 = vpack.c.bf16 %v1774_v45, %v1770_v21  ;;  %v1486_v40 = vadd.f32 %v1485_v2, %v7666_v61  ;;  %v5692_v21 = vor.u32 %v6239_v35, %v5689_v27  ;;  %v6072_v45 = vor.u32 %v6337_v38, %v6071_v43  ;;  %v6261_v2 = vld [vmem:[%s10279_s3 + $0x16c] sm:$0xf0]  ;;  %v5673_v27 = vld [vmem:[%s10279_s3 + $0xb0] sm:$0xf0]  ;;  %v5719_v43 = vld [vmem:[%s10279_s3 + $0x100] sm:$0xf] }
 0x1dc   : > { %v7781_v6 = vpop.f32.mrf.mxu2  ;;  %v1428_v29 = vpop.f32.mrf.mxu3 }
 0x1dd   : > { %v1429_v5 = vadd.f32 %v1428_v29, %v1380_v44  ;;  %1680 = vmatmul.bf16.gmra.mxu0 %v7453_v36  ;;  %v5815_v36 = vld [vmem:[%s10279_s3 + $0x1c0] sm:$0xf]  ;;  %2810 = vmatpush.bf16.msra.mxu2 %v5692_v21 }
 0x1de   : > { %v1529_v19 = vpop.f32.mrf.mxu1  ;;  %v5816_v59 = vor.u32 %v6273_v24, %v5815_v36  ;;  %v5783_v44 = vld [vmem:[%s10279_s3 + $0x180] sm:$0xf]  ;;  %2761 = vmatpush.bf16.msra.mxu1 %v6072_v45  ;;  %v6325_v45 = vld [vmem:[%s10279_s3 + $0x36c] sm:$0xf0] }
 0x1df   : > { %v1773_v16 = vmax.f32 %v1429_v5, 0.0  ;;  %v7794_v14 = vadd.f32 %v1529_v19, %v1481_v11  ;;  %v5784_v53 = vor.u32 %v6265_v39, %v5783_v44  ;;  %v1388_v5 = vadd.f32 %v7746_v30, %v7682_v0  ;;  %v6055_v19 = vld [vmem:[%s10279_s3 + $0x3a0] sm:$0xf]  ;;  %v6333_v30 = vld [vmem:[%s10279_s3 + $0x3ac] sm:$0xf0] }
 0x1e0   : > { %2663 = vmatpush.bf16.msra.mxu3 %v5816_v59  ;;  %v6056_v24 = vor.u32 %v6333_v30, %v6055_v19  ;;  %v6023_v21 = vld [vmem:[%s10279_s3 + $0x360] sm:$0xf] }
 0x1e1   : > { %v7796_v56 = vpack.c.bf16 %v1773_v16, %v1769_v58  ;;  %1626 = vmatmul.bf16.gmra.mxu3 %v7525_v46  ;;  %1724 = vmatmul.bf16.gmra.mxu1 %v7525_v46  ;;  %v5752_v16 = vor.u32 %v6257_v15, %v5751_v52 }
 0x1e2   : > { %v7806_v13 = vpop.f32.mrf.mxu0  ;;  %2762 = vmatpush.bf16.msra.mxu1 %v6056_v24  ;;  %v1393_v24 = vadd.f32 %v7781_v6, %v7682_v0  ;;  %v6289_v6 = vld [vmem:[%s10279_s3 + $0x24c] sm:$0xf0] }
 0x1e4   : > { %v7810_v57 = vpop.f32.mrf.mxu2  ;;  %v1431_v62 = vpop.f32.mrf.mxu3  ;;  %2664 = vmatpush.bf16.msra.mxu3 %v5800_v28  ;;  %v5927_v28 = vld [vmem:[%s10279_s3 + $0x2a0] sm:$0xf] }
 0x1e5   : > { %v1432_v18 = vadd.f32 %v1431_v62, %v1383_v22  ;;  %v5735_v22 = vld [vmem:[%s10279_s3 + $0x120] sm:$0xf]  ;;  %v6253_v62 = vld [vmem:[%s10279_s3 + $0x12c] sm:$0xf0] }
 0x1e6   : > { %v7812_v46 = vpop.f32.mrf.mxu1  ;;  %2763 = vmatpush.bf16.msra.mxu1 %v6040_v23 }
 0x1e7   : > { %v1777_v29 = vmax.f32 %v1432_v18, 0.0  ;;  %v5736_v18 = vor.u32 %v6253_v62, %v5735_v22  ;;  %v5991_v22 = vld [vmem:[%s10279_s3 + $0x320] sm:$0xf] }
 0x1e8   : > { %2665 = vmatpush.bf16.msra.mxu3 %v5784_v53  ;;  %v6024_v53 = vor.u32 %v6325_v45, %v6023_v21  ;;  %v6231_v21 = vld [vmem:[%s10279_s3 + $0x84] sm:$0xf]  ;;  %v5657_v45 = vld [vmem:[%s10279_s3 + $0x90] sm:$0xf0] }
 0x1e9   : > { %1592 = vmatmul.bf16.gmra.mxu2 %v7553_v42 }
 0x1ea   : > { %v7821_v17 = vpop.f32.mrf.mxu0  ;;  %2764 = vmatpush.bf16.msra.mxu1 %v6024_v53 }
 0x1eb   : > { %v1491_v44 = vadd.f32 %v7821_v17, %v7666_v61  ;;  %v6321_v17 = vld [vmem:[%s10279_s3 + $0x34c] sm:$0xf0] }
 0x1ec   : > { %v7834_v8 = vpop.f32.mrf.mxu2  ;;  %v1433_v25 = vpop.f32.mrf.mxu3 }
 0x1ed   : > { %v1434_v32 = vadd.f32 %v1433_v25, %v1385_v48  ;;  %1685 = vmatmul.bf16.gmra.mxu0 %v7500_v50  ;;  %v5767_v50 = vld [vmem:[%s10279_s3 + $0x160] sm:$0xf]  ;;  %v6301_v48 = vld [vmem:[%s10279_s3 + $0x2ac] sm:$0xf0]  ;;  %v1390_v25 = vadd.f32 %v7764_v12, %v7682_v0 }
 0x1ee   : > { %v1534_v31 = vpop.f32.mrf.mxu1  ;;  %v5768_v54 = vor.u32 %v6261_v2, %v5767_v50  ;;  %v5928_v35 = vor.u32 %v6301_v48, %v5927_v28  ;;  %v6249_v12 = vld [vmem:[%s10279_s3 + $0x10c] sm:$0xf0]  ;;  %v5879_v28 = vld [vmem:[%s10279_s3 + $0x240] sm:$0xf] }
 0x1ef   : > { %v1781_v60 = vmax.f32 %v1434_v32, 0.0  ;;  %v7853_v49 = vadd.f32 %v1534_v31, %v1486_v40  ;;  %v5676_v32 = vor.u32 %v6235_v41, %v5673_v27  ;;  %v5720_v31 = vor.u32 %v6249_v12, %v5719_v43  ;;  %v5863_v27 = vld [vmem:[%s10279_s3 + $0x220] sm:$0xf]  ;;  %v6285_v43 = vld [vmem:[%s10279_s3 + $0x22c] sm:$0xf0] }
 0x1f0   : > { %2666 = vmatpush.bf16.msra.mxu3 %v5768_v54  ;;  %2713 = vmatpush.bf16.msra.mxu0 %v5928_v35  ;;  %v5880_v23 = vor.u32 %v6289_v6, %v5879_v28  ;;  %v5975_v35 = vld [vmem:[%s10279_s3 + $0x300] sm:$0xf]  ;;  %v1395_v12 = vadd.f32 %v7810_v57, %v7682_v0 }
 0x1f1   : > { %v7861_v33 = vpack.c.bf16 %v1781_v60, %v1777_v29  ;;  %1631 = vmatmul.bf16.gmra.mxu3 %v7587_v26  ;;  %1729 = vmatmul.bf16.gmra.mxu1 %v7587_v26  ;;  %v5911_v29 = vld [vmem:[%s10279_s3 + $0x280] sm:$0xf]  ;;  %v6297_v60 = vld [vmem:[%s10279_s3 + $0x28c] sm:$0xf0] }
 0x1f2   : > { %v7865_v11 = vpop.f32.mrf.mxu0  ;;  %2811 = vmatpush.bf16.msra.mxu2 %v5676_v32  ;;  %v5912_v2 = vor.u32 %v6297_v60, %v5911_v29  ;;  %v5864_v32 = vor.u32 %v6285_v43, %v5863_v27  ;;  %v5847_v57 = vld [vmem:[%s10279_s3 + $0x200] sm:$0xf]  ;;  %v6281_v60 = vld [vmem:[%s10279_s3 + $0x20c] sm:$0xf0] }
 0x1f4   : > { %v7878_v58 = vpop.f32.mrf.mxu2  ;;  %v1436_v26 = vpop.f32.mrf.mxu3  ;;  %2667 = vmatpush.bf16.msra.mxu3 %v5752_v16  ;;  %2714 = vmatpush.bf16.msra.mxu0 %v5912_v2  ;;  %v6293_v16 = vld [vmem:[%s10279_s3 + $0x26c] sm:$0xf0]  ;;  %v5848_v2 = vor.u32 %v6281_v60, %v5847_v57 }
 0x1f5   : > { %v1437_v36 = vadd.f32 %v1436_v26, %v1388_v5  ;;  %v5895_v26 = vld [vmem:[%s10279_s3 + $0x260] sm:$0xf] }
 0x1f6   : > { %v7883_v59 = vpop.f32.mrf.mxu1 }
 0x1f7   : > { %v1785_v54 = vmax.f32 %v1437_v36, 0.0  ;;  %v5896_v36 = vor.u32 %v6293_v16, %v5895_v26 }
 0x1f8   : > { %2668 = vmatpush.bf16.msra.mxu3 %v5736_v18 }
 0x1f9   : > { %2621 = vmatmul.bf16.vlgmr.msrb.gmra.mxu2 %v7704_v4  ;;  %2715 = vmatpush.bf16.msra.mxu0 %v5896_v36 }
 0x1fa   : > { %v7904_v34 = vpop.f32.mrf.mxu0 }
 0x1fb   : > { %v1496_v53 = vadd.f32 %v7904_v34, %v7666_v61 }
 0x1fc   : > { %v1438_v38 = vpop.f32.mrf.mxu3  ;;  %v7917_v40 = vpop.f32.mrf.mxu2  ;;  %2669 = vmatpush.bf16.msra.mxu3 %v5720_v31  ;;  %v5660_v31 = vor.u32 %v6231_v21, %v5657_v45 }
 0x1fd   : > { %v1439_v39 = vadd.f32 %v1438_v38, %v1390_v25  ;;  %1690 = vmatmul.bf16.gmra.mxu0 %v7553_v42  ;;  %v6007_v42 = vld [vmem:[%s10279_s3 + $0x340] sm:$0xf]  ;;  %v6313_v25 = vld [vmem:[%s10279_s3 + $0x30c] sm:$0xf0] }
 0x1fe   : > { %v1539_v50 = vpop.f32.mrf.mxu1  ;;  %v6008_v15 = vor.u32 %v6321_v17, %v6007_v42  ;;  %2716 = vmatpush.bf16.msra.mxu0 %v5880_v23  ;;  %v5976_v41 = vor.u32 %v6313_v25, %v5975_v35  ;;  %2812 = vmatpush.bf16.msra.mxu2 %v5660_v31 }
 0x1ff   : > { %v1789_v5 = vmax.f32 %v1439_v39, 0.0  ;;  %v7937_v52 = vadd.f32 %v1539_v50, %v1491_v44 }
 0x200   : > { %2765 = vmatpush.bf16.msra.mxu1 %v6008_v15  ;;  %v1398_v15 = vadd.f32 %v7834_v8, %v7682_v0  ;;  %v5641_v8 = vld [vmem:[%s10279_s3 + $0x70] sm:$0xf0] }
 0x201   : > { %v7945_v19 = vpack.c.bf16 %v1789_v5, %v1785_v54  ;;  %1636 = vmatmul.bf16.gmra.mxu3 %v7647_v20  ;;  %1734 = vmatmul.bf16.gmra.mxu1 %v7647_v20  ;;  %v6317_v20 = vld [vmem:[%s10279_s3 + $0x32c] sm:$0xf0] }
 0x202   : > { %v7955_v30 = vpop.f32.mrf.mxu0  ;;  %v5992_v3 = vor.u32 %v6317_v20, %v5991_v22  ;;  %2717 = vmatpush.bf16.msra.mxu0 %v5864_v32  ;;  %v1400_v20 = vadd.f32 %v7878_v58, %v7682_v0 }
 0x204   : > { %v1441_v62 = vpop.f32.mrf.mxu3  ;;  %v7965_v18 = vpop.f32.mrf.mxu2  ;;  %2766 = vmatpush.bf16.msra.mxu1 %v5992_v3 }
 0x205   : > { %v1442_v7 = vadd.f32 %v1441_v62, %v1393_v24  ;;  %v309_v62 = vld [vmem:[%s10281_s5 + $0x18] sm:$0xff] }
 0x206   : > { %v7973_v48 = vpop.f32.mrf.mxu1  ;;  %2718 = vmatpush.bf16.msra.mxu0 %v5848_v2  ;;  %v8032_v0 = vperm.slane %v309_v62, 0 }
 0x207   : > { %v1793_v54 = vmax.f32 %v1442_v7, 0.0 }
 0x208   : > { %2767 = vmatpush.bf16.msra.mxu1 %v5976_v41  ;;  %v308_v41 = vld [vmem:[%s10281_s5 + $0x10] sm:$0xff] }
 0x209   : > { %2626 = vmatmul.bf16.gmra.mxu2 %v7726_v9  ;;  %v8043_v21 = vperm.slane %v308_v41, 0 }
 0x20a   : > { %v1656_v38 = vpop.f32.mrf.mxu0 }
 0x20b   : > { %v1657_v43 = vadd.f32 %v1656_v38, %v8032_v0  ;;  %v1561_v38 = vadd.f32 %v7965_v18, %v8043_v21 }
 0x20c   : > { %v1443_v44 = vpop.f32.mrf.mxu3  ;;  %v7996_v39 = vpop.f32.mrf.mxu2 }
 0x20d   : > { %v1444_v29 = vadd.f32 %v1443_v44, %v1395_v12 }
 0x20e   : > { %v1544_v50 = vpop.f32.mrf.mxu1 }
 0x20f   : > { %v1797_v5 = vmax.f32 %v1444_v29, 0.0  ;;  %v8006_v42 = vadd.f32 %v1544_v50, %v1496_v53  ;;  %v1559_v29 = vadd.f32 %v7917_v40, %v8043_v21 }
 0x211   : > { %v8008_v17 = vpack.c.bf16 %v1797_v5, %v1793_v54  ;;  %1641 = vmatmul.bf16.gmra.mxu3 %v7659_v37  ;;  %1739 = vmatmul.bf16.gmra.mxu1 %v7659_v37  ;;  %v6227_v37 = vld [vmem:[%s10279_s3 + $0x64] sm:$0xf] }
 0x212   : > { %v1658_v34 = vpop.f32.mrf.mxu0  ;;  %v5644_v28 = vor.u32 %v6227_v37, %v5641_v8  ;;  %v6223_v5 = vld [vmem:[%s10279_s3 + $0x44] sm:$0xf] }
 0x213   : > { %v1659_v45 = vadd.f32 %v1658_v34, %v8032_v0  ;;  %v5625_v34 = vld [vmem:[%s10279_s3 + $0x50] sm:$0xf0] }
 0x214   : > { %v1446_v26 = vpop.f32.mrf.mxu3  ;;  %v8014_v16 = vpop.f32.mrf.mxu2  ;;  %2813 = vmatpush.bf16.msra.mxu2 %v5644_v28 }
 0x215   : > { %v1447_v36 = vadd.f32 %v1446_v26, %v1398_v15  ;;  %v5628_v26 = vor.u32 %v6223_v5, %v5625_v34 }
 0x216   : > { %v8016_v24 = vpop.f32.mrf.mxu1 }
 0x217   : > { %v1801_v58 = vmax.f32 %v1447_v36, 0.0 }
 0x218   : > { %2814 = vmatpush.bf16.msra.mxu2 %v5628_v26 }
 0x219   : > { %2631 = vmatmul.bf16.gmra.mxu2 %v7750_v1 }
 0x21a   : > { %v1661_v22 = vpop.f32.mrf.mxu0 }
 0x21c   : > { %v1448_v3 = vpop.f32.mrf.mxu3  ;;  %v8030_v7 = vpop.f32.mrf.mxu2 }
 0x21d   : > { %v1449_v6 = vadd.f32 %v1448_v3, %v1400_v20  ;;  %v1662_v3 = vadd.f32 %v1661_v22, %v8032_v0  ;;  %v1566_v22 = vadd.f32 %v8014_v16, %v8043_v21 }
 0x21e   : > { %v1705_v23 = vpop.f32.mrf.mxu1 }
 0x21f   : > { %v1805_v35 = vmax.f32 %v1449_v6, 0.0  ;;  %v1706_v44 = vadd.f32 %v1705_v23, %v1657_v43  ;;  %v1564_v43 = vadd.f32 %v7996_v39, %v8043_v21 }
 0x221   : > { %v8034_v25 = vpack.c.bf16 %v1805_v35, %v1801_v58  ;;  %2670 = vmatmul.bf16.vlgmr.msra.gmra.mxu3 %v7692_v47  ;;  %v1748_v57 = vmax.f32 %v1706_v44, 0.0 }
 0x222   : > { %v1663_v27 = vpop.f32.mrf.mxu0 }
 0x223   : > { %v1664_v23 = vadd.f32 %v1663_v27, %v8032_v0  ;;  %v6219_v27 = vld [vmem:[%s10279_s3 + $0x24] sm:$0xf] }
 0x224   : > { %v8041_v32 = vpop.f32.mrf.mxu2  ;;  %v1607_v12 = vpop.f32.mrf.mxu3 }
 0x225   : > { %v1608_v2 = vadd.f32 %v1607_v12, %v1559_v29  ;;  %v5609_v29 = vld [vmem:[%s10279_s3 + $0x30] sm:$0xf0] }
 0x226   : > { %v1707_v31 = vpop.f32.mrf.mxu1 }
 0x227   : > { %v1708_v53 = vadd.f32 %v1707_v31, %v1659_v45  ;;  %v1747_v18 = vmax.f32 %v1608_v2, 0.0 }
 0x229   : > { %v1752_v60 = vmax.f32 %v1708_v53, 0.0  ;;  %2636 = vmatmul.bf16.gmra.mxu2 %v7796_v56 }
 0x22a   : > { %v1666_v50 = vpop.f32.mrf.mxu0 }
 0x22b   : > { %v8051_v54 = vpack.c.bf16 %v1752_v60, %v1748_v57  ;;  %v5612_v60 = vor.u32 %v6219_v27, %v5609_v29  ;;  %v1667_v26 = vadd.f32 %v1666_v50, %v8032_v0  ;;  %v1571_v50 = vadd.f32 %v8041_v32, %v8043_v21 }
 0x22c   : > { %v8059_v40 = vpop.f32.mrf.mxu2  ;;  %v1609_v15 = vpop.f32.mrf.mxu3 }
 0x22d   : > { %v1610_v36 = vadd.f32 %v1609_v15, %v1561_v38  ;;  %2768 = vmatmul.bf16.vlgmr.msra.gmra.mxu1 %v8051_v54  ;;  %2815 = vmatpush.bf16.msra.mxu2 %v5612_v60 }
 0x22e   : > { %v1710_v20 = vpop.f32.mrf.mxu1 }
 0x22f   : > { %v1751_v37 = vmax.f32 %v1610_v36, 0.0  ;;  %v1711_v58 = vadd.f32 %v1710_v20, %v1662_v3 }
 0x231   : > { %v8062_v8 = vpack.c.bf16 %v1751_v37, %v1747_v18  ;;  %2675 = vmatmul.bf16.gmra.mxu3 %v7714_v55  ;;  %v1756_v12 = vmax.f32 %v1711_v58, 0.0 }
 0x232   : > { %v1668_v62 = vpop.f32.mrf.mxu0 }
 0x233   : > { %2719 = vmatmul.bf16.vlgmr.msra.gmra.mxu0 %v8062_v8  ;;  %v1669_v18 = vadd.f32 %v1668_v62, %v8032_v0  ;;  %v6215_v62 = vld [vmem:[%s10279_s3 + $0x4] sm:$0xf] }
 0x234   : > { %v8067_v28 = vpop.f32.mrf.mxu2  ;;  %v1612_v6 = vpop.f32.mrf.mxu3 }
 0x235   : > { %v1613_v31 = vadd.f32 %v1612_v6, %v1564_v43 }
 0x236   : > { %v1712_v35 = vpop.f32.mrf.mxu1 }
 0x237   : > { %v1713_v41 = vadd.f32 %v1712_v35, %v1664_v23  ;;  %v1755_v16 = vmax.f32 %v1613_v31, 0.0  ;;  %v1569_v23 = vadd.f32 %v8030_v7, %v8043_v21  ;;  %v5593_v7 = vld [vmem:[%s10279_s3 + $0x10] sm:$0xf0] }
 0x238   : > { %v5596_v31 = vor.u32 %v6215_v62, %v5593_v7  ;;  %v1576_v62 = vadd.f32 %v8067_v28, %v8043_v21  ;;  %v6246_v28 = vld [vmem:[%s10279_s3 + $0xf4] sm:$0xf0] }
 0x239   : > { %v1760_v45 = vmax.f32 %v1713_v41, 0.0  ;;  %2641 = vmatmul.bf16.gmra.mxu2 %v7861_v33 }
 0x23a   : > { %v1671_v44 = vpop.f32.mrf.mxu0  ;;  %2816 = vmatpush.bf16.msra.mxu2 %v5596_v31 }
 0x23b   : > { %v8075_v53 = vpack.c.bf16 %v1760_v45, %v1756_v12 }
 0x23c   : > { %v8083_v39 = vpop.f32.mrf.mxu2  ;;  %v1614_v57 = vpop.f32.mrf.mxu3 }
 0x23d   : > { %v1615_v38 = vadd.f32 %v1614_v57, %v1566_v22  ;;  %2773 = vmatmul.bf16.gmra.mxu1 %v8075_v53 }
 0x23e   : > { %v1715_v2 = vpop.f32.mrf.mxu1 }
 0x23f   : > { %v1759_v5 = vmax.f32 %v1615_v38, 0.0  ;;  %v1716_v37 = vadd.f32 %v1715_v2, %v1667_v26  ;;  %v6275_v38 = vld [vmem:[%s10279_s3 + $0x1e4] sm:$0xf]  ;;  %v5833_v2 = vld [vmem:[%s10279_s3 + $0x1f0] sm:$0xf0]  ;;  %v1483_v26 = vadd.f32 %v7760_v63, %v7666_v61 }
 0x241   : > { %v8086_v34 = vpack.c.bf16 %v1759_v5, %v1755_v16  ;;  %2680 = vmatmul.bf16.gmra.mxu3 %v7738_v10  ;;  %v1764_v58 = vmax.f32 %v1716_v37, 0.0  ;;  %v5836_v16 = vor.u32 %v6275_v38, %v5833_v2  ;;  %v1672_v5 = vadd.f32 %v1671_v44, %v8032_v0 }
 0x242   : > { %v1673_v15 = vpop.f32.mrf.mxu0  ;;  %v1574_v44 = vadd.f32 %v8059_v40, %v8043_v21  ;;  %v5711_v40 = vld [vmem:[%s10279_s3 + $0xe8] sm:$0xf]  ;;  %v1778_v38 = vmax.f32 %v7794_v14, 0.0  ;;  %v6271_v14 = vld [vmem:[%s10279_s3 + $0x1c4] sm:$0xf] }
 0x243   : > { %2724 = vmatmul.bf16.gmra.mxu0 %v8086_v34  ;;  %2858 = vmatpush.bf16.msrb.mxu3 %v5836_v16  ;;  %v1674_v37 = vadd.f32 %v1673_v15, %v8032_v0  ;;  %v5961_v15 = vld [vmem:[%s10279_s3 + $0x2f0] sm:$0xf0]  ;;  %v5712_v16 = vor.u32 %v6246_v28, %v5711_v40  ;;  %v1579_v28 = vadd.f32 %v8083_v39, %v8043_v21 }
 0x244   : > { %v8091_v36 = vpop.f32.mrf.mxu2  ;;  %v1617_v20 = vpop.f32.mrf.mxu3  ;;  %v5945_v39 = vld [vmem:[%s10279_s3 + $0x2d0] sm:$0xf0] }
 0x245   : > { %v1618_v41 = vadd.f32 %v1617_v20, %v1569_v23  ;;  %v1532_v23 = vadd.f32 %v7812_v46, %v1483_v26  ;;  %v6307_v46 = vld [vmem:[%s10279_s3 + $0x2e4] sm:$0xf]  ;;  %3005 = vmatpush.bf16.msrb.mxu2 %v5712_v16 }
 0x246   : > { %v1717_v3 = vpop.f32.mrf.mxu1 }
 0x247   : > { %v1718_v6 = vadd.f32 %v1717_v3, %v1669_v18  ;;  %v1763_v29 = vmax.f32 %v1618_v41, 0.0  ;;  %v1782_v63 = vmax.f32 %v1532_v23, 0.0 }
 0x249   : > { %v1768_v35 = vmax.f32 %v1718_v6, 0.0  ;;  %2646 = vmatmul.bf16.gmra.mxu2 %v7945_v19 }
 0x24a   : > { %v8101_v12 = vpop.f32.mrf.mxu0 }
 0x24b   : > { %v8099_v43 = vpack.c.bf16 %v1768_v35, %v1764_v58 }
 0x24c   : > { %v8109_v45 = vpop.f32.mrf.mxu2  ;;  %v1619_v22 = vpop.f32.mrf.mxu3 }
 0x24d   : > { %v1620_v27 = vadd.f32 %v1619_v22, %v1571_v50  ;;  %2778 = vmatmul.bf16.gmra.mxu1 %v8099_v43 }
 0x24e   : > { %v1720_v32 = vpop.f32.mrf.mxu1 }
 0x24f   : > { %v1767_v57 = vmax.f32 %v1620_v27, 0.0  ;;  %v1721_v3 = vadd.f32 %v1720_v32, %v1672_v5  ;;  %v5964_v32 = vor.u32 %v6307_v46, %v5961_v15 }
 0x251   : > { %v8112_v60 = vpack.c.bf16 %v1767_v57, %v1763_v29  ;;  %2685 = vmatmul.bf16.gmra.mxu3 %v7770_v51  ;;  %v1772_v50 = vmax.f32 %v1721_v3, 0.0  ;;  %v6339_v29 = vld [vmem:[%s10279_s3 + $0x3e4] sm:$0xf]  ;;  %v6089_v57 = vld [vmem:[%s10279_s3 + $0x3f0] sm:$0xf0]  ;;  %2907 = vmatpush.bf16.msrb.mxu0 %v5964_v32 }
 0x252   : > { %v1678_v6 = vpop.f32.mrf.mxu0  ;;  %v6092_v5 = vor.u32 %v6339_v29, %v6089_v57  ;;  %v5801_v32 = vld [vmem:[%s10279_s3 + $0x1b0] sm:$0xf0] }
 0x253   : > { %2729 = vmatmul.bf16.gmra.mxu0 %v8112_v60 }
 0x254   : > { %v8125_v20 = vpop.f32.mrf.mxu2  ;;  %v1622_v18 = vpop.f32.mrf.mxu3  ;;  %2956 = vmatpush.bf16.msrb.mxu1 %v6092_v5  ;;  %v6303_v5 = vld [vmem:[%s10279_s3 + $0x2c4] sm:$0xf] }
 0x255   : > { %v1623_v7 = vadd.f32 %v1622_v18, %v1574_v44  ;;  %v8158_v18 = vpack.c.bf16 %v1782_v63, %v1778_v38  ;;  %v1581_v38 = vadd.f32 %v8091_v36, %v8043_v21  ;;  %v6242_v36 = vld [vmem:[%s10279_s3 + $0xd4] sm:$0xf0] }
 0x256   : > { %v1722_v58 = vpop.f32.mrf.mxu1 }
 0x257   : > { %v1723_v35 = vadd.f32 %v1722_v58, %v1674_v37  ;;  %v1771_v37 = vmax.f32 %v1623_v7, 0.0  ;;  %v1679_v7 = vadd.f32 %v1678_v6, %v8032_v0 }
 0x259   : > { %v1776_v41 = vmax.f32 %v1723_v35, 0.0  ;;  %2651 = vmatmul.bf16.gmra.mxu2 %v8008_v17  ;;  %v5817_v35 = vld [vmem:[%s10279_s3 + $0x1d0] sm:$0xf0] }
 0x25a   : > { %v8160_v3 = vpop.f32.mrf.mxu0  ;;  %v5820_v44 = vor.u32 %v6271_v14, %v5817_v35  ;;  %v5948_v14 = vor.u32 %v6303_v5, %v5945_v39  ;;  %v6335_v35 = vld [vmem:[%s10279_s3 + $0x3c4] sm:$0xf]  ;;  %v5753_v5 = vld [vmem:[%s10279_s3 + $0x150] sm:$0xf0] }
 0x25b   : > { %v8134_v22 = vpack.c.bf16 %v1776_v41, %v1772_v50  ;;  %v1677_v50 = vadd.f32 %v8101_v12, %v8032_v0  ;;  %v1488_v41 = vadd.f32 %v7806_v13, %v7666_v61  ;;  %v6267_v12 = vld [vmem:[%s10279_s3 + $0x1a4] sm:$0xf] }
 0x25c   : > { %v8145_v31 = vpop.f32.mrf.mxu2  ;;  %v1624_v27 = vpop.f32.mrf.mxu3  ;;  %2859 = vmatpush.bf16.msrb.mxu3 %v5820_v44  ;;  %v5804_v13 = vor.u32 %v6267_v12, %v5801_v32  ;;  %v6073_v44 = vld [vmem:[%s10279_s3 + $0x3d0] sm:$0xf0]  ;;  %2908 = vmatpush.bf16.msrb.mxu0 %v5948_v14  ;;  %v6331_v39 = vld [vmem:[%s10279_s3 + $0x3a4] sm:$0xf] }
 0x25d   : > { %v1625_v2 = vadd.f32 %v1624_v27, %v1576_v62  ;;  %2783 = vmatmul.bf16.gmra.mxu1 %v8134_v22  ;;  %v1537_v15 = vadd.f32 %v7883_v59, %v1488_v41 }
 0x25e   : > { %v1725_v26 = vpop.f32.mrf.mxu1 }
 0x25f   : > { %v1775_v23 = vmax.f32 %v1625_v2, 0.0  ;;  %v1726_v46 = vadd.f32 %v1725_v26, %v1677_v50  ;;  %v1790_v59 = vmax.f32 %v1537_v15, 0.0  ;;  %v5695_v26 = vld [vmem:[%s10279_s3 + $0xc8] sm:$0xf]  ;;  %v1786_v50 = vmax.f32 %v7853_v49, 0.0 }
 0x260   : > { %2860 = vmatpush.bf16.msrb.mxu3 %v5804_v13  ;;  %v5785_v15 = vld [vmem:[%s10279_s3 + $0x190] sm:$0xf0]  ;;  %v6259_v13 = vld [vmem:[%s10279_s3 + $0x164] sm:$0xf] }
 0x261   : > { %v8162_v58 = vpack.c.bf16 %v1775_v23, %v1771_v37  ;;  %2690 = vmatmul.bf16.gmra.mxu3 %v8158_v18  ;;  %v1780_v29 = vmax.f32 %v1726_v46, 0.0  ;;  %v6263_v46 = vld [vmem:[%s10279_s3 + $0x184] sm:$0xf]  ;;  %v8221_v12 = vpack.c.bf16 %v1790_v59, %v1786_v50  ;;  %v1682_v59 = vadd.f32 %v8160_v3, %v8032_v0 }
 0x262   : > { %v1683_v57 = vpop.f32.mrf.mxu0 }
 0x263   : > { %2734 = vmatmul.bf16.gmra.mxu0 %v8162_v58 }
 0x264   : > { %v8176_v63 = vpop.f32.mrf.mxu2  ;;  %v1627_v62 = vpop.f32.mrf.mxu3 }
 0x265   : > { %v1628_v2 = vadd.f32 %v1627_v62, %v1579_v28  ;;  %v5696_v62 = vor.u32 %v6242_v36, %v5695_v26  ;;  %v5769_v28 = vld [vmem:[%s10279_s3 + $0x170] sm:$0xf0]  ;;  %v1493_v26 = vadd.f32 %v7865_v11, %v7666_v61  ;;  %v6251_v11 = vld [vmem:[%s10279_s3 + $0x124] sm:$0xf] }
 0x266   : > { %v1727_v40 = vpop.f32.mrf.mxu1  ;;  %v6057_v36 = vld [vmem:[%s10279_s3 + $0x3b0] sm:$0xf0] }
 0x267   : > { %v1728_v27 = vadd.f32 %v1727_v40, %v1679_v7  ;;  %v6076_v7 = vor.u32 %v6335_v35, %v6073_v44  ;;  %v1779_v32 = vmax.f32 %v1628_v2, 0.0  ;;  %3006 = vmatpush.bf16.msrb.mxu2 %v5696_v62  ;;  %v6255_v2 = vld [vmem:[%s10279_s3 + $0x144] sm:$0xf]  ;;  %v1684_v35 = vadd.f32 %v1683_v57, %v8032_v0 }
 0x268   : > { %v5756_v14 = vor.u32 %v6255_v2, %v5753_v5  ;;  %v6060_v50 = vor.u32 %v6331_v39, %v6057_v36  ;;  %v6327_v57 = vld [vmem:[%s10279_s3 + $0x384] sm:$0xf]  ;;  %v1586_v2 = vadd.f32 %v8125_v20, %v8043_v21  ;;  %v5679_v39 = vld [vmem:[%s10279_s3 + $0xa8] sm:$0xf] }
 0x269   : > { %v1784_v6 = vmax.f32 %v1728_v27, 0.0  ;;  %2656 = vmatmul.bf16.gmra.mxu2 %v8034_v25  ;;  %v5788_v27 = vor.u32 %v6263_v46, %v5785_v15  ;;  %2957 = vmatpush.bf16.msrb.mxu1 %v6076_v7  ;;  %v5737_v46 = vld [vmem:[%s10279_s3 + $0x130] sm:$0xf0] }
 0x26a   : > { %v5740_v15 = vor.u32 %v6251_v11, %v5737_v46  ;;  %v6295_v46 = vld [vmem:[%s10279_s3 + $0x284] sm:$0xf] }
 0x26b   : > { %v8191_v16 = vpack.c.bf16 %v1784_v6, %v1780_v29  ;;  %2861 = vmatpush.bf16.msrb.mxu3 %v5788_v27  ;;  %v5772_v29 = vor.u32 %v6259_v13, %v5769_v28  ;;  %v5929_v13 = vld [vmem:[%s10279_s3 + $0x2b0] sm:$0xf0] }
 0x26c   : > { %v8202_v37 = vpop.f32.mrf.mxu2  ;;  %v1629_v23 = vpop.f32.mrf.mxu3 }
 0x26d   : > { %v1630_v41 = vadd.f32 %v1629_v23, %v1581_v38  ;;  %2788 = vmatmul.bf16.gmra.mxu1 %v8191_v16  ;;  %v8234_v38 = vpop.f32.mrf.mxu0 }
 0x26e   : > { %v1730_v40 = vpop.f32.mrf.mxu1  ;;  %2958 = vmatpush.bf16.msrb.mxu1 %v6060_v50  ;;  %v6025_v50 = vld [vmem:[%s10279_s3 + $0x370] sm:$0xf0] }
 0x26f   : > { %v1783_v49 = vmax.f32 %v1630_v41, 0.0  ;;  %2862 = vmatpush.bf16.msrb.mxu3 %v5772_v29  ;;  %v1731_v44 = vadd.f32 %v1730_v40, %v1682_v59  ;;  %v1542_v41 = vadd.f32 %v7973_v48, %v1493_v26  ;;  %v6041_v48 = vld [vmem:[%s10279_s3 + $0x390] sm:$0xf0]  ;;  %v1584_v40 = vadd.f32 %v8109_v45, %v8043_v21  ;;  %v6238_v26 = vld [vmem:[%s10279_s3 + $0xb4] sm:$0xf0] }
 0x270   : > { %v6044_v28 = vor.u32 %v6327_v57, %v6041_v48  ;;  %v5680_v20 = vor.u32 %v6238_v26, %v5679_v39  ;;  %v1687_v39 = vadd.f32 %v8234_v38, %v8032_v0  ;;  %v6315_v26 = vld [vmem:[%s10279_s3 + $0x324] sm:$0xf] }
 0x271   : > { %v8229_v6 = vpack.c.bf16 %v1783_v49, %v1779_v32  ;;  %2695 = vmatmul.bf16.gmra.mxu3 %v8221_v12  ;;  %v1788_v27 = vmax.f32 %v1731_v44, 0.0  ;;  %v6299_v49 = vld [vmem:[%s10279_s3 + $0x2a4] sm:$0xf]  ;;  %v1798_v29 = vmax.f32 %v1542_v41, 0.0  ;;  %v1794_v41 = vmax.f32 %v7937_v52, 0.0 }
 0x272   : > { %v5932_v59 = vor.u32 %v6299_v49, %v5929_v13  ;;  %2959 = vmatpush.bf16.msrb.mxu1 %v6044_v28  ;;  %v6323_v44 = vld [vmem:[%s10279_s3 + $0x364] sm:$0xf]  ;;  %3007 = vmatpush.bf16.msrb.mxu2 %v5680_v20  ;;  %v6009_v13 = vld [vmem:[%s10279_s3 + $0x350] sm:$0xf0] }
 0x273   : > { %2739 = vmatmul.bf16.gmra.mxu0 %v8229_v6  ;;  %2863 = vmatpush.bf16.msrb.mxu3 %v5756_v14  ;;  %v6247_v14 = vld [vmem:[%s10279_s3 + $0x104] sm:$0xf]  ;;  %v6028_v11 = vor.u32 %v6323_v44, %v6025_v50 }
 0x274   : > { %v8248_v3 = vpop.f32.mrf.mxu2  ;;  %v1632_v23 = vpop.f32.mrf.mxu3  ;;  %2909 = vmatpush.bf16.msrb.mxu0 %v5932_v59  ;;  %v6319_v49 = vld [vmem:[%s10279_s3 + $0x344] sm:$0xf] }
 0x275   : > { %v1633_v5 = vadd.f32 %v1632_v23, %v1584_v40  ;;  %v5721_v23 = vld [vmem:[%s10279_s3 + $0x110] sm:$0xf0]  ;;  %v1688_v57 = vpop.f32.mrf.mxu0  ;;  %v6012_v28 = vor.u32 %v6319_v49, %v6009_v13  ;;  %v6234_v49 = vld [vmem:[%s10279_s3 + $0x94] sm:$0xf0] }
 0x276   : > { %v1732_v62 = vpop.f32.mrf.mxu1  ;;  %2960 = vmatpush.bf16.msrb.mxu1 %v6028_v11  ;;  %v1689_v38 = vadd.f32 %v1688_v57, %v8032_v0 }
 0x277   : > { %v1733_v7 = vadd.f32 %v1732_v62, %v1684_v35  ;;  %2864 = vmatpush.bf16.msrb.mxu3 %v5740_v15  ;;  %v5913_v15 = vld [vmem:[%s10279_s3 + $0x290] sm:$0xf0]  ;;  %v1787_v52 = vmax.f32 %v1633_v5, 0.0 }
 0x278   : > { %v5916_v40 = vor.u32 %v6295_v46, %v5913_v15  ;;  %v6311_v46 = vld [vmem:[%s10279_s3 + $0x304] sm:$0xf]  ;;  %v5977_v15 = vld [vmem:[%s10279_s3 + $0x310] sm:$0xf0] }
 0x279   : > { %v1792_v32 = vmax.f32 %v1733_v7, 0.0  ;;  %2817 = vmatmul.bf16.vlgmr.msra.gmra.mxu2 %v7704_v4  ;;  %v5724_v7 = vor.u32 %v6247_v14, %v5721_v23  ;;  %v5993_v14 = vld [vmem:[%s10279_s3 + $0x330] sm:$0xf0] }
 0x27a   : > { %2910 = vmatpush.bf16.msrb.mxu0 %v5916_v40  ;;  %2961 = vmatpush.bf16.msrb.mxu1 %v6012_v28  ;;  %v5996_v44 = vor.u32 %v6315_v26, %v5993_v14  ;;  %v1589_v40 = vadd.f32 %v8145_v31, %v8043_v21  ;;  %v5865_v31 = vld [vmem:[%s10279_s3 + $0x230] sm:$0xf0] }
 0x27b   : > { %v8278_v45 = vpack.c.bf16 %v1792_v32, %v1788_v27  ;;  %v8308_v27 = vpack.c.bf16 %v1798_v29, %v1794_v41  ;;  %2865 = vmatpush.bf16.msrb.mxu3 %v5724_v7  ;;  %v6291_v29 = vld [vmem:[%s10279_s3 + $0x264] sm:$0xf] }
 0x27c   : > { %v1634_v36 = vpop.f32.mrf.mxu3  ;;  %v8289_v35 = vpop.f32.mrf.mxu2  ;;  %v6287_v41 = vld [vmem:[%s10279_s3 + $0x244] sm:$0xf] }
 0x27d   : > { %v1635_v62 = vadd.f32 %v1634_v36, %v1586_v2  ;;  %2793 = vmatmul.bf16.gmra.mxu1 %v8278_v45  ;;  %v5897_v2 = vld [vmem:[%s10279_s3 + $0x270] sm:$0xf0]  ;;  %v1498_v36 = vadd.f32 %v7955_v30, %v7666_v61  ;;  %v1691_v57 = vpop.f32.mrf.mxu0 }
 0x27e   : > { %v1735_v48 = vpop.f32.mrf.mxu1  ;;  %v5900_v5 = vor.u32 %v6291_v29, %v5897_v2  ;;  %2962 = vmatpush.bf16.msrb.mxu1 %v5996_v44  ;;  %v6283_v29 = vld [vmem:[%s10279_s3 + $0x224] sm:$0xf]  ;;  %v1591_v2 = vadd.f32 %v8176_v63, %v8043_v21  ;;  %v1802_v44 = vmax.f32 %v8006_v42, 0.0  ;;  %v5849_v63 = vld [vmem:[%s10279_s3 + $0x210] sm:$0xf0] }
 0x27f   : > { %v1791_v32 = vmax.f32 %v1635_v62, 0.0  ;;  %v1736_v50 = vadd.f32 %v1735_v48, %v1687_v39  ;;  %v5881_v62 = vld [vmem:[%s10279_s3 + $0x250] sm:$0xf0]  ;;  %v1547_v7 = vadd.f32 %v8016_v24, %v1498_v36  ;;  %v5980_v48 = vor.u32 %v6311_v46, %v5977_v15 }
 0x280   : > { %2911 = vmatpush.bf16.msrb.mxu0 %v5900_v5  ;;  %v5884_v61 = vor.u32 %v6287_v41, %v5881_v62  ;;  %v5868_v26 = vor.u32 %v6283_v29, %v5865_v31  ;;  %v6230_v31 = vld [vmem:[%s10279_s3 + $0x74] sm:$0xf0] }
 0x281   : > { %v8316_v59 = vpack.c.bf16 %v1791_v32, %v1787_v52  ;;  %2700 = vmatmul.bf16.gmra.mxu3 %v8308_v27  ;;  %v1796_v52 = vmax.f32 %v1736_v50, 0.0  ;;  %v5663_v32 = vld [vmem:[%s10279_s3 + $0x88] sm:$0xf]  ;;  %v1806_v13 = vmax.f32 %v1547_v7, 0.0  ;;  %v6279_v50 = vld [vmem:[%s10279_s3 + $0x204] sm:$0xf] }
 0x282   : > { %v5664_v28 = vor.u32 %v6234_v49, %v5663_v32  ;;  %2963 = vmatpush.bf16.msrb.mxu1 %v5980_v48  ;;  %v5852_v41 = vor.u32 %v6279_v50, %v5849_v63  ;;  %v1594_v32 = vadd.f32 %v8202_v37, %v8043_v21 }
 0x283   : > { %2744 = vmatmul.bf16.gmra.mxu0 %v8316_v59  ;;  %v8381_v62 = vpack.c.bf16 %v1806_v13, %v1802_v44 }
 0x284   : > { %v1637_v20 = vpop.f32.mrf.mxu3  ;;  %v8336_v23 = vpop.f32.mrf.mxu2  ;;  %2912 = vmatpush.bf16.msrb.mxu0 %v5884_v61  ;;  %3008 = vmatpush.bf16.msrb.mxu2 %v5664_v28  ;;  %v1596_v28 = vadd.f32 %v8248_v3, %v8043_v21  ;;  %v6544_v21 = vld [vmem:[%s10281_s5] sm:$0xff] }
 0x285   : > { %v1638_v5 = vadd.f32 %v1637_v20, %v1589_v40  ;;  %v1693_v42 = vpop.f32.mrf.mxu0  ;;  %v8406_v3 = vperm.slane %v6544_v21, 1  ;;  %v6222_v21 = vld [vmem:[%s10279_s3 + $0x34] sm:$0xf0] }
 0x286   : > { %v1737_v11 = vpop.f32.mrf.mxu1  ;;  %v1694_v48 = vadd.f32 %v1693_v42, %v8032_v0  ;;  %v5631_v42 = vld [vmem:[%s10279_s3 + $0x48] sm:$0xf] }
 0x287   : > { %v1738_v30 = vadd.f32 %v1737_v11, %v1689_v38  ;;  %v1795_v7 = vmax.f32 %v1638_v5, 0.0  ;;  %v2623_v50 = vadd.f32 %v8289_v35, %v8406_v3 }
 0x288   : > { %2913 = vmatpush.bf16.msrb.mxu0 %v5868_v26 }
 0x289   : > { %v1800_v24 = vmax.f32 %v1738_v30, 0.0  ;;  %2822 = vmatmul.bf16.gmra.mxu2 %v7726_v9  ;;  %v1692_v30 = vadd.f32 %v1691_v57, %v8032_v0  ;;  %v5647_v0 = vld [vmem:[%s10279_s3 + $0x68] sm:$0xf] }
 0x28a   : > { %v5648_v5 = vor.u32 %v6230_v31, %v5647_v0 }
 0x28b   : > { %v8369_v39 = vpack.c.bf16 %v1800_v24, %v1796_v52 }
 0x28c   : > { %v1639_v14 = vpop.f32.mrf.mxu3  ;;  %v8371_v36 = vpop.f32.mrf.mxu2  ;;  %2914 = vmatpush.bf16.msrb.mxu0 %v5852_v41  ;;  %3009 = vmatpush.bf16.msrb.mxu2 %v5648_v5 }
 0x28d   : > { %v1640_v38 = vadd.f32 %v1639_v14, %v1591_v2  ;;  %2798 = vmatmul.bf16.gmra.mxu1 %v8369_v39 }
 0x28e   : > { %v1740_v20 = vpop.f32.mrf.mxu1 }
 0x28f   : > { %v1799_v11 = vmax.f32 %v1640_v38, 0.0  ;;  %v1741_v40 = vadd.f32 %v1740_v20, %v1692_v30  ;;  %v6226_v30 = vld [vmem:[%s10279_s3 + $0x54] sm:$0xf0] }
 0x291   : > { %v8383_v61 = vpack.c.bf16 %v1799_v11, %v1795_v7  ;;  %2705 = vmatmul.bf16.gmra.mxu3 %v8381_v62  ;;  %v1804_v49 = vmax.f32 %v1741_v40, 0.0  ;;  %v2625_v11 = vadd.f32 %v8336_v23, %v8406_v3 }
 0x293   : > { %2749 = vmatmul.bf16.gmra.mxu0 %v8383_v61 }
 0x294   : > { %v1642_v46 = vpop.f32.mrf.mxu3  ;;  %v2629_v15 = vpop.f32.mrf.mxu2 }
 0x295   : > { %v1643_v57 = vadd.f32 %v1642_v46, %v1594_v32  ;;  %v2628_v32 = vadd.f32 %v8371_v36, %v8406_v3  ;;  %v2630_v5 = vadd.f32 %v2629_v15, %v8406_v3  ;;  %v5615_v36 = vld [vmem:[%s10279_s3 + $0x28] sm:$0xf] }
 0x296   : > { %v1742_v52 = vpop.f32.mrf.mxu1 }
 0x297   : > { %v1743_v24 = vadd.f32 %v1742_v52, %v1694_v48  ;;  %v1803_v14 = vmax.f32 %v1643_v57, 0.0  ;;  %v5632_v48 = vor.u32 %v6226_v30, %v5631_v42 }
 0x299   : > { %v1808_v13 = vmax.f32 %v1743_v24, 0.0  ;;  %2827 = vmatmul.bf16.gmra.mxu2 %v7750_v1 }
 0x29a   : > { %3010 = vmatpush.bf16.msrb.mxu2 %v5632_v48 }
 0x29b   : > { %v8394_v29 = vpack.c.bf16 %v1808_v13, %v1804_v49 }
 0x29c   : > { %v1644_v2 = vpop.f32.mrf.mxu3  ;;  %v2632_v37 = vpop.f32.mrf.mxu2 }
 0x29d   : > { %v1645_v26 = vadd.f32 %v1644_v2, %v1596_v28  ;;  %2803 = vmatmul.bf16.gmra.mxu1 %v8394_v29 }
 0x29f   : > { %v1807_v44 = vmax.f32 %v1645_v26, 0.0 }
 0x2a1   : > { %v8408_v38 = vpack.c.bf16 %v1807_v44, %v1803_v14  ;;  %2866 = vmatmul.bf16.vlgmr.msrb.gmra.mxu3 %v7692_v47 }
 0x2a3   : > { %2754 = vmatmul.bf16.gmra.mxu0 %v8408_v38 }
 0x2a4   : > { %v2634_v63 = vpop.f32.mrf.mxu2  ;;  %v2671_v20 = vpop.f32.mrf.mxu3 }
 0x2a5   : > { %v2672_v41 = vadd.f32 %v2671_v20, %v2623_v50  ;;  %v5616_v50 = vor.u32 %v6222_v21, %v5615_v36 }
 0x2a7   : > { %3011 = vmatpush.bf16.msrb.mxu2 %v5616_v50 }
 0x2a9   : > { %2832 = vmatmul.bf16.gmra.mxu2 %v7796_v56 }
 0x2aa   : > { %v2769_v7 = vpop.f32.mrf.mxu1 }
 0x2ac   : > { %v2637_v35 = vpop.f32.mrf.mxu2  ;;  %v2673_v46 = vpop.f32.mrf.mxu3 }
 0x2ad   : > { %v2674_v40 = vadd.f32 %v2673_v46, %v2625_v11  ;;  %2964 = vmatmul.bf16.vlgmr.msrb.gmra.mxu1 %v8051_v54  ;;  %v2633_v11 = vadd.f32 %v2632_v37, %v8406_v3  ;;  %v5599_v37 = vld [vmem:[%s10279_s3 + $0x8] sm:$0xf]  ;;  %v2638_v21 = vadd.f32 %v2637_v35, %v8406_v3 }
 0x2b0   : > { %v2720_v52 = vpop.f32.mrf.mxu0 }
 0x2b1   : > { %v2721_v24 = vadd.f32 %v2720_v52, %v2672_v41  ;;  %2871 = vmatmul.bf16.gmra.mxu3 %v7714_v55 }
 0x2b2   : > { %v2771_v23 = vpop.f32.mrf.mxu1 }
 0x2b3   : > { %v8427_v49 = vadd.f32 %v2769_v7, %v2721_v24  ;;  %2915 = vmatmul.bf16.vlgmr.msrb.gmra.mxu0 %v8062_v8 }
 0x2b4   : > { %v2639_v13 = vpop.f32.mrf.mxu2  ;;  %v2676_v28 = vpop.f32.mrf.mxu3 }
 0x2b5   : > { %v2677_v57 = vadd.f32 %v2676_v28, %v2628_v32  ;;  %v6218_v28 = vld [vmem:[%s10279_s3 + $0x14] sm:$0xf0] }
 0x2b8   : > { %v2722_v0 = vpop.f32.mrf.mxu0 }
 0x2b9   : > { %v2723_v31 = vadd.f32 %v2722_v0, %v2674_v40  ;;  %2837 = vmatmul.bf16.gmra.mxu2 %v7861_v33 }
 0x2ba   : > { %v2774_v2 = vpop.f32.mrf.mxu1 }
 0x2bb   : > { %v8432_v26 = vadd.f32 %v2771_v23, %v2723_v31  ;;  %v2635_v23 = vadd.f32 %v2634_v63, %v8406_v3  ;;  %v5600_v31 = vor.u32 %v6218_v28, %v5599_v37  ;;  %v6244_v37 = vld [vmem:[%s10279_s3 + $0xec] sm:$0xf] }
 0x2bc   : > { %v8440_v14 = vpop.f32.mrf.mxu2  ;;  %v2678_v44 = vpop.f32.mrf.mxu3 }
 0x2bd   : > { %v2679_v20 = vadd.f32 %v2678_v44, %v2630_v5  ;;  %2969 = vmatmul.bf16.gmra.mxu1 %v8075_v53  ;;  %3012 = vmatpush.bf16.msrb.mxu2 %v5600_v31 }
 0x2c0   : > { %v2725_v41 = vpop.f32.mrf.mxu0 }
 0x2c1   : > { %v2726_v15 = vadd.f32 %v2725_v41, %v2677_v57  ;;  %2876 = vmatmul.bf16.gmra.mxu3 %v7738_v10 }
 0x2c2   : > { %v2776_v7 = vpop.f32.mrf.mxu1 }
 0x2c3   : > { %v8445_v42 = vadd.f32 %v2774_v2, %v2726_v15  ;;  %2920 = vmatmul.bf16.gmra.mxu0 %v8086_v34  ;;  %v5839_v15 = vld [vmem:[%s10279_s3 + $0x1e8] sm:$0xf] }
 0x2c4   : > { %v8448_v30 = vpop.f32.mrf.mxu2  ;;  %v2681_v46 = vpop.f32.mrf.mxu3 }
 0x2c5   : > { %v2682_v48 = vadd.f32 %v2681_v46, %v2633_v11 }
 0x2c8   : > { %v2727_v40 = vpop.f32.mrf.mxu0 }
 0x2c9   : > { %v2728_v52 = vadd.f32 %v2727_v40, %v2679_v20  ;;  %2842 = vmatmul.bf16.gmra.mxu2 %v7945_v19  ;;  %v2640_v40 = vadd.f32 %v2639_v13, %v8406_v3  ;;  %v5713_v13 = vld [vmem:[%s10279_s3 + $0xf8] sm:$0xf0] }
 0x2ca   : > { %v2779_v24 = vpop.f32.mrf.mxu1 }
 0x2cb   : > { %v8452_v32 = vadd.f32 %v2776_v7, %v2728_v52  ;;  %v6278_v7 = vld [vmem:[%s10279_s3 + $0x1f4] sm:$0xf0] }
 0x2cc   : > { %v8460_v57 = vpop.f32.mrf.mxu2  ;;  %v2683_v0 = vpop.f32.mrf.mxu3  ;;  %v5840_v11 = vor.u32 %v6278_v7, %v5839_v15 }
 0x2cd   : > { %v2684_v2 = vadd.f32 %v2683_v0, %v2635_v23  ;;  %2974 = vmatmul.bf16.gmra.mxu1 %v8099_v43  ;;  %v6310_v23 = vld [vmem:[%s10279_s3 + $0x2f4] sm:$0xf0] }
 0x2ce   : > { %3054 = vmatpush.bf16.msra.mxu3 %v5840_v11  ;;  %v2643_v11 = vadd.f32 %v8440_v14, %v8406_v3  ;;  %v5807_v14 = vld [vmem:[%s10279_s3 + $0x1a8] sm:$0xf] }
 0x2d0   : > { %v2730_v5 = vpop.f32.mrf.mxu0 }
 0x2d1   : > { %v2731_v63 = vadd.f32 %v2730_v5, %v2682_v48  ;;  %2881 = vmatmul.bf16.gmra.mxu3 %v7770_v51  ;;  %v6342_v5 = vld [vmem:[%s10279_s3 + $0x3f4] sm:$0xf0] }
 0x2d2   : > { %v2781_v36 = vpop.f32.mrf.mxu1 }
 0x2d3   : > { %v8465_v44 = vadd.f32 %v2779_v24, %v2731_v63  ;;  %2925 = vmatmul.bf16.gmra.mxu0 %v8112_v60  ;;  %v5967_v24 = vld [vmem:[%s10279_s3 + $0x2e8] sm:$0xf] }
 0x2d4   : > { %v8468_v50 = vpop.f32.mrf.mxu2  ;;  %v2686_v20 = vpop.f32.mrf.mxu3  ;;  %v5968_v31 = vor.u32 %v6310_v23, %v5967_v24 }
 0x2d5   : > { %v2687_v41 = vadd.f32 %v2686_v20, %v2638_v21 }
 0x2d6   : > { %3103 = vmatpush.bf16.msra.mxu0 %v5968_v31 }
 0x2d8   : > { %v2732_v46 = vpop.f32.mrf.mxu0 }
 0x2d9   : > { %v2733_v35 = vadd.f32 %v2732_v46, %v2684_v2  ;;  %2847 = vmatmul.bf16.gmra.mxu2 %v8008_v17  ;;  %v6095_v2 = vld [vmem:[%s10279_s3 + $0x3e8] sm:$0xf] }
 0x2da   : > { %v2784_v48 = vpop.f32.mrf.mxu1  ;;  %v6096_v21 = vor.u32 %v6342_v5, %v6095_v2  ;;  %v2645_v5 = vadd.f32 %v8448_v30, %v8406_v3  ;;  %v5697_v30 = vld [vmem:[%s10279_s3 + $0xd8] sm:$0xf0] }
 0x2db   : > { %v8478_v52 = vadd.f32 %v2781_v36, %v2733_v35  ;;  %v5716_v36 = vor.u32 %v6244_v37, %v5713_v13  ;;  %v5823_v35 = vld [vmem:[%s10279_s3 + $0x1c8] sm:$0xf] }
 0x2dc   : > { %v8489_v28 = vpop.f32.mrf.mxu2  ;;  %v2688_v0 = vpop.f32.mrf.mxu3  ;;  %3152 = vmatpush.bf16.msra.mxu1 %v6096_v21  ;;  %v5951_v21 = vld [vmem:[%s10279_s3 + $0x2c8] sm:$0xf] }
 0x2dd   : > { %v2689_v63 = vadd.f32 %v2688_v0, %v2640_v40  ;;  %2979 = vmatmul.bf16.gmra.mxu1 %v8134_v22  ;;  %3201 = vmatpush.bf16.msra.mxu2 %v5716_v36  ;;  %v6274_v40 = vld [vmem:[%s10279_s3 + $0x1d4] sm:$0xf0] }
 0x2de   : > { %v5824_v23 = vor.u32 %v6274_v40, %v5823_v35  ;;  %v6338_v40 = vld [vmem:[%s10279_s3 + $0x3d4] sm:$0xf0] }
 0x2e0   : > { %v2735_v20 = vpop.f32.mrf.mxu0  ;;  %3055 = vmatpush.bf16.msra.mxu3 %v5824_v23 }
 0x2e1   : > { %v2736_v15 = vadd.f32 %v2735_v20, %v2687_v41  ;;  %2886 = vmatmul.bf16.gmra.mxu3 %v8158_v18  ;;  %v6306_v20 = vld [vmem:[%s10279_s3 + $0x2d4] sm:$0xf0] }
 0x2e2   : > { %v2786_v7 = vpop.f32.mrf.mxu1  ;;  %v5952_v35 = vor.u32 %v6306_v20, %v5951_v21 }
 0x2e3   : > { %v8504_v46 = vadd.f32 %v2784_v48, %v2736_v15  ;;  %2930 = vmatmul.bf16.gmra.mxu0 %v8162_v58  ;;  %v6270_v48 = vld [vmem:[%s10279_s3 + $0x1b4] sm:$0xf0] }
 0x2e4   : > { %v8513_v24 = vpop.f32.mrf.mxu2  ;;  %v2691_v41 = vpop.f32.mrf.mxu3  ;;  %v5808_v31 = vor.u32 %v6270_v48, %v5807_v14  ;;  %v5791_v48 = vld [vmem:[%s10279_s3 + $0x188] sm:$0xf]  ;;  %3104 = vmatpush.bf16.msra.mxu0 %v5952_v35  ;;  %v2648_v35 = vadd.f32 %v8460_v57, %v8406_v3 }
 0x2e5   : > { %v2692_v37 = vadd.f32 %v2691_v41, %v2643_v11 }
 0x2e6   : > { %3056 = vmatpush.bf16.msra.mxu3 %v5808_v31 }
 0x2e8   : > { %v2737_v0 = vpop.f32.mrf.mxu0 }
 0x2e9   : > { %v2738_v13 = vadd.f32 %v2737_v0, %v2689_v63  ;;  %2852 = vmatmul.bf16.gmra.mxu2 %v8034_v25  ;;  %v6240_v63 = vld [vmem:[%s10279_s3 + $0xcc] sm:$0xf]  ;;  %v6266_v0 = vld [vmem:[%s10279_s3 + $0x194] sm:$0xf0] }
 0x2ea   : > { %v2789_v2 = vpop.f32.mrf.mxu1  ;;  %v5700_v23 = vor.u32 %v6240_v63, %v5697_v30  ;;  %v5792_v31 = vor.u32 %v6266_v0, %v5791_v48 }
 0x2eb   : > { %v8524_v36 = vadd.f32 %v2786_v7, %v2738_v13  ;;  %v6079_v7 = vld [vmem:[%s10279_s3 + $0x3c8] sm:$0xf] }
 0x2ec   : > { %v8535_v15 = vpop.f32.mrf.mxu2  ;;  %v2693_v11 = vpop.f32.mrf.mxu3  ;;  %v6080_v14 = vor.u32 %v6338_v40, %v6079_v7  ;;  %3202 = vmatpush.bf16.msra.mxu2 %v5700_v23  ;;  %v5775_v13 = vld [vmem:[%s10279_s3 + $0x168] sm:$0xf]  ;;  %3057 = vmatpush.bf16.msra.mxu3 %v5792_v31  ;;  %v6258_v40 = vld [vmem:[%s10279_s3 + $0x154] sm:$0xf0] }
 0x2ed   : > { %10283 = vst [vmem:[#allocation2_spill] sm:$0xff] %v8524_v36  ;;  %v2694_v41 = vadd.f32 %v2693_v11, %v2645_v5  ;;  %2984 = vmatmul.bf16.gmra.mxu1 %v8191_v16  ;;  %v6262_v5 = vld [vmem:[%s10279_s3 + $0x174] sm:$0xf0]  ;;  %v5759_v7 = vld [vmem:[%s10279_s3 + $0x148] sm:$0xf] }
 0x2ee   : > { %3153 = vmatpush.bf16.msra.mxu1 %v6080_v14  ;;  %v5776_v20 = vor.u32 %v6262_v5, %v5775_v13  ;;  %v5760_v57 = vor.u32 %v6258_v40, %v5759_v7  ;;  %v5743_v31 = vld [vmem:[%s10279_s3 + $0x128] sm:$0xf]  ;;  %v6254_v13 = vld [vmem:[%s10279_s3 + $0x134] sm:$0xf0] }
 0x2ef   : > { %v6047_v5 = vld [vmem:[%s10279_s3 + $0x388] sm:$0xf]  ;;  %v6302_v40 = vld [vmem:[%s10279_s3 + $0x2b4] sm:$0xf0] }
 0x2f0   : > { %v2740_v21 = vpop.f32.mrf.mxu0  ;;  %3058 = vmatpush.bf16.msra.mxu3 %v5776_v20  ;;  %v5744_v20 = vor.u32 %v6254_v13, %v5743_v31  ;;  %v5935_v7 = vld [vmem:[%s10279_s3 + $0x2a8] sm:$0xf]  ;;  %v5681_v31 = vld [vmem:[%s10279_s3 + $0xb8] sm:$0xf0] }
 0x2f1   : > { %v2741_v63 = vadd.f32 %v2740_v21, %v2692_v37  ;;  %2891 = vmatmul.bf16.gmra.mxu3 %v8221_v12  ;;  %v6063_v37 = vld [vmem:[%s10279_s3 + $0x3a8] sm:$0xf] }
 0x2f2   : > { %v2791_v11 = vpop.f32.mrf.mxu1  ;;  %v5727_v13 = vld [vmem:[%s10279_s3 + $0x108] sm:$0xf] }
 0x2f3   : > { %v8562_v30 = vadd.f32 %v2789_v2, %v2741_v63  ;;  %2935 = vmatmul.bf16.gmra.mxu0 %v8229_v6  ;;  %v6334_v2 = vld [vmem:[%s10279_s3 + $0x3b4] sm:$0xf0] }
 0x2f4   : > { %v8574_v23 = vpop.f32.mrf.mxu2  ;;  %v2696_v14 = vpop.f32.mrf.mxu3  ;;  %v6064_v0 = vor.u32 %v6334_v2, %v6063_v37  ;;  %3059 = vmatpush.bf16.msra.mxu3 %v5760_v57  ;;  %v6330_v63 = vld [vmem:[%s10279_s3 + $0x394] sm:$0xf0]  ;;  %v5936_v2 = vor.u32 %v6302_v40, %v5935_v7  ;;  %v2650_v57 = vadd.f32 %v8468_v50, %v8406_v3 }
 0x2f5   : > { %10284 = vst [vmem:[#allocation3_spill] sm:$0xff] %v8562_v30  ;;  %v2697_v48 = vadd.f32 %v2696_v14, %v2648_v35  ;;  %v6048_v37 = vor.u32 %v6330_v63, %v6047_v5  ;;  %v6031_v63 = vld [vmem:[%s10279_s3 + $0x368] sm:$0xf] }
 0x2f6   : > { %3154 = vmatpush.bf16.msra.mxu1 %v6064_v0  ;;  %3105 = vmatpush.bf16.msra.mxu0 %v5936_v2  ;;  %v6298_v2 = vld [vmem:[%s10279_s3 + $0x294] sm:$0xf0] }
 0x2f8   : > { %v2742_v21 = vpop.f32.mrf.mxu0  ;;  %3060 = vmatpush.bf16.msra.mxu3 %v5744_v20  ;;  %v5919_v20 = vld [vmem:[%s10279_s3 + $0x288] sm:$0xf] }
 0x2f9   : > { %v2743_v35 = vadd.f32 %v2742_v21, %v2694_v41  ;;  %3013 = vmatmul.bf16.vlgmr.msrb.gmra.mxu2 %v7704_v4  ;;  %v6236_v41 = vld [vmem:[%s10279_s3 + $0xac] sm:$0xf] }
 0x2fa   : > { %v2794_v14 = vpop.f32.mrf.mxu1  ;;  %3155 = vmatpush.bf16.msra.mxu1 %v6048_v37  ;;  %v5684_v50 = vor.u32 %v6236_v41, %v5681_v31  ;;  %v5920_v41 = vor.u32 %v6298_v2, %v5919_v20  ;;  %v6015_v31 = vld [vmem:[%s10279_s3 + $0x348] sm:$0xf]  ;;  %v2653_v20 = vadd.f32 %v8489_v28, %v8406_v3 }
 0x2fb   : > { %v8600_v0 = vadd.f32 %v2791_v11, %v2743_v35  ;;  %v6250_v11 = vld [vmem:[%s10279_s3 + $0x114] sm:$0xf0]  ;;  %v5887_v28 = vld [vmem:[%s10279_s3 + $0x248] sm:$0xf] }
 0x2fc   : > { %v2698_v5 = vpop.f32.mrf.mxu3  ;;  %v8611_v21 = vpop.f32.mrf.mxu2  ;;  %v6326_v35 = vld [vmem:[%s10279_s3 + $0x374] sm:$0xf0]  ;;  %v5728_v40 = vor.u32 %v6250_v11, %v5727_v13  ;;  %3203 = vmatpush.bf16.msra.mxu2 %v5684_v50  ;;  %3106 = vmatpush.bf16.msra.mxu0 %v5920_v41  ;;  %v5903_v50 = vld [vmem:[%s10279_s3 + $0x268] sm:$0xf] }
 0x2fd   : > { %10285 = vst [vmem:[#allocation4_spill] sm:$0xff] %v8600_v0  ;;  %v2699_v7 = vadd.f32 %v2698_v5, %v2650_v57  ;;  %2989 = vmatmul.bf16.gmra.mxu1 %v8278_v45  ;;  %v6032_v37 = vor.u32 %v6326_v35, %v6031_v63  ;;  %v6322_v57 = vld [vmem:[%s10279_s3 + $0x354] sm:$0xf0] }
 0x2fe   : > { %3061 = vmatpush.bf16.msra.mxu3 %v5728_v40  ;;  %v6016_v5 = vor.u32 %v6322_v57, %v6015_v31  ;;  %v6294_v63 = vld [vmem:[%s10279_s3 + $0x274] sm:$0xf0] }
 0x2ff   : > { %3156 = vmatpush.bf16.msra.mxu1 %v6032_v37  ;;  %v5904_v37 = vor.u32 %v6294_v63, %v5903_v50  ;;  %v6318_v40 = vld [vmem:[%s10279_s3 + $0x334] sm:$0xf0] }
 0x300   : > { %v2745_v13 = vpop.f32.mrf.mxu0  ;;  %v6314_v50 = vld [vmem:[%s10279_s3 + $0x314] sm:$0xf0] }
 0x301   : > { %v2746_v11 = vadd.f32 %v2745_v13, %v2697_v48  ;;  %2896 = vmatmul.bf16.gmra.mxu3 %v8308_v27  ;;  %v5999_v48 = vld [vmem:[%s10279_s3 + $0x328] sm:$0xf]  ;;  %3107 = vmatpush.bf16.msra.mxu0 %v5904_v37 }
 0x302   : > { %v2796_v35 = vpop.f32.mrf.mxu1  ;;  %v6000_v57 = vor.u32 %v6318_v40, %v5999_v48  ;;  %v5871_v48 = vld [vmem:[%s10279_s3 + $0x228] sm:$0xf]  ;;  %v6286_v40 = vld [vmem:[%s10279_s3 + $0x234] sm:$0xf0] }
 0x303   : > { %v8644_v2 = vadd.f32 %v2794_v14, %v2746_v11  ;;  %2940 = vmatmul.bf16.gmra.mxu0 %v8316_v59  ;;  %3157 = vmatpush.bf16.msra.mxu1 %v6016_v5  ;;  %v6290_v14 = vld [vmem:[%s10279_s3 + $0x254] sm:$0xf0]  ;;  %v5983_v11 = vld [vmem:[%s10279_s3 + $0x308] sm:$0xf] }
 0x304   : > { %v2701_v41 = vpop.f32.mrf.mxu3  ;;  %v8653_v31 = vpop.f32.mrf.mxu2  ;;  %v5888_v5 = vor.u32 %v6290_v14, %v5887_v28  ;;  %v5984_v37 = vor.u32 %v6314_v50, %v5983_v11  ;;  %v2655_v28 = vadd.f32 %v8513_v24, %v8406_v3  ;;  %v5855_v24 = vld [vmem:[%s10279_s3 + $0x208] sm:$0xf] }
 0x305   : > { %10286 = vst [vmem:[#allocation5_spill] sm:$0xff] %v8644_v2  ;;  %v2702_v13 = vadd.f32 %v2701_v41, %v2653_v20 }
 0x306   : > { %3108 = vmatpush.bf16.msra.mxu0 %v5888_v5  ;;  %v5665_v5 = vld [vmem:[%s10279_s3 + $0x98] sm:$0xf0] }
 0x307   : > { %3158 = vmatpush.bf16.msra.mxu1 %v6000_v57  ;;  %v5872_v57 = vor.u32 %v6286_v40, %v5871_v48 }
 0x308   : > { %v2747_v63 = vpop.f32.mrf.mxu0 }
 0x309   : > { %v2748_v20 = vadd.f32 %v2747_v63, %v2699_v7  ;;  %3018 = vmatmul.bf16.gmra.mxu2 %v7726_v9  ;;  %v6232_v7 = vld [vmem:[%s10279_s3 + $0x8c] sm:$0xf] }
 0x30a   : > { %v2799_v41 = vpop.f32.mrf.mxu1  ;;  %v5668_v63 = vor.u32 %v6232_v7, %v5665_v5  ;;  %3109 = vmatpush.bf16.msra.mxu0 %v5872_v57  ;;  %v2658_v57 = vadd.f32 %v8535_v15, %v8406_v3  ;;  %v6228_v15 = vld [vmem:[%s10279_s3 + $0x6c] sm:$0xf] }
 0x30b   : > { %v8676_v14 = vadd.f32 %v2796_v35, %v2748_v20  ;;  %3159 = vmatpush.bf16.msra.mxu1 %v5984_v37  ;;  %v6282_v35 = vld [vmem:[%s10279_s3 + $0x214] sm:$0xf0] }
 0x30c   : > { %v2703_v11 = vpop.f32.mrf.mxu3  ;;  %v8684_v50 = vpop.f32.mrf.mxu2  ;;  %3204 = vmatpush.bf16.msra.mxu2 %v5668_v63  ;;  %v5856_v20 = vor.u32 %v6282_v35, %v5855_v24 }
 0x30d   : > { %10287 = vst [vmem:[#allocation6_spill] sm:$0xff] %v8676_v14  ;;  %v2704_v48 = vadd.f32 %v2703_v11, %v2655_v28  ;;  %2994 = vmatmul.bf16.gmra.mxu1 %v8369_v39 }
 0x30e   : > { %3110 = vmatpush.bf16.msra.mxu0 %v5856_v20 }
 0x310   : > { %v2750_v40 = vpop.f32.mrf.mxu0 }
 0x311   : > { %v2751_v37 = vadd.f32 %v2750_v40, %v2702_v13  ;;  %2901 = vmatmul.bf16.gmra.mxu3 %v8381_v62  ;;  %v2660_v13 = vadd.f32 %v8574_v23, %v8406_v3  ;;  %v6545_v3 = vld [vmem:[%s10281_s5 + $0x8] sm:$0xff] }
 0x312   : > { %v2801_v7 = vpop.f32.mrf.mxu1  ;;  %v8714_v23 = vperm.slane %v6545_v3, 1 }
 0x313   : > { %v8696_v28 = vadd.f32 %v2799_v41, %v2751_v37  ;;  %2945 = vmatmul.bf16.gmra.mxu0 %v8383_v61  ;;  %v5649_v41 = vld [vmem:[%s10279_s3 + $0x78] sm:$0xf0] }
 0x314   : > { %v2706_v5 = vpop.f32.mrf.mxu3  ;;  %v2825_v11 = vpop.f32.mrf.mxu2  ;;  %v5652_v40 = vor.u32 %v6228_v15, %v5649_v41 }
 0x315   : > { %10288 = vst [vmem:[#allocation7_spill] sm:$0xff] %v8696_v28  ;;  %v2707_v14 = vadd.f32 %v2706_v5, %v2658_v57 }
 0x316   : > { %3205 = vmatpush.bf16.msra.mxu2 %v5652_v40 }
 0x318   : > { %v2752_v2 = vpop.f32.mrf.mxu0 }
 0x319   : > { %v2753_v0 = vadd.f32 %v2752_v2, %v2704_v48  ;;  %3023 = vmatmul.bf16.gmra.mxu2 %v7750_v1 }
 0x31a   : > { %v2804_v63 = vpop.f32.mrf.mxu1 }
 0x31b   : > { %v8702_v24 = vadd.f32 %v2801_v7, %v2753_v0  ;;  %v2819_v7 = vadd.f32 %v8611_v21, %v8714_v23  ;;  %v6224_v21 = vld [vmem:[%s10279_s3 + $0x4c] sm:$0xf] }
 0x31c   : > { %v2708_v35 = vpop.f32.mrf.mxu3  ;;  %v2828_v20 = vpop.f32.mrf.mxu2 }
 0x31d   : > { %10289 = vst [vmem:[#allocation8_spill] sm:$0xff] %v8702_v24  ;;  %v2709_v2 = vadd.f32 %v2708_v35, %v2660_v13  ;;  %2999 = vmatmul.bf16.gmra.mxu1 %v8394_v29 }
 0x320   : > { %v2755_v0 = vpop.f32.mrf.mxu0 }
 0x321   : > { %v2756_v48 = vadd.f32 %v2755_v0, %v2707_v14  ;;  %3062 = vmatmul.bf16.vlgmr.msra.gmra.mxu3 %v7692_v47  ;;  %v2821_v14 = vadd.f32 %v8653_v31, %v8714_v23 }
 0x322   : > { %v2806_v37 = vpop.f32.mrf.mxu1 }
 0x323   : > { %v8719_v57 = vadd.f32 %v2804_v63, %v2756_v48  ;;  %2950 = vmatmul.bf16.gmra.mxu0 %v8408_v38  ;;  %v5633_v63 = vld [vmem:[%s10279_s3 + $0x58] sm:$0xf0] }
 0x324   : > { %v2830_v5 = vpop.f32.mrf.mxu2  ;;  %v2867_v13 = vpop.f32.mrf.mxu3 }
 0x325   : > { %10290 = vst [vmem:[#allocation9_spill] sm:$0xff] %v8719_v57  ;;  %v2868_v15 = vadd.f32 %v2867_v13, %v2819_v7  ;;  %v5636_v7 = vor.u32 %v6224_v21, %v5633_v63 }
 0x327   : > { %3206 = vmatpush.bf16.msra.mxu2 %v5636_v7 }
 0x328   : > { %v2757_v41 = vpop.f32.mrf.mxu0 }
 0x329   : > { %v2758_v35 = vadd.f32 %v2757_v41, %v2709_v2  ;;  %3028 = vmatmul.bf16.gmra.mxu2 %v7796_v56 }
 0x32a   : > { %v2965_v40 = vpop.f32.mrf.mxu1 }
 0x32b   : > { %v8725_v3 = vadd.f32 %v2806_v37, %v2758_v35  ;;  %v2824_v37 = vadd.f32 %v8684_v50, %v8714_v23  ;;  %v6220_v50 = vld [vmem:[%s10279_s3 + $0x2c] sm:$0xf] }
 0x32c   : > { %v2833_v0 = vpop.f32.mrf.mxu2  ;;  %v2869_v48 = vpop.f32.mrf.mxu3 }
 0x32d   : > { %10291 = vst [vmem:[#allocation10_spill] sm:$0xff] %v8725_v3  ;;  %v2870_v2 = vadd.f32 %v2869_v48, %v2821_v14  ;;  %3160 = vmatmul.bf16.vlgmr.msra.gmra.mxu1 %v8051_v54 }
 0x330   : > { %v2916_v13 = vpop.f32.mrf.mxu0 }
 0x331   : > { %v2917_v41 = vadd.f32 %v2916_v13, %v2868_v15  ;;  %3067 = vmatmul.bf16.gmra.mxu3 %v7714_v55  ;;  %v2826_v15 = vadd.f32 %v2825_v11, %v8714_v23 }
 0x332   : > { %v2967_v31 = vpop.f32.mrf.mxu1 }
 0x333   : > { %v8737_v35 = vadd.f32 %v2965_v40, %v2917_v41  ;;  %3111 = vmatmul.bf16.vlgmr.msra.gmra.mxu0 %v8062_v8  ;;  %v5617_v40 = vld [vmem:[%s10279_s3 + $0x38] sm:$0xf0] }
 0x334   : > { %v2835_v3 = vpop.f32.mrf.mxu2  ;;  %v2872_v57 = vpop.f32.mrf.mxu3  ;;  %v5620_v13 = vor.u32 %v6220_v50, %v5617_v40 }
 0x335   : > { %v2873_v24 = vadd.f32 %v2872_v57, %v2824_v37  ;;  %v2829_v37 = vadd.f32 %v2828_v20, %v8714_v23  ;;  %v6216_v20 = vld [vmem:[%s10279_s3 + $0xc] sm:$0xf] }
 0x336   : > { %3207 = vmatpush.bf16.msra.mxu2 %v5620_v13 }
 0x338   : > { %v2918_v21 = vpop.f32.mrf.mxu0 }
 0x339   : > { %v2919_v14 = vadd.f32 %v2918_v21, %v2870_v2  ;;  %3033 = vmatmul.bf16.gmra.mxu2 %v7861_v33 }
 0x33a   : > { %v2970_v63 = vpop.f32.mrf.mxu1 }
 0x33b   : > { %v8742_v48 = vadd.f32 %v2967_v31, %v2919_v14 }
 0x33c   : > { %v8750_v7 = vpop.f32.mrf.mxu2  ;;  %v2874_v57 = vpop.f32.mrf.mxu3 }
 0x33d   : > { %v2875_v2 = vadd.f32 %v2874_v57, %v2826_v15  ;;  %3165 = vmatmul.bf16.gmra.mxu1 %v8075_v53 }
 0x340   : > { %v2921_v41 = vpop.f32.mrf.mxu0 }
 0x341   : > { %v2922_v11 = vadd.f32 %v2921_v41, %v2873_v24  ;;  %3072 = vmatmul.bf16.gmra.mxu3 %v7738_v10  ;;  %v2831_v24 = vadd.f32 %v2830_v5, %v8714_v23 }
 0x342   : > { %v2972_v31 = vpop.f32.mrf.mxu1 }
 0x343   : > { %v8755_v21 = vadd.f32 %v2970_v63, %v2922_v11  ;;  %3116 = vmatmul.bf16.gmra.mxu0 %v8086_v34  ;;  %v5601_v63 = vld [vmem:[%s10279_s3 + $0x18] sm:$0xf0] }
 0x344   : > { %v8758_v14 = vpop.f32.mrf.mxu2  ;;  %v2877_v28 = vpop.f32.mrf.mxu3  ;;  %v5604_v41 = vor.u32 %v6216_v20, %v5601_v63 }
 0x345   : > { %10292 = vst [vmem:[#allocation11_spill] sm:$0xff] %v8755_v21  ;;  %v2878_v30 = vadd.f32 %v2877_v28, %v2829_v37  ;;  %v2834_v37 = vadd.f32 %v2833_v0, %v8714_v23 }
 0x346   : > { %3208 = vmatpush.bf16.msra.mxu2 %v5604_v41 }
 0x348   : > { %v2923_v50 = vpop.f32.mrf.mxu0 }
 0x349   : > { %v2924_v15 = vadd.f32 %v2923_v50, %v2875_v2  ;;  %3038 = vmatmul.bf16.gmra.mxu2 %v7945_v19 }
 0x34a   : > { %v2975_v40 = vpop.f32.mrf.mxu1 }
 0x34b   : > { %v8762_v57 = vadd.f32 %v2972_v31, %v2924_v15 }
 0x34c   : > { %v8770_v13 = vpop.f32.mrf.mxu2  ;;  %v2879_v28 = vpop.f32.mrf.mxu3 }
 0x34d   : > { %10293 = vst [vmem:[#allocation12_spill] sm:$0xff] %v8762_v57  ;;  %v2880_v2 = vadd.f32 %v2879_v28, %v2831_v24  ;;  %3170 = vmatmul.bf16.gmra.mxu1 %v8099_v43  ;;  %v6276_v24 = vld [vmem:[%s10279_s3 + $0x1ec] sm:$0xf]  ;;  %v2836_v28 = vadd.f32 %v2835_v3, %v8714_v23 }
 0x34e   : > { %v6340_v3 = vld [vmem:[%s10279_s3 + $0x3ec] sm:$0xf] }
 0x350   : > { %v2926_v11 = vpop.f32.mrf.mxu0 }
 0x351   : > { %v2927_v5 = vadd.f32 %v2926_v11, %v2878_v30  ;;  %3077 = vmatmul.bf16.gmra.mxu3 %v7770_v51  ;;  %v5841_v30 = vld [vmem:[%s10279_s3 + $0x1f8] sm:$0xf0] }
 0x352   : > { %v2977_v31 = vpop.f32.mrf.mxu1  ;;  %v5844_v20 = vor.u32 %v6276_v24, %v5841_v30  ;;  %v5969_v11 = vld [vmem:[%s10279_s3 + $0x2f8] sm:$0xf0] }
 0x353   : > { %v8775_v50 = vadd.f32 %v2975_v40, %v2927_v5  ;;  %3121 = vmatmul.bf16.gmra.mxu0 %v8112_v60  ;;  %v3476_v5 = vld [vmem:[%s10280_s4 + $0x78] sm:$0xff] }
 0x354   : > { %v8778_v15 = vpop.f32.mrf.mxu2  ;;  %v2882_v57 = vpop.f32.mrf.mxu3  ;;  %3250 = vmatpush.bf16.msrb.mxu3 %v5844_v20  ;;  %3541 = vmatpush.msrb.mxu2 %v3476_v5 }
 0x355   : > { %10294 = vst [vmem:[#allocation13_spill] sm:$0xff] %v8775_v50  ;;  %v2883_v36 = vadd.f32 %v2882_v57, %v2834_v37  ;;  %v6308_v57 = vld [vmem:[%s10279_s3 + $0x2ec] sm:$0xf] }
 0x356   : > { %v5972_v24 = vor.u32 %v6308_v57, %v5969_v11  ;;  %v2839_v11 = vadd.f32 %v8750_v7, %v8714_v23  ;;  %v3475_v7 = vld [vmem:[%s10280_s4 + $0x70] sm:$0xff] }
 0x357   : > { %3542 = vmatpush.msrb.mxu2 %v3475_v7 }
 0x358   : > { %v2928_v63 = vpop.f32.mrf.mxu0  ;;  %3299 = vmatpush.bf16.msrb.mxu0 %v5972_v24 }
 0x359   : > { %v2929_v0 = vadd.f32 %v2928_v63, %v2880_v2  ;;  %3043 = vmatmul.bf16.gmra.mxu2 %v8008_v17 }
 0x35a   : > { %v2980_v40 = vpop.f32.mrf.mxu1 }
 0x35b   : > { %v8788_v41 = vadd.f32 %v2977_v31, %v2929_v0  ;;  %v6097_v31 = vld [vmem:[%s10279_s3 + $0x3f8] sm:$0xf0] }
 0x35c   : > { %v8799_v2 = vpop.f32.mrf.mxu2  ;;  %v2884_v37 = vpop.f32.mrf.mxu3  ;;  %v6100_v20 = vor.u32 %v6340_v3, %v6097_v31 }
 0x35d   : > { %10295 = vst [vmem:[#allocation14_spill] sm:$0xff] %v8788_v41  ;;  %v2885_v30 = vadd.f32 %v2884_v37, %v2836_v28  ;;  %3175 = vmatmul.bf16.gmra.mxu1 %v8134_v22  ;;  %v6272_v28 = vld [vmem:[%s10279_s3 + $0x1cc] sm:$0xf]  ;;  %v5825_v37 = vld [vmem:[%s10279_s3 + $0x1d8] sm:$0xf0] }
 0x35e   : > { %3348 = vmatpush.bf16.msrb.mxu1 %v6100_v20  ;;  %v5828_v3 = vor.u32 %v6272_v28, %v5825_v37  ;;  %v5809_v20 = vld [vmem:[%s10279_s3 + $0x1b8] sm:$0xf0]  ;;  %v2841_v28 = vadd.f32 %v8758_v14, %v8714_v23  ;;  %v6336_v14 = vld [vmem:[%s10279_s3 + $0x3cc] sm:$0xf] }
 0x360   : > { %v2931_v63 = vpop.f32.mrf.mxu0  ;;  %3251 = vmatpush.bf16.msrb.mxu3 %v5828_v3  ;;  %v5953_v3 = vld [vmem:[%s10279_s3 + $0x2d8] sm:$0xf0] }
 0x361   : > { %v2932_v0 = vadd.f32 %v2931_v63, %v2883_v36  ;;  %3082 = vmatmul.bf16.gmra.mxu3 %v8158_v18 }
 0x362   : > { %v2982_v57 = vpop.f32.mrf.mxu1 }
 0x363   : > { %v8811_v5 = vadd.f32 %v2980_v40, %v2932_v0  ;;  %3126 = vmatmul.bf16.gmra.mxu0 %v8162_v58  ;;  %v6268_v40 = vld [vmem:[%s10279_s3 + $0x1ac] sm:$0xf] }
 0x364   : > { %v8820_v24 = vpop.f32.mrf.mxu2  ;;  %v2887_v36 = vpop.f32.mrf.mxu3  ;;  %v5812_v0 = vor.u32 %v6268_v40, %v5809_v20 }
 0x365   : > { %10296 = vst [vmem:[#allocation15_spill] sm:$0xff] %v8811_v5  ;;  %v2888_v31 = vadd.f32 %v2887_v36, %v2839_v11  ;;  %v6304_v36 = vld [vmem:[%s10279_s3 + $0x2cc] sm:$0xf] }
 0x366   : > { %3252 = vmatpush.bf16.msrb.mxu3 %v5812_v0  ;;  %v5956_v20 = vor.u32 %v6304_v36, %v5953_v3  ;;  %v5793_v36 = vld [vmem:[%s10279_s3 + $0x198] sm:$0xf0] }
 0x368   : > { %v2933_v63 = vpop.f32.mrf.mxu0  ;;  %3300 = vmatpush.bf16.msrb.mxu0 %v5956_v20  ;;  %v2844_v20 = vadd.f32 %v8770_v13, %v8714_v23 }
 0x369   : > { %v2934_v5 = vadd.f32 %v2933_v63, %v2885_v30  ;;  %3048 = vmatmul.bf16.gmra.mxu2 %v8034_v25  ;;  %v3474_v30 = vld [vmem:[%s10280_s4 + $0x68] sm:$0xff] }
 0x36a   : > { %v2985_v11 = vpop.f32.mrf.mxu1  ;;  %3543 = vmatpush.msrb.mxu2 %v3474_v30  ;;  %v6260_v30 = vld [vmem:[%s10279_s3 + $0x16c] sm:$0xf] }
 0x36b   : > { %v8834_v37 = vadd.f32 %v2982_v57, %v2934_v5  ;;  %v6081_v57 = vld [vmem:[%s10279_s3 + $0x3d8] sm:$0xf0]  ;;  %v6264_v5 = vld [vmem:[%s10279_s3 + $0x18c] sm:$0xf] }
 0x36c   : > { %v8845_v7 = vpop.f32.mrf.mxu2  ;;  %v2889_v40 = vpop.f32.mrf.mxu3  ;;  %v6084_v0 = vor.u32 %v6336_v14, %v6081_v57  ;;  %v5796_v3 = vor.u32 %v6264_v5, %v5793_v36  ;;  %v6256_v5 = vld [vmem:[%s10279_s3 + $0x14c] sm:$0xf] }
 0x36d   : > { %10297 = vst [vmem:[#allocation16_spill] sm:$0xff] %v8834_v37  ;;  %v2890_v63 = vadd.f32 %v2889_v40, %v2841_v28  ;;  %3180 = vmatmul.bf16.gmra.mxu1 %v8191_v16  ;;  %v5777_v37 = vld [vmem:[%s10279_s3 + $0x178] sm:$0xf0] }
 0x36e   : > { %3349 = vmatpush.bf16.msrb.mxu1 %v6084_v0  ;;  %3253 = vmatpush.bf16.msrb.mxu3 %v5796_v3  ;;  %v5780_v28 = vor.u32 %v6260_v30, %v5777_v37  ;;  %v5761_v0 = vld [vmem:[%s10279_s3 + $0x158] sm:$0xf0]  ;;  %v3473_v3 = vld [vmem:[%s10280_s4 + $0x60] sm:$0xff] }
 0x36f   : > { %v5764_v13 = vor.u32 %v6256_v5, %v5761_v0  ;;  %3544 = vmatpush.msrb.mxu2 %v3473_v3  ;;  %v6328_v5 = vld [vmem:[%s10279_s3 + $0x38c] sm:$0xf]  ;;  %v6049_v0 = vld [vmem:[%s10279_s3 + $0x398] sm:$0xf0] }
 0x370   : > { %v2936_v41 = vpop.f32.mrf.mxu0 }
 0x371   : > { %v2937_v40 = vadd.f32 %v2936_v41, %v2888_v31  ;;  %3087 = vmatmul.bf16.gmra.mxu3 %v8221_v12  ;;  %v6332_v41 = vld [vmem:[%s10279_s3 + $0x3ac] sm:$0xf] }
 0x372   : > { %v2987_v14 = vpop.f32.mrf.mxu1  ;;  %3254 = vmatpush.bf16.msrb.mxu3 %v5780_v28  ;;  %v5745_v28 = vld [vmem:[%s10279_s3 + $0x138] sm:$0xf0] }
 0x373   : > { %v8869_v57 = vadd.f32 %v2985_v11, %v2937_v40  ;;  %3131 = vmatmul.bf16.gmra.mxu0 %v8229_v6  ;;  %v6065_v11 = vld [vmem:[%s10279_s3 + $0x3b8] sm:$0xf0]  ;;  %v6252_v40 = vld [vmem:[%s10279_s3 + $0x12c] sm:$0xf] }
 0x374   : > { %v8881_v31 = vpop.f32.mrf.mxu2  ;;  %v2892_v37 = vpop.f32.mrf.mxu3  ;;  %v6068_v30 = vor.u32 %v6332_v41, %v6065_v11  ;;  %v5937_v11 = vld [vmem:[%s10279_s3 + $0x2b8] sm:$0xf0]  ;;  %v5748_v3 = vor.u32 %v6252_v40, %v5745_v28 }
 0x375   : > { %10298 = vst [vmem:[#allocation17_spill] sm:$0xff] %v8869_v57  ;;  %v2893_v36 = vadd.f32 %v2892_v37, %v2844_v20  ;;  %v6300_v37 = vld [vmem:[%s10279_s3 + $0x2ac] sm:$0xf]  ;;  %v5729_v40 = vld [vmem:[%s10279_s3 + $0x118] sm:$0xf0] }
 0x376   : > { %3350 = vmatpush.bf16.msrb.mxu1 %v6068_v30  ;;  %3255 = vmatpush.bf16.msrb.mxu3 %v5764_v13  ;;  %v6052_v30 = vor.u32 %v6328_v5, %v6049_v0  ;;  %v5940_v50 = vor.u32 %v6300_v37, %v5937_v11  ;;  %v2846_v13 = vadd.f32 %v8778_v15, %v8714_v23  ;;  %v6324_v15 = vld [vmem:[%s10279_s3 + $0x36c] sm:$0xf] }
 0x378   : > { %v2938_v20 = vpop.f32.mrf.mxu0  ;;  %3301 = vmatpush.bf16.msrb.mxu0 %v5940_v50  ;;  %v5921_v50 = vld [vmem:[%s10279_s3 + $0x298] sm:$0xf0] }
 0x379   : > { %v2939_v41 = vadd.f32 %v2938_v20, %v2890_v63  ;;  %3209 = vmatmul.bf16.vlgmr.msra.gmra.mxu2 %v7704_v4  ;;  %v3472_v4 = vld [vmem:[%s10280_s4 + $0x58] sm:$0xff]  ;;  %v6248_v63 = vld [vmem:[%s10279_s3 + $0x10c] sm:$0xf] }
 0x37a   : > { %v2990_v57 = vpop.f32.mrf.mxu1  ;;  %3351 = vmatpush.bf16.msrb.mxu1 %v6052_v30  ;;  %3545 = vmatpush.msrb.mxu2 %v3472_v4  ;;  %v5732_v37 = vor.u32 %v6248_v63, %v5729_v40  ;;  %v6320_v30 = vld [vmem:[%s10279_s3 + $0x34c] sm:$0xf]  ;;  %v5905_v40 = vld [vmem:[%s10279_s3 + $0x278] sm:$0xf0] }
 0x37b   : > { %v8910_v21 = vadd.f32 %v2987_v14, %v2939_v41  ;;  %v6033_v14 = vld [vmem:[%s10279_s3 + $0x378] sm:$0xf0]  ;;  %3256 = vmatpush.bf16.msrb.mxu3 %v5748_v3  ;;  %v6296_v41 = vld [vmem:[%s10279_s3 + $0x28c] sm:$0xf] }
 0x37c   : > { %v2894_v28 = vpop.f32.mrf.mxu3  ;;  %v8921_v5 = vpop.f32.mrf.mxu2  ;;  %v6036_v0 = vor.u32 %v6324_v15, %v6033_v14  ;;  %v5924_v11 = vor.u32 %v6296_v41, %v5921_v50  ;;  %v6017_v3 = vld [vmem:[%s10279_s3 + $0x358] sm:$0xf0]  ;;  %v6292_v63 = vld [vmem:[%s10279_s3 + $0x26c] sm:$0xf] }
 0x37d   : > { %v2895_v20 = vadd.f32 %v2894_v28, %v2846_v13  ;;  %3185 = vmatmul.bf16.gmra.mxu1 %v8278_v45  ;;  %v6020_v4 = vor.u32 %v6320_v30, %v6017_v3  ;;  %v5908_v14 = vor.u32 %v6292_v63, %v5905_v40  ;;  %v6001_v50 = vld [vmem:[%s10279_s3 + $0x338] sm:$0xf0] }
 0x37e   : > { %3352 = vmatpush.bf16.msrb.mxu1 %v6036_v0  ;;  %3302 = vmatpush.bf16.msrb.mxu0 %v5924_v11  ;;  %v2849_v0 = vadd.f32 %v8799_v2, %v8714_v23  ;;  %v3471_v2 = vld [vmem:[%s10280_s4 + $0x50] sm:$0xff]  ;;  %v5985_v63 = vld [vmem:[%s10279_s3 + $0x318] sm:$0xf0] }
 0x37f   : > { %3257 = vmatpush.bf16.msrb.mxu3 %v5732_v37  ;;  %3546 = vmatpush.msrb.mxu2 %v3471_v2  ;;  %v2851_v2 = vadd.f32 %v8820_v24, %v8714_v23  ;;  %v5857_v24 = vld [vmem:[%s10279_s3 + $0x218] sm:$0xf0] }
 0x380   : > { %v2941_v13 = vpop.f32.mrf.mxu0 }
 0x381   : > { %v2942_v28 = vadd.f32 %v2941_v13, %v2893_v36  ;;  %3092 = vmatmul.bf16.gmra.mxu3 %v8308_v27  ;;  %v6316_v36 = vld [vmem:[%s10279_s3 + $0x32c] sm:$0xf]  ;;  %v5889_v13 = vld [vmem:[%s10279_s3 + $0x258] sm:$0xf0] }
 0x382   : > { %v2992_v15 = vpop.f32.mrf.mxu1  ;;  %3353 = vmatpush.bf16.msrb.mxu1 %v6020_v4  ;;  %3303 = vmatpush.bf16.msrb.mxu0 %v5908_v14  ;;  %v6004_v37 = vor.u32 %v6316_v36, %v6001_v50  ;;  %v6284_v36 = vld [vmem:[%s10279_s3 + $0x22c] sm:$0xf]  ;;  %v5873_v50 = vld [vmem:[%s10279_s3 + $0x238] sm:$0xf0] }
 0x383   : > { %v8951_v41 = vadd.f32 %v2990_v57, %v2942_v28  ;;  %3136 = vmatmul.bf16.gmra.mxu0 %v8316_v59  ;;  %v6288_v57 = vld [vmem:[%s10279_s3 + $0x24c] sm:$0xf] }
 0x384   : > { %v2897_v11 = vpop.f32.mrf.mxu3  ;;  %v8960_v30 = vpop.f32.mrf.mxu2  ;;  %v5892_v4 = vor.u32 %v6288_v57, %v5889_v13  ;;  %v6312_v28 = vld [vmem:[%s10279_s3 + $0x30c] sm:$0xf] }
 0x385   : > { %v2898_v3 = vadd.f32 %v2897_v11, %v2849_v0  ;;  %v5988_v14 = vor.u32 %v6312_v28, %v5985_v63  ;;  %v6280_v28 = vld [vmem:[%s10279_s3 + $0x20c] sm:$0xf] }
 0x386   : > { %3354 = vmatpush.bf16.msrb.mxu1 %v6004_v37  ;;  %3304 = vmatpush.bf16.msrb.mxu0 %v5892_v4  ;;  %v5876_v37 = vor.u32 %v6284_v36, %v5873_v50 }
 0x388   : > { %v2943_v40 = vpop.f32.mrf.mxu0 }
 0x389   : > { %v2944_v0 = vadd.f32 %v2943_v40, %v2895_v20  ;;  %3214 = vmatmul.bf16.gmra.mxu2 %v7726_v9  ;;  %v3470_v20 = vld [vmem:[%s10280_s4 + $0x48] sm:$0xff] }
 0x38a   : > { %v2995_v11 = vpop.f32.mrf.mxu1  ;;  %3355 = vmatpush.bf16.msrb.mxu1 %v5988_v14  ;;  %3547 = vmatpush.msrb.mxu2 %v3470_v20  ;;  %v3469_v20 = vld [vmem:[%s10280_s4 + $0x40] sm:$0xff] }
 0x38b   : > { %v8986_v57 = vadd.f32 %v2992_v15, %v2944_v0  ;;  %3305 = vmatpush.bf16.msrb.mxu0 %v5876_v37  ;;  %v5860_v15 = vor.u32 %v6280_v28, %v5857_v24  ;;  %v2854_v0 = vadd.f32 %v8845_v7, %v8714_v23  ;;  %v2856_v7 = vadd.f32 %v8881_v31, %v8714_v23  ;;  %v3468_v24 = vld [vmem:[%s10280_s4 + $0x38] sm:$0xff] }
 0x38c   : > { %v2899_v9 = vpop.f32.mrf.mxu3  ;;  %v8991_v13 = vpop.f32.mrf.mxu2  ;;  %3548 = vmatpush.msrb.mxu2 %v3469_v20 }
 0x38d   : > { %v2900_v4 = vadd.f32 %v2899_v9, %v2851_v2  ;;  %3190 = vmatmul.bf16.gmra.mxu1 %v8369_v39 }
 0x38e   : > { %3549 = vmatpush.msrb.mxu2 %v3468_v24 }
 0x38f   : > { %3306 = vmatpush.bf16.msrb.mxu0 %v5860_v15 }
 0x390   : > { %v2946_v63 = vpop.f32.mrf.mxu0 }
 0x391   : > { %v2947_v40 = vadd.f32 %v2946_v63, %v2898_v3  ;;  %3097 = vmatmul.bf16.gmra.mxu3 %v8381_v62 }
 0x392   : > { %v2997_v14 = vpop.f32.mrf.mxu1 }
 0x393   : > { %v9003_v36 = vadd.f32 %v2995_v11, %v2947_v40  ;;  %3141 = vmatmul.bf16.gmra.mxu0 %v8383_v61 }
 0x394   : > { %v2902_v50 = vpop.f32.mrf.mxu3  ;;  %v3021_v37 = vpop.f32.mrf.mxu2 }
 0x395   : > { %v2903_v2 = vadd.f32 %v2902_v50, %v2854_v0 }
 0x398   : > { %v2948_v9 = vpop.f32.mrf.mxu0 }
 0x399   : > { %v2949_v3 = vadd.f32 %v2948_v9, %v2900_v4  ;;  %3219 = vmatmul.bf16.gmra.mxu2 %v7750_v1  ;;  %v6546_v1 = vld [vmem:[%s10281_s5 + $0x10] sm:$0xff] }
 0x39a   : > { %v3000_v28 = vpop.f32.mrf.mxu1  ;;  %v9021_v4 = vperm.slane %v6546_v1, 1 }
 0x39b   : > { %v9012_v11 = vadd.f32 %v2997_v14, %v2949_v3 }
 0x39c   : > { %v2904_v15 = vpop.f32.mrf.mxu3  ;;  %v3024_v63 = vpop.f32.mrf.mxu2  ;;  %v3015_v14 = vadd.f32 %v8921_v5, %v9021_v4  ;;  %v3017_v5 = vadd.f32 %v8960_v30, %v9021_v4  ;;  %v3020_v30 = vadd.f32 %v8991_v13, %v9021_v4 }
 0x39d   : > { %v2905_v40 = vadd.f32 %v2904_v15, %v2856_v7  ;;  %3195 = vmatmul.bf16.gmra.mxu1 %v8394_v29  ;;  %v3467_v7 = vld [vmem:[%s10280_s4 + $0x30] sm:$0xff]  ;;  %v3466_v15 = vld [vmem:[%s10280_s4 + $0x28] sm:$0xff] }
 0x39e   : > { %3550 = vmatpush.msrb.mxu2 %v3467_v7 }
 0x3a0   : > { %v2951_v0 = vpop.f32.mrf.mxu0  ;;  %3551 = vmatpush.msrb.mxu2 %v3466_v15 }
 0x3a1   : > { %v2952_v23 = vadd.f32 %v2951_v0, %v2903_v2  ;;  %3258 = vmatmul.bf16.vlgmr.msrb.gmra.mxu3 %v7692_v47 }
 0x3a2   : > { %v3002_v31 = vpop.f32.mrf.mxu1 }
 0x3a3   : > { %v9026_v50 = vadd.f32 %v3000_v28, %v2952_v23  ;;  %3146 = vmatmul.bf16.gmra.mxu0 %v8408_v38 }
 0x3a4   : > { %v3026_v20 = vpop.f32.mrf.mxu2  ;;  %v3063_v9 = vpop.f32.mrf.mxu3 }
 0x3a5   : > { %v3064_v3 = vadd.f32 %v3063_v9, %v3015_v14 }
 0x3a8   : > { %v2953_v24 = vpop.f32.mrf.mxu0 }
 0x3a9   : > { %v2954_v2 = vadd.f32 %v2953_v24, %v2905_v40  ;;  %3224 = vmatmul.bf16.gmra.mxu2 %v7796_v56 }
 0x3aa   : > { %v3161_v47 = vpop.f32.mrf.mxu1 }
 0x3ab   : > { %v9035_v28 = vadd.f32 %v3002_v31, %v2954_v2  ;;  %v3465_v2 = vld [vmem:[%s10280_s4 + $0x20] sm:$0xff] }
 0x3ac   : > { %v3029_v1 = vpop.f32.mrf.mxu2  ;;  %v3065_v0 = vpop.f32.mrf.mxu3  ;;  %3552 = vmatpush.msrb.mxu2 %v3465_v2  ;;  %v3463_v2 = vld [vmem:[%s10280_s4 + $0x10] sm:$0xff] }
 0x3ad   : > { %v3066_v23 = vadd.f32 %v3065_v0, %v3017_v5  ;;  %3356 = vmatmul.bf16.vlgmr.msrb.gmra.mxu1 %v8051_v54  ;;  %v3022_v5 = vadd.f32 %v3021_v37, %v9021_v4  ;;  %v3025_v37 = vadd.f32 %v3024_v63, %v9021_v4  ;;  %v3027_v63 = vadd.f32 %v3026_v20, %v9021_v4 }
 0x3ae   : > { %v3030_v20 = vadd.f32 %v3029_v1, %v9021_v4 }
 0x3b0   : > { %v3112_v14 = vpop.f32.mrf.mxu0 }
 0x3b1   : > { %v3113_v40 = vadd.f32 %v3112_v14, %v3064_v3  ;;  %3263 = vmatmul.bf16.gmra.mxu3 %v7714_v55 }
 0x3b2   : > { %v3163_v56 = vpop.f32.mrf.mxu1 }
 0x3b3   : > { %v9044_v31 = vadd.f32 %v3161_v47, %v3113_v40  ;;  %3307 = vmatmul.bf16.vlgmr.msrb.gmra.mxu0 %v8062_v8  ;;  %v3464_v8 = vld [vmem:[%s10280_s4 + $0x18] sm:$0xff] }
 0x3b4   : > { %v3031_v9 = vpop.f32.mrf.mxu2  ;;  %v3068_v7 = vpop.f32.mrf.mxu3  ;;  %3553 = vmatpush.msrb.mxu2 %v3464_v8 }
 0x3b5   : > { %v3069_v24 = vadd.f32 %v3068_v7, %v3020_v30 }
 0x3b6   : > { %3554 = vmatpush.msrb.mxu2 %v3463_v2  ;;  %v3540_v2 = vld [vmem:[%s10280_s4 + $0x278] sm:$0xff] }
 0x3b8   : > { %v3114_v54 = vpop.f32.mrf.mxu0 }
 0x3b9   : > { %v3115_v3 = vadd.f32 %v3114_v54, %v3066_v23  ;;  %3229 = vmatmul.bf16.gmra.mxu2 %v7861_v33 }
 0x3ba   : > { %v3166_v55 = vpop.f32.mrf.mxu1 }
 0x3bb   : > { %v9052_v13 = vadd.f32 %v3163_v56, %v3115_v3 }
 0x3bc   : > { %v9057_v47 = vpop.f32.mrf.mxu2  ;;  %v3070_v15 = vpop.f32.mrf.mxu3 }
 0x3bd   : > { %v3071_v0 = vadd.f32 %v3070_v15, %v3022_v5  ;;  %3361 = vmatmul.bf16.gmra.mxu1 %v8075_v53 }
 0x3c0   : > { %v3117_v14 = vpop.f32.mrf.mxu0 }
 0x3c1   : > { %v3118_v23 = vadd.f32 %v3117_v14, %v3069_v24  ;;  %3268 = vmatmul.bf16.gmra.mxu3 %v7738_v10  ;;  %v3461_v14 = vld [vmem:[%s10280_s4] sm:$0xff] }
 0x3c2   : > { %v3168_v33 = vpop.f32.mrf.mxu1 }
 0x3c3   : > { %v9062_v40 = vadd.f32 %v3166_v55, %v3118_v23  ;;  %3312 = vmatmul.bf16.gmra.mxu0 %v8086_v34  ;;  %v3462_v34 = vld [vmem:[%s10280_s4 + $0x8] sm:$0xff]  ;;  %v3492_v23 = vld [vmem:[%s10280_s4 + $0xf8] sm:$0xff] }
 0x3c4   : > { %v9065_v56 = vpop.f32.mrf.mxu2  ;;  %v3073_v30 = vpop.f32.mrf.mxu3  ;;  %3555 = vmatpush.msrb.mxu2 %v3462_v34  ;;  %3606 = vmatpush.msra.mxu3 %v3492_v23  ;;  %v3489_v23 = vld [vmem:[%s10280_s4 + $0xe0] sm:$0xff] }
 0x3c5   : > { %v3074_v7 = vadd.f32 %v3073_v30, %v3025_v37 }
 0x3c6   : > { %3556 = vmatpush.msrb.mxu2 %v3461_v14 }
 0x3c8   : > { %v3119_v53 = vpop.f32.mrf.mxu0  ;;  %3801 = vmatpush.msra.mxu2 %v3540_v2  ;;  %v3538_v2 = vld [vmem:[%s10280_s4 + $0x268] sm:$0xff] }
 0x3c9   : > { %v3120_v24 = vadd.f32 %v3119_v53, %v3071_v0  ;;  %3234 = vmatmul.bf16.gmra.mxu2 %v7945_v19  ;;  %v3491_v53 = vld [vmem:[%s10280_s4 + $0xf0] sm:$0xff] }
 0x3ca   : > { %v3171_v10 = vpop.f32.mrf.mxu1  ;;  %3607 = vmatpush.msra.mxu3 %v3491_v53  ;;  %v3487_v53 = vld [vmem:[%s10280_s4 + $0xd0] sm:$0xff] }
 0x3cb   : > { %v9072_v54 = vadd.f32 %v3168_v33, %v3120_v24  ;;  %v3508_v24 = vld [vmem:[%s10280_s4 + $0x178] sm:$0xff] }
 0x3cc   : > { %v9077_v3 = vpop.f32.mrf.mxu2  ;;  %v3075_v55 = vpop.f32.mrf.mxu3  ;;  %3671 = vmatpush.msra.mxu0 %v3508_v24 }
 0x3cd   : > { %v3076_v5 = vadd.f32 %v3075_v55, %v3027_v63  ;;  %3366 = vmatmul.bf16.gmra.mxu1 %v8099_v43  ;;  %v3524_v63 = vld [vmem:[%s10280_s4 + $0x1f8] sm:$0xff] }
 0x3ce   : > { %3736 = vmatpush.msra.mxu1 %v3524_v63  ;;  %v3486_v63 = vld [vmem:[%s10280_s4 + $0xc8] sm:$0xff] }
 0x3d0   : > { %v3122_v8 = vpop.f32.mrf.mxu0 }
 0x3d1   : > { %v3123_v15 = vadd.f32 %v3122_v8, %v3074_v7  ;;  %3273 = vmatmul.bf16.gmra.mxu3 %v7770_v51  ;;  %v3035_v8 = vadd.f32 %v9057_v47, %v9021_v4 }
 0x3d2   : > { %v3173_v19 = vpop.f32.mrf.mxu1 }
 0x3d3   : > { %v9082_v0 = vadd.f32 %v3171_v10, %v3123_v15  ;;  %3317 = vmatmul.bf16.gmra.mxu0 %v8112_v60  ;;  %v3032_v60 = vadd.f32 %v3031_v9, %v9021_v4 }
 0x3d4   : > { %v9091_v43 = vpop.f32.mrf.mxu2  ;;  %v3078_v33 = vpop.f32.mrf.mxu3 }
 0x3d5   : > { %v3079_v51 = vadd.f32 %v3078_v33, %v3030_v20 }
 0x3d8   : > { %v3124_v37 = vpop.f32.mrf.mxu0 }
 0x3d9   : > { %v3125_v1 = vadd.f32 %v3124_v37, %v3076_v5  ;;  %3239 = vmatmul.bf16.gmra.mxu2 %v8008_v17  ;;  %v3488_v37 = vld [vmem:[%s10280_s4 + $0xd8] sm:$0xff] }
 0x3da   : > { %v3176_v30 = vpop.f32.mrf.mxu1 }
 0x3db   : > { %v9095_v7 = vadd.f32 %v3173_v19, %v3125_v1  ;;  %v3490_v19 = vld [vmem:[%s10280_s4 + $0xe8] sm:$0xff] }
 0x3dc   : > { %v9106_v10 = vpop.f32.mrf.mxu2  ;;  %v3080_v17 = vpop.f32.mrf.mxu3  ;;  %3608 = vmatpush.msra.mxu3 %v3490_v19  ;;  %v3483_v19 = vld [vmem:[%s10280_s4 + $0xb0] sm:$0xff] }
 0x3dd   : > { %v3081_v9 = vadd.f32 %v3080_v17, %v3032_v60  ;;  %3371 = vmatmul.bf16.gmra.mxu1 %v8134_v22  ;;  %v3539_v22 = vld [vmem:[%s10280_s4 + $0x270] sm:$0xff] }
 0x3de   : > { %3802 = vmatpush.msra.mxu2 %v3539_v22  ;;  %3609 = vmatpush.msra.mxu3 %v3489_v23  ;;  %v3537_v22 = vld [vmem:[%s10280_s4 + $0x260] sm:$0xff]  ;;  %v3397_v23 = vmax.f32 %v8427_v49, 0.0  ;;  %v3536_v49 = vld [vmem:[%s10280_s4 + $0x258] sm:$0xff] }
 0x3e0   : > { %v3127_v34 = vpop.f32.mrf.mxu0  ;;  %3610 = vmatpush.msra.mxu3 %v3488_v37  ;;  %3803 = vmatpush.msra.mxu2 %v3538_v2  ;;  %v3480_v37 = vld [vmem:[%s10280_s4 + $0x98] sm:$0xff]  ;;  %v3042_v2 = vadd.f32 %v9091_v43, %v9021_v4 }
 0x3e1   : > { %v3128_v55 = vadd.f32 %v3127_v34, %v3079_v51  ;;  %3278 = vmatmul.bf16.gmra.mxu3 %v8158_v18  ;;  %v3507_v18 = vld [vmem:[%s10280_s4 + $0x170] sm:$0xff]  ;;  %v3485_v34 = vld [vmem:[%s10280_s4 + $0xc0] sm:$0xff]  ;;  %v3520_v43 = vld [vmem:[%s10280_s4 + $0x1d8] sm:$0xff] }
 0x3e2   : > { %v3178_v5 = vpop.f32.mrf.mxu1  ;;  %3672 = vmatpush.msra.mxu0 %v3507_v18  ;;  %3611 = vmatpush.msra.mxu3 %v3487_v53  ;;  %v3479_v53 = vld [vmem:[%s10280_s4 + $0x90] sm:$0xff] }
 0x3e3   : > { %v9115_v15 = vadd.f32 %v3176_v30, %v3128_v55  ;;  %3322 = vmatmul.bf16.gmra.mxu0 %v8162_v58  ;;  %v3523_v58 = vld [vmem:[%s10280_s4 + $0x1f0] sm:$0xff]  ;;  %v3037_v30 = vadd.f32 %v9065_v56, %v9021_v4  ;;  %3804 = vmatpush.msra.mxu2 %v3537_v22  ;;  %v3502_v22 = vld [vmem:[%s10280_s4 + $0x148] sm:$0xff] }
 0x3e4   : > { %v9127_v20 = vpop.f32.mrf.mxu2  ;;  %v3083_v14 = vpop.f32.mrf.mxu3  ;;  %3737 = vmatpush.msra.mxu1 %v3523_v58  ;;  %3612 = vmatpush.msra.mxu3 %v3486_v63  ;;  %v3482_v58 = vld [vmem:[%s10280_s4 + $0xa8] sm:$0xff] }
 0x3e5   : > { %v9129_v47 = vadd.f32 %v3083_v14, %v3035_v8  ;;  %v3040_v8 = vadd.f32 %v9077_v3, %v9021_v4  ;;  %3805 = vmatpush.msra.mxu2 %v3536_v49  ;;  %v3405_v49 = vmax.f32 %v8445_v42, 0.0  ;;  %v3497_v42 = vld [vmem:[%s10280_s4 + $0x120] sm:$0xff] }
 0x3e6   : > { %3613 = vmatpush.msra.mxu3 %v3485_v34  ;;  %v3478_v34 = vld [vmem:[%s10280_s4 + $0x88] sm:$0xff] }
 0x3e8   : > { %v3129_v33 = vpop.f32.mrf.mxu0 }
 0x3e9   : > { %v3130_v51 = vadd.f32 %v3129_v33, %v3081_v9  ;;  %3244 = vmatmul.bf16.gmra.mxu2 %v8034_v25  ;;  %v3506_v25 = vld [vmem:[%s10280_s4 + $0x168] sm:$0xff]  ;;  %v3481_v33 = vld [vmem:[%s10280_s4 + $0xa0] sm:$0xff] }
 0x3ea   : > { %v9141_v1 = vpop.f32.mrf.mxu1  ;;  %3673 = vmatpush.msra.mxu0 %v3506_v25  ;;  %v3522_v9 = vld [vmem:[%s10280_s4 + $0x1e8] sm:$0xff]  ;;  %v3504_v25 = vld [vmem:[%s10280_s4 + $0x158] sm:$0xff] }
 0x3eb   : > { %v9145_v60 = vadd.f32 %v3178_v5, %v3130_v51  ;;  %3738 = vmatpush.msra.mxu1 %v3522_v9 }
 0x3ec   : > { %v9156_v24 = vpop.f32.mrf.mxu2  ;;  %v3085_v17 = vpop.f32.mrf.mxu3 }
 0x3ed   : > { %v9158_v56 = vadd.f32 %v3085_v17, %v3037_v30  ;;  %3376 = vmatmul.bf16.gmra.mxu1 %v8191_v16  ;;  %v3484_v16 = vld [vmem:[%s10280_s4 + $0xb8] sm:$0xff] }
 0x3ee   : > { %3614 = vmatpush.msra.mxu3 %v3484_v16  ;;  %v3503_v16 = vld [vmem:[%s10280_s4 + $0x150] sm:$0xff] }
 0x3f0   : > { %v9170_v55 = vpop.f32.mrf.mxu0  ;;  %3615 = vmatpush.msra.mxu3 %v3483_v19 }
 0x3f1   : > { %3283 = vmatmul.bf16.gmra.mxu3 %v8221_v12  ;;  %v3505_v12 = vld [vmem:[%s10280_s4 + $0x160] sm:$0xff] }
 0x3f2   : > { %v9176_v5 = vpop.f32.mrf.mxu1  ;;  %3674 = vmatpush.msra.mxu0 %v3505_v12  ;;  %3616 = vmatpush.msra.mxu3 %v3482_v58 }
 0x3f3   : > { %3327 = vmatmul.bf16.gmra.mxu0 %v8229_v6  ;;  %v3521_v6 = vld [vmem:[%s10280_s4 + $0x1e0] sm:$0xff] }
 0x3f4   : > { %v9190_v18 = vpop.f32.mrf.mxu2  ;;  %v3088_v14 = vpop.f32.mrf.mxu3  ;;  %3739 = vmatpush.msra.mxu1 %v3521_v6  ;;  %3617 = vmatpush.msra.mxu3 %v3481_v33  ;;  %v3045_v6 = vadd.f32 %v9106_v10, %v9021_v4  ;;  %v3500_v33 = vld [vmem:[%s10280_s4 + $0x138] sm:$0xff]  ;;  %v3518_v10 = vld [vmem:[%s10280_s4 + $0x1c8] sm:$0xff] }
 0x3f5   : > { %v9192_v3 = vadd.f32 %v3088_v14, %v3040_v8  ;;  %3675 = vmatpush.msra.mxu0 %v3504_v25  ;;  %v3401_v8 = vmax.f32 %v8432_v26, 0.0  ;;  %v3501_v26 = vld [vmem:[%s10280_s4 + $0x140] sm:$0xff]  ;;  %v3519_v14 = vld [vmem:[%s10280_s4 + $0x1d0] sm:$0xff] }
 0x3f6   : > { %3618 = vmatpush.msra.mxu3 %v3480_v37  ;;  %3740 = vmatpush.msra.mxu1 %v3520_v43 }
 0x3f7   : > { %3676 = vmatpush.msra.mxu0 %v3503_v16  ;;  %v3047_v16 = vadd.f32 %v9127_v20, %v9021_v4  ;;  %v3495_v20 = vld [vmem:[%s10280_s4 + $0x110] sm:$0xff] }
 0x3f8   : > { %v9204_v51 = vpop.f32.mrf.mxu0  ;;  %3619 = vmatpush.msra.mxu3 %v3479_v53  ;;  %3741 = vmatpush.msra.mxu1 %v3519_v14  ;;  %v3498_v53 = vld [vmem:[%s10280_s4 + $0x128] sm:$0xff] }
 0x3f9   : > { %3557 = vmatmul.f32.vlgmr.msrb.gmra.mxu2 %v3397_v23  ;;  %3677 = vmatpush.msra.mxu0 %v3502_v22  ;;  %v3514_v14 = vld [vmem:[%s10280_s4 + $0x1a8] sm:$0xff] }
 0x3fa   : > { %v9209_v30 = vpop.f32.mrf.mxu1  ;;  %3620 = vmatpush.msra.mxu3 %v3478_v34  ;;  %3742 = vmatpush.msra.mxu1 %v3518_v10  ;;  %v3515_v34 = vld [vmem:[%s10280_s4 + $0x1b0] sm:$0xff]  ;;  %v3512_v10 = vld [vmem:[%s10280_s4 + $0x198] sm:$0xff] }
 0x3fb   : > { %3678 = vmatpush.msra.mxu0 %v3501_v26  ;;  %v3496_v26 = vld [vmem:[%s10280_s4 + $0x118] sm:$0xff] }
 0x3fc   : > { %v3090_v17 = vpop.f32.mrf.mxu3  ;;  %v9222_v9 = vpop.f32.mrf.mxu2 }
 0x3fd   : > { %v9224_v63 = vadd.f32 %v3090_v17, %v3042_v2  ;;  %3381 = vmatmul.bf16.gmra.mxu1 %v8278_v45  ;;  %v3477_v45 = vld [vmem:[%s10280_s4 + $0x80] sm:$0xff]  ;;  %3679 = vmatpush.msra.mxu0 %v3500_v33  ;;  %v3516_v17 = vld [vmem:[%s10280_s4 + $0x1b8] sm:$0xff] }
 0x3fe   : > { %3621 = vmatpush.msra.mxu3 %v3477_v45  ;;  %v3517_v2 = vld [vmem:[%s10280_s4 + $0x1c0] sm:$0xff] }
 0x3ff   : > { %3743 = vmatpush.msra.mxu1 %v3517_v2  ;;  %v3511_v2 = vld [vmem:[%s10280_s4 + $0x190] sm:$0xff] }
 0x400   : > { %v9243_v12 = vpop.f32.mrf.mxu0 }
 0x401   : > { %3288 = vmatmul.bf16.gmra.mxu3 %v8308_v27  ;;  %3560 = vmatmul.f32.gmra.mxu2 %v3401_v8  ;;  %v3535_v27 = vld [vmem:[%s10280_s4 + $0x250] sm:$0xff]  ;;  %v3534_v8 = vld [vmem:[%s10280_s4 + $0x248] sm:$0xff] }
 0x402   : > { %v9246_v19 = vpop.f32.mrf.mxu1  ;;  %3806 = vmatpush.msra.mxu2 %v3535_v27  ;;  %3744 = vmatpush.msra.mxu1 %v3516_v17  ;;  %v3513_v27 = vld [vmem:[%s10280_s4 + $0x1a0] sm:$0xff]  ;;  %v3510_v17 = vld [vmem:[%s10280_s4 + $0x188] sm:$0xff] }
 0x403   : > { %3332 = vmatmul.bf16.gmra.mxu0 %v8316_v59  ;;  %v3499_v59 = vld [vmem:[%s10280_s4 + $0x130] sm:$0xff] }
 0x404   : > { %v3093_v58 = vpop.f32.mrf.mxu3  ;;  %v9260_v23 = vpop.f32.mrf.mxu2  ;;  %3680 = vmatpush.msra.mxu0 %v3499_v59  ;;  %3745 = vmatpush.msra.mxu1 %v3515_v34  ;;  %v3533_v34 = vld [vmem:[%s10280_s4 + $0x240] sm:$0xff] }
 0x405   : > { %v9268_v37 = vadd.f32 %v3093_v58, %v3045_v6  ;;  %3807 = vmatpush.msra.mxu2 %v3534_v8  ;;  %v3409_v58 = vmax.f32 %v8452_v32, 0.0  ;;  %v3493_v32 = vld [vmem:[%s10280_s4 + $0x100] sm:$0xff] }
 0x406   : > { %3681 = vmatpush.msra.mxu0 %v3498_v53  ;;  %3746 = vmatpush.msra.mxu1 %v3514_v14 }
 0x407   : > { %3808 = vmatpush.msra.mxu2 %v3533_v34  ;;  %v10299_v34 = vld [vmem:[#allocation11_spill] sm:$0xff] }
 0x408   : > { %v9277_v25 = vpop.f32.mrf.mxu0  ;;  %3682 = vmatpush.msra.mxu0 %v3497_v42  ;;  %3747 = vmatpush.msra.mxu1 %v3513_v27 }
 0x409   : > { %3563 = vmatmul.f32.gmra.mxu2 %v3405_v49  ;;  %v3050_v49 = vadd.f32 %v9156_v24, %v9021_v4  ;;  %v3509_v24 = vld [vmem:[%s10280_s4 + $0x180] sm:$0xff] }
 0x40a   : > { %v9285_v43 = vpop.f32.mrf.mxu1  ;;  %3683 = vmatpush.msra.mxu0 %v3496_v26  ;;  %3748 = vmatpush.msra.mxu1 %v3512_v10  ;;  %v3532_v26 = vld [vmem:[%s10280_s4 + $0x238] sm:$0xff] }
 0x40b   : > { %3809 = vmatpush.msra.mxu2 %v3532_v26 }
 0x40c   : > { %v3095_v45 = vpop.f32.mrf.mxu3  ;;  %v9298_v22 = vpop.f32.mrf.mxu2  ;;  %3684 = vmatpush.msra.mxu0 %v3495_v20  ;;  %3749 = vmatpush.msra.mxu1 %v3511_v2  ;;  %v6547_v2 = vld [vmem:[%s10281_s5 + $0x18] sm:$0xff] }
 0x40d   : > { %v9306_v6 = vadd.f32 %v3095_v45, %v3047_v16  ;;  %3386 = vmatmul.bf16.gmra.mxu1 %v8369_v39  ;;  %v3494_v39 = vld [vmem:[%s10280_s4 + $0x108] sm:$0xff]  ;;  %v3052_v45 = vadd.f32 %v9190_v18, %v9021_v4  ;;  %v3531_v18 = vld [vmem:[%s10280_s4 + $0x230] sm:$0xff] }
 0x40e   : > { %3685 = vmatpush.msra.mxu0 %v3494_v39  ;;  %3750 = vmatpush.msra.mxu1 %v3510_v17 }
 0x40f   : > { %3810 = vmatpush.msra.mxu2 %v3531_v18 }
 0x410   : > { %v9316_v33 = vpop.f32.mrf.mxu0  ;;  %3686 = vmatpush.msra.mxu0 %v3493_v32  ;;  %3751 = vmatpush.msra.mxu1 %v3509_v24  ;;  %v3406_v24 = vmax.f32 %v10299_v34, 0.0 }
 0x411   : > { %3293 = vmatmul.bf16.gmra.mxu3 %v8381_v62  ;;  %3566 = vmatmul.f32.gmra.mxu2 %v3409_v58  ;;  %v3417_v58 = vmax.f32 %v8478_v52, 0.0  ;;  %v3402_v52 = vmax.f32 %v8742_v48, 0.0 }
 0x412   : > { %v9325_v59 = vpop.f32.mrf.mxu1 }
 0x413   : > { %3337 = vmatmul.bf16.gmra.mxu0 %v8383_v61  ;;  %v3413_v61 = vmax.f32 %v8465_v44, 0.0  ;;  %v3398_v44 = vmax.f32 %v8737_v35, 0.0 }
 0x414   : > { %v3098_v53 = vpop.f32.mrf.mxu3  ;;  %v9336_v62 = vpop.f32.mrf.mxu2 }
 0x415   : > { %v9341_v42 = vadd.f32 %v3098_v53, %v3050_v49  ;;  %v9383_v49 = vperm.slane %v6547_v2, 1  ;;  %v3530_v53 = vld [vmem:[%s10280_s4 + $0x228] sm:$0xff] }
 0x416   : > { %3811 = vmatpush.msra.mxu2 %v3530_v53 }
 0x417   : > { %v3211_v48 = vadd.f32 %v9222_v9, %v9383_v49 }
 0x418   : > { %v9350_v16 = vpop.f32.mrf.mxu0 }
 0x419   : > { %3569 = vmatmul.f32.gmra.mxu2 %v3413_v61 }
 0x41a   : > { %v9352_v8 = vpop.f32.mrf.mxu1 }
 0x41c   : > { %v3100_v14 = vpop.f32.mrf.mxu3  ;;  %v9359_v20 = vpop.f32.mrf.mxu2 }
 0x41d   : > { %v9361_v27 = vadd.f32 %v3100_v14, %v3052_v45  ;;  %3391 = vmatmul.bf16.gmra.mxu1 %v8394_v29  ;;  %v3421_v29 = vmax.f32 %v8504_v46, 0.0  ;;  %v10300_v45 = vld [vmem:[#allocation2_spill] sm:$0xff] }
 0x41e   : > { %v3425_v26 = vmax.f32 %v10300_v45, 0.0 }
 0x420   : > { %v9366_v39 = vpop.f32.mrf.mxu0 }
 0x421   : > { %3572 = vmatmul.f32.gmra.mxu2 %v3417_v58  ;;  %3622 = vmatmul.f32.vlgmr.msra.gmra.mxu3 %v3398_v44  ;;  %v3399_v44 = vmax.f32 %v9044_v31, 0.0 }
 0x422   : > { %v9368_v4 = vpop.f32.mrf.mxu1 }
 0x423   : > { %3342 = vmatmul.bf16.gmra.mxu0 %v8408_v38 }
 0x424   : > { %v9374_v10 = vpop.f32.mrf.mxu2  ;;  %v3259_v32 = vpop.f32.mrf.mxu3 }
 0x425   : > { %v3260_v61 = vadd.f32 %v3259_v32, %v3211_v48  ;;  %v3213_v32 = vadd.f32 %v9260_v23, %v9383_v49  ;;  %v10301_v48 = vld [vmem:[#allocation3_spill] sm:$0xff]  ;;  %v3528_v23 = vld [vmem:[%s10280_s4 + $0x218] sm:$0xff] }
 0x426   : > { %v3429_v31 = vmax.f32 %v10301_v48, 0.0 }
 0x428   : > { %v9378_v35 = vpop.f32.mrf.mxu0 }
 0x429   : > { %3575 = vmatmul.f32.gmra.mxu2 %v3421_v29  ;;  %3625 = vmatmul.f32.gmra.mxu3 %v3402_v52  ;;  %v3529_v52 = vld [vmem:[%s10280_s4 + $0x220] sm:$0xff] }
 0x42a   : > { %v3357_v38 = vpop.f32.mrf.mxu1  ;;  %3812 = vmatpush.msra.mxu2 %v3529_v52 }
 0x42c   : > { %v9388_v17 = vpop.f32.mrf.mxu2  ;;  %v3261_v46 = vpop.f32.mrf.mxu3  ;;  %3813 = vmatpush.msra.mxu2 %v3528_v23  ;;  %v10305_v23 = vld [vmem:[#allocation5_spill] sm:$0xff] }
 0x42d   : > { %v3262_v34 = vadd.f32 %v3261_v46, %v3213_v32  ;;  %v3216_v46 = vadd.f32 %v9298_v22, %v9383_v49  ;;  %v10303_v32 = vld [vmem:[#allocation13_spill] sm:$0xff]  ;;  %v3527_v22 = vld [vmem:[%s10280_s4 + $0x210] sm:$0xff] }
 0x42e   : > { %3814 = vmatpush.msra.mxu2 %v3527_v22 }
 0x430   : > { %v3308_v14 = vpop.f32.mrf.mxu0 }
 0x431   : > { %v3309_v58 = vadd.f32 %v3308_v14, %v3260_v61  ;;  %3578 = vmatmul.f32.gmra.mxu2 %v3425_v26  ;;  %3628 = vmatmul.f32.gmra.mxu3 %v3406_v24  ;;  %v10302_v24 = vld [vmem:[#allocation12_spill] sm:$0xff]  ;;  %v3403_v26 = vmax.f32 %v9052_v13, 0.0 }
 0x432   : > { %v3359_v18 = vpop.f32.mrf.mxu1  ;;  %v3410_v61 = vmax.f32 %v10302_v24, 0.0  ;;  %v10304_v13 = vld [vmem:[#allocation4_spill] sm:$0xff] }
 0x433   : > { %v3358_v29 = vadd.f32 %v3357_v38, %v3309_v58  ;;  %3687 = vmatmul.f32.vlgmr.msra.gmra.mxu0 %v3399_v44 }
 0x434   : > { %v9398_v2 = vpop.f32.mrf.mxu2  ;;  %v3264_v9 = vpop.f32.mrf.mxu3 }
 0x435   : > { %v3400_v53 = vmax.f32 %v3358_v29, 0.0  ;;  %v3265_v48 = vadd.f32 %v3264_v9, %v3216_v46  ;;  %v3218_v9 = vadd.f32 %v9336_v62, %v9383_v49  ;;  %v3526_v62 = vld [vmem:[%s10280_s4 + $0x208] sm:$0xff] }
 0x436   : > { %3815 = vmatpush.msra.mxu2 %v3526_v62  ;;  %v10310_v62 = vld [vmem:[#allocation16_spill] sm:$0xff] }
 0x437   : > { %3752 = vmatmul.f32.vlgmr.msra.gmra.mxu1 %v3400_v53  ;;  %v3414_v53 = vmax.f32 %v10303_v32, 0.0 }
 0x438   : > { %v3310_v38 = vpop.f32.mrf.mxu0 }
 0x439   : > { %v3311_v45 = vadd.f32 %v3310_v38, %v3262_v34  ;;  %3581 = vmatmul.f32.gmra.mxu2 %v3429_v31  ;;  %3631 = vmatmul.f32.gmra.mxu3 %v3410_v61  ;;  %v3433_v31 = vmax.f32 %v10304_v13, 0.0  ;;  %v3407_v34 = vmax.f32 %v9062_v40, 0.0  ;;  %v3437_v40 = vmax.f32 %v10305_v23, 0.0 }
 0x43a   : > { %v3362_v14 = vpop.f32.mrf.mxu1  ;;  %v3415_v23 = vmax.f32 %v9082_v0, 0.0 }
 0x43b   : > { %v3360_v44 = vadd.f32 %v3359_v18, %v3311_v45  ;;  %3690 = vmatmul.f32.gmra.mxu0 %v3403_v26 }
 0x43c   : > { %v9408_v58 = vpop.f32.mrf.mxu2  ;;  %v3266_v29 = vpop.f32.mrf.mxu3 }
 0x43d   : > { %v3404_v52 = vmax.f32 %v3360_v44, 0.0  ;;  %v3267_v46 = vadd.f32 %v3266_v29, %v3218_v9  ;;  %v3221_v29 = vadd.f32 %v9359_v20, %v9383_v49  ;;  %v3223_v20 = vadd.f32 %v9374_v10, %v9383_v49 }
 0x43f   : > { %3755 = vmatmul.f32.gmra.mxu1 %v3404_v52  ;;  %v10306_v52 = vld [vmem:[#allocation14_spill] sm:$0xff] }
 0x440   : > { %v3313_v18 = vpop.f32.mrf.mxu0  ;;  %v3418_v32 = vmax.f32 %v10306_v52, 0.0 }
 0x441   : > { %v3314_v24 = vadd.f32 %v3313_v18, %v3265_v48  ;;  %3584 = vmatmul.f32.gmra.mxu2 %v3433_v31  ;;  %3634 = vmatmul.f32.gmra.mxu3 %v3414_v53  ;;  %v3411_v48 = vmax.f32 %v9072_v54, 0.0  ;;  %v10308_v54 = vld [vmem:[#allocation6_spill] sm:$0xff] }
 0x442   : > { %v3364_v61 = vpop.f32.mrf.mxu1 }
 0x443   : > { %v3363_v38 = vadd.f32 %v3362_v14, %v3314_v24  ;;  %3693 = vmatmul.f32.gmra.mxu0 %v3407_v34 }
 0x444   : > { %v9418_v45 = vpop.f32.mrf.mxu2  ;;  %v3269_v26 = vpop.f32.mrf.mxu3 }
 0x445   : > { %v3408_v44 = vmax.f32 %v3363_v38, 0.0  ;;  %v10307_v38 = vld [vmem:[#allocation15_spill] sm:$0xff]  ;;  %v3270_v9 = vadd.f32 %v3269_v26, %v3221_v29  ;;  %v3525_v26 = vld [vmem:[%s10280_s4 + $0x200] sm:$0xff]  ;;  %v3426_v29 = vmax.f32 %v10310_v62, 0.0 }
 0x446   : > { %v3422_v22 = vmax.f32 %v10307_v38, 0.0  ;;  %3816 = vmatpush.msra.mxu2 %v3525_v26  ;;  %v3419_v38 = vmax.f32 %v9095_v7, 0.0  ;;  %v3423_v26 = vmax.f32 %v9115_v15, 0.0 }
 0x447   : > { %3758 = vmatmul.f32.gmra.mxu1 %v3408_v44  ;;  %v3441_v44 = vmax.f32 %v10308_v54, 0.0 }
 0x448   : > { %v3315_v14 = vpop.f32.mrf.mxu0 }
 0x449   : > { %v3316_v53 = vadd.f32 %v3315_v14, %v3267_v46  ;;  %3587 = vmatmul.f32.gmra.mxu2 %v3437_v40  ;;  %3637 = vmatmul.f32.gmra.mxu3 %v3418_v32 }
 0x44a   : > { %v3367_v13 = vpop.f32.mrf.mxu1 }
 0x44b   : > { %v3365_v31 = vadd.f32 %v3364_v61, %v3316_v53  ;;  %3696 = vmatmul.f32.gmra.mxu0 %v3411_v48  ;;  %v10309_v48 = vld [vmem:[#allocation7_spill] sm:$0xff] }
 0x44c   : > { %v9428_v18 = vpop.f32.mrf.mxu2  ;;  %v3271_v34 = vpop.f32.mrf.mxu3  ;;  %v3445_v0 = vmax.f32 %v10309_v48, 0.0 }
 0x44d   : > { %v3412_v24 = vmax.f32 %v3365_v31, 0.0  ;;  %v3272_v31 = vadd.f32 %v3271_v34, %v3223_v20  ;;  %v10311_v34 = vld [vmem:[#allocation17_spill] sm:$0xff] }
 0x44f   : > { %3761 = vmatmul.f32.gmra.mxu1 %v3412_v24 }
 0x450   : > { %v3318_v61 = vpop.f32.mrf.mxu0 }
 0x451   : > { %v3319_v40 = vadd.f32 %v3318_v61, %v3270_v9  ;;  %3590 = vmatmul.f32.gmra.mxu2 %v3441_v44  ;;  %3640 = vmatmul.f32.gmra.mxu3 %v3422_v22  ;;  %v3226_v44 = vadd.f32 %v9388_v17, %v9383_v49  ;;  %v3228_v17 = vadd.f32 %v9398_v2, %v9383_v49 }
 0x452   : > { %v3369_v46 = vpop.f32.mrf.mxu1 }
 0x453   : > { %v3368_v52 = vadd.f32 %v3367_v13, %v3319_v40  ;;  %3699 = vmatmul.f32.gmra.mxu0 %v3415_v23  ;;  %v3430_v23 = vmax.f32 %v10311_v34, 0.0 }
 0x454   : > { %v9435_v32 = vpop.f32.mrf.mxu2  ;;  %v3274_v14 = vpop.f32.mrf.mxu3 }
 0x455   : > { %v3416_v53 = vmax.f32 %v3368_v52, 0.0  ;;  %v3275_v40 = vadd.f32 %v3274_v14, %v3226_v44  ;;  %v10312_v52 = vld [vmem:[#allocation8_spill] sm:$0xff]  ;;  %v10313_v14 = vld [vmem:[#allocation9_spill] sm:$0xff] }
 0x456   : > { %v3449_v20 = vmax.f32 %v10312_v52, 0.0 }
 0x457   : > { %3764 = vmatmul.f32.gmra.mxu1 %v3416_v53 }
 0x458   : > { %v3320_v13 = vpop.f32.mrf.mxu0 }
 0x459   : > { %v3321_v24 = vadd.f32 %v3320_v13, %v3272_v31  ;;  %3593 = vmatmul.f32.gmra.mxu2 %v3445_v0  ;;  %3643 = vmatmul.f32.gmra.mxu3 %v3426_v29  ;;  %v3453_v29 = vmax.f32 %v10313_v14, 0.0 }
 0x45a   : > { %v3372_v22 = vpop.f32.mrf.mxu1 }
 0x45b   : > { %v3370_v10 = vadd.f32 %v3369_v46, %v3321_v24  ;;  %3702 = vmatmul.f32.gmra.mxu0 %v3419_v38  ;;  %v3434_v24 = vmax.f32 %v8910_v21, 0.0  ;;  %v3133_v38 = vadd.f32 %v9170_v55, %v9129_v47  ;;  %v3231_v21 = vadd.f32 %v9408_v58, %v9383_v49  ;;  %v10314_v55 = vld [vmem:[#allocation10_spill] sm:$0xff] }
 0x45c   : > { %v9445_v9 = vpop.f32.mrf.mxu2  ;;  %v3276_v54 = vpop.f32.mrf.mxu3  ;;  %v3457_v52 = vmax.f32 %v10314_v55, 0.0 }
 0x45d   : > { %v3420_v61 = vmax.f32 %v3370_v10, 0.0  ;;  %v3277_v13 = vadd.f32 %v3276_v54, %v3228_v17  ;;  %v3182_v54 = vadd.f32 %v9141_v1, %v3133_v38  ;;  %v3236_v38 = vadd.f32 %v9428_v18, %v9383_v49 }
 0x45f   : > { %3767 = vmatmul.f32.gmra.mxu1 %v3420_v61 }
 0x460   : > { %v3323_v53 = vpop.f32.mrf.mxu0 }
 0x461   : > { %v3324_v7 = vadd.f32 %v3323_v53, %v3275_v40  ;;  %3596 = vmatmul.f32.gmra.mxu2 %v3449_v20  ;;  %3646 = vmatmul.f32.gmra.mxu3 %v3430_v23  ;;  %v3438_v40 = vmax.f32 %v8951_v41, 0.0 }
 0x462   : > { %v3374_v46 = vpop.f32.mrf.mxu1 }
 0x463   : > { %v3373_v48 = vadd.f32 %v3372_v22, %v3324_v7  ;;  %3705 = vmatmul.f32.gmra.mxu0 %v3423_v26  ;;  %v3427_v22 = vmax.f32 %v9145_v60, 0.0  ;;  %v3135_v60 = vadd.f32 %v9204_v51, %v9158_v56  ;;  %v3431_v26 = vmax.f32 %v3182_v54, 0.0 }
 0x464   : > { %v9452_v0 = vpop.f32.mrf.mxu2  ;;  %v3279_v31 = vpop.f32.mrf.mxu3  ;;  %v3442_v56 = vmax.f32 %v8986_v57, 0.0 }
 0x465   : > { %v3424_v62 = vmax.f32 %v3373_v48, 0.0  ;;  %v3280_v47 = vadd.f32 %v3279_v31, %v3231_v21  ;;  %v3184_v41 = vadd.f32 %v9176_v5, %v3135_v60  ;;  %v3233_v48 = vadd.f32 %v9418_v45, %v9383_v49  ;;  %v9503_v60 = vld [vmem:[%s6734_s14 + $0x40] sm:$0xff] }
 0x467   : > { %3770 = vmatmul.f32.gmra.mxu1 %v3424_v62  ;;  %v3138_v62 = vadd.f32 %v9243_v12, %v9192_v3  ;;  %v3446_v12 = vmax.f32 %v9003_v36, 0.0 }
 0x468   : > { %v3325_v15 = vpop.f32.mrf.mxu0 }
 0x469   : > { %v3326_v10 = vadd.f32 %v3325_v15, %v3277_v13  ;;  %3599 = vmatmul.f32.gmra.mxu2 %v3453_v29  ;;  %3649 = vmatmul.f32.gmra.mxu3 %v3434_v24  ;;  %v9479_v29 = vld [vmem:[%s6734_s14 + $0x10] sm:$0xff]  ;;  %v3435_v13 = vmax.f32 %v3184_v41, 0.0  ;;  %v3187_v57 = vadd.f32 %v9209_v30, %v3138_v62 }
 0x46a   : > { %v3377_v44 = vpop.f32.mrf.mxu1 }
 0x46b   : > { %v3375_v61 = vadd.f32 %v3374_v46, %v3326_v10  ;;  %3708 = vmatmul.f32.gmra.mxu0 %v3427_v22  ;;  %v3439_v54 = vmax.f32 %v3187_v57, 0.0 }
 0x46c   : > { %v9461_v2 = vpop.f32.mrf.mxu2  ;;  %v3281_v34 = vpop.f32.mrf.mxu3 }
 0x46d   : > { %v3428_v23 = vmax.f32 %v3375_v61, 0.0  ;;  %v3282_v17 = vadd.f32 %v3281_v34, %v3233_v48  ;;  %v9491_v34 = vld [vmem:[%s6734_s14 + $0x28] sm:$0xff]  ;;  %v3145_v48 = vadd.f32 %v9350_v16, %v9306_v6  ;;  %v3458_v16 = vmax.f32 %v9035_v28, 0.0 }
 0x46e   : > { %v3246_v28 = vadd.f32 %v9461_v2, %v9383_v49 }
 0x46f   : > { %3773 = vmatmul.f32.gmra.mxu1 %v3428_v23  ;;  %v3238_v23 = vadd.f32 %v9435_v32, %v9383_v49 }
 0x470   : > { %v3328_v20 = vpop.f32.mrf.mxu0 }
 0x471   : > { %v3329_v53 = vadd.f32 %v3328_v20, %v3280_v47  ;;  %3602 = vmatmul.f32.gmra.mxu2 %v3457_v52  ;;  %3652 = vmatmul.f32.gmra.mxu3 %v3438_v40  ;;  %v3450_v47 = vmax.f32 %v9012_v11, 0.0  ;;  %v3143_v52 = vadd.f32 %v9316_v33, %v9268_v37  ;;  %v3241_v11 = vadd.f32 %v9445_v9, %v9383_v49 }
 0x472   : > { %v3379_v1 = vpop.f32.mrf.mxu1  ;;  %v3454_v37 = vmax.f32 %v9026_v50, 0.0  ;;  %v3194_v50 = vadd.f32 %v9325_v59, %v3145_v48 }
 0x473   : > { %v3378_v7 = vadd.f32 %v3377_v44, %v3329_v53  ;;  %3711 = vmatmul.f32.gmra.mxu0 %v3431_v26  ;;  %v3140_v44 = vadd.f32 %v9277_v25, %v9224_v63 }
 0x474   : > { %v9470_v58 = vpop.f32.mrf.mxu2  ;;  %v3284_v46 = vpop.f32.mrf.mxu3  ;;  %v3451_v59 = vmax.f32 %v3194_v50, 0.0 }
 0x475   : > { %v3432_v31 = vmax.f32 %v3378_v7, 0.0  ;;  %v3285_v10 = vadd.f32 %v3284_v46, %v3236_v38  ;;  %v3189_v36 = vadd.f32 %v9246_v19, %v3140_v44 }
 0x477   : > { %3776 = vmatmul.f32.gmra.mxu1 %v3432_v31  ;;  %v3443_v19 = vmax.f32 %v3189_v36, 0.0  ;;  %v3248_v36 = vadd.f32 %v9470_v58, %v9383_v49  ;;  %v9553_v58 = vld [vmem:[%s6734_s14 + $0xb8] sm:$0xff] }
 0x478   : > { %v3330_v51 = vpop.f32.mrf.mxu0 }
 0x479   : > { %v3331_v14 = vadd.f32 %v3330_v51, %v3282_v17  ;;  %3655 = vmatmul.f32.gmra.mxu3 %v3442_v56  ;;  %3817 = vmatmul.f32.vlgmr.msra.gmra.mxu2 %v9479_v29  ;;  %v9515_v17 = vld [vmem:[%s6734_s14 + $0x58] sm:$0xff]  ;;  %v3243_v51 = vadd.f32 %v9452_v0, %v9383_v49 }
 0x47a   : > { %v3382_v5 = vpop.f32.mrf.mxu1 }
 0x47b   : > { %v3380_v24 = vadd.f32 %v3379_v1, %v3331_v14  ;;  %3714 = vmatmul.f32.gmra.mxu0 %v3435_v13  ;;  %v3192_v1 = vadd.f32 %v9285_v43, %v3143_v52 }
 0x47c   : > { %v3286_v45 = vpop.f32.mrf.mxu3  ;;  %v9482_v15 = vpop.f32.mrf.mxu2 }
 0x47d   : > { %v3436_v3 = vmax.f32 %v3380_v24, 0.0  ;;  %v3287_v25 = vadd.f32 %v3286_v45, %v3238_v23  ;;  %v3447_v43 = vmax.f32 %v3192_v1, 0.0  ;;  %v9527_v45 = vld [vmem:[%s6734_s14 + $0x70] sm:$0xff]  ;;  %v9571_v1 = vld [vmem:[%s6734_s14 + $0x100] sm:$0xff] }
 0x47f   : > { %3779 = vmatmul.f32.gmra.mxu1 %v3436_v3 }
 0x480   : > { %v3333_v22 = vpop.f32.mrf.mxu0 }
 0x481   : > { %v3334_v61 = vadd.f32 %v3333_v22, %v3285_v10  ;;  %3658 = vmatmul.f32.gmra.mxu3 %v3446_v12  ;;  %3820 = vmatmul.f32.gmra.mxu2 %v9491_v34  ;;  %v3150_v22 = vadd.f32 %v9378_v35, %v9361_v27 }
 0x482   : > { %v3384_v30 = vpop.f32.mrf.mxu1 }
 0x483   : > { %v3383_v21 = vadd.f32 %v3382_v5, %v3334_v61  ;;  %3717 = vmatmul.f32.gmra.mxu0 %v3439_v54  ;;  %v3148_v5 = vadd.f32 %v9366_v39, %v9341_v42  ;;  %v9538_v61 = vld [vmem:[%s6734_s14 + $0x88] sm:$0xff]  ;;  %v3199_v2 = vadd.f32 %v9368_v4, %v3150_v22 }
 0x484   : > { %v9494_v18 = vpop.f32.mrf.mxu2  ;;  %v3289_v63 = vpop.f32.mrf.mxu3 }
 0x485   : > { %v3440_v40 = vmax.f32 %v3383_v21, 0.0  ;;  %v3290_v33 = vadd.f32 %v3289_v63, %v3241_v11  ;;  %v3197_v3 = vadd.f32 %v9352_v8, %v3148_v5  ;;  %v9547_v63 = vld [vmem:[%s6734_s14 + $0xa0] sm:$0xff] }
 0x487   : > { %3782 = vmatmul.f32.gmra.mxu1 %v3440_v40  ;;  %v3455_v54 = vmax.f32 %v3197_v3, 0.0 }
 0x488   : > { %v3335_v55 = vpop.f32.mrf.mxu0 }
 0x489   : > { %v3336_v20 = vadd.f32 %v3335_v55, %v3287_v25  ;;  %3661 = vmatmul.f32.gmra.mxu3 %v3450_v47  ;;  %3823 = vmatmul.f32.gmra.mxu2 %v9503_v60  ;;  %v3459_v25 = vmax.f32 %v3199_v2, 0.0 }
 0x48a   : > { %v3387_v32 = vpop.f32.mrf.mxu1 }
 0x48b   : > { %v3385_v53 = vadd.f32 %v3384_v30, %v3336_v20  ;;  %3720 = vmatmul.f32.gmra.mxu0 %v3443_v19  ;;  %v9559_v20 = vld [vmem:[%s6734_s14 + $0xd0] sm:$0xff] }
 0x48c   : > { %v9506_v26 = vpop.f32.mrf.mxu2  ;;  %v3291_v46 = vpop.f32.mrf.mxu3 }
 0x48d   : > { %v3444_v7 = vmax.f32 %v3385_v53, 0.0  ;;  %v3292_v6 = vadd.f32 %v3291_v46, %v3243_v51  ;;  %v9565_v53 = vld [vmem:[%s6734_s14 + $0xe8] sm:$0xff] }
 0x48f   : > { %3785 = vmatmul.f32.gmra.mxu1 %v3444_v7  ;;  %v9577_v7 = vld [vmem:[%s6734_s14 + $0x118] sm:$0xff] }
 0x490   : > { %v3338_v41 = vpop.f32.mrf.mxu0 }
 0x491   : > { %v3339_v31 = vadd.f32 %v3338_v41, %v3290_v33  ;;  %3664 = vmatmul.f32.gmra.mxu3 %v3454_v37  ;;  %3826 = vmatmul.f32.gmra.mxu2 %v9515_v17  ;;  %v9583_v41 = vld [vmem:[%s6734_s14 + $0x130] sm:$0xff] }
 0x492   : > { %v3389_v14 = vpop.f32.mrf.mxu1 }
 0x493   : > { %v3388_v56 = vadd.f32 %v3387_v32, %v3339_v31  ;;  %3723 = vmatmul.f32.gmra.mxu0 %v3447_v43 }
 0x494   : > { %v9518_v9 = vpop.f32.mrf.mxu2  ;;  %v3294_v57 = vpop.f32.mrf.mxu3 }
 0x495   : > { %v3448_v62 = vmax.f32 %v3388_v56, 0.0  ;;  %v3295_v42 = vadd.f32 %v3294_v57, %v3246_v28  ;;  %v9589_v56 = vld [vmem:[%s6734_s14 + $0x148] sm:$0xff] }
 0x497   : > { %3788 = vmatmul.f32.gmra.mxu1 %v3448_v62 }
 0x498   : > { %v3340_v13 = vpop.f32.mrf.mxu0 }
 0x499   : > { %v3341_v24 = vadd.f32 %v3340_v13, %v3292_v6  ;;  %3667 = vmatmul.f32.gmra.mxu3 %v3458_v16  ;;  %3829 = vmatmul.f32.gmra.mxu2 %v9527_v45 }
 0x49a   : > { %v3392_v39 = vpop.f32.mrf.mxu1 }
 0x49b   : > { %v3390_v0 = vadd.f32 %v3389_v14, %v3341_v24  ;;  %3726 = vmatmul.f32.gmra.mxu0 %v3451_v59  ;;  %v9595_v14 = vld [vmem:[%s6734_s14 + $0x160] sm:$0xff]  ;;  %v9601_v24 = vld [vmem:[%s6734_s14 + $0x178] sm:$0xff]  ;;  %s6573_s14 = smov 9  }
 0x49c   : > { %v9530_v38 = vpop.f32.mrf.mxu2  ;;  %v3296_v8 = vpop.f32.mrf.mxu3 }
 0x49d   : > { %v3452_v12 = vmax.f32 %v3390_v0, 0.0  ;;  %v3297_v27 = vadd.f32 %v3296_v8, %v3248_v36 }
 0x49f   : > { %3791 = vmatmul.f32.gmra.mxu1 %v3452_v12 }
 0x4a0   : > { %v3343_v10 = vpop.f32.mrf.mxu0 }
 0x4a1   : > { %v3344_v44 = vadd.f32 %v3343_v10, %v3295_v42  ;;  %3832 = vmatmul.f32.gmra.mxu2 %v9538_v61 }
 0x4a2   : > { %v3394_v47 = vpop.f32.mrf.mxu1 }
 0x4a3   : > { %v3393_v30 = vadd.f32 %v3392_v39, %v3344_v44  ;;  %3729 = vmatmul.f32.gmra.mxu0 %v3455_v54 }
 0x4a4   : > { %v9541_v21 = vpop.f32.mrf.mxu2  ;;  %v3623_v33 = vpop.f32.mrf.mxu3 }
 0x4a5   : > { %v3456_v23 = vmax.f32 %v3393_v30, 0.0  ;;  %v3624_v3 = vadd.f32 %v3623_v33, %v9482_v15 }
 0x4a7   : > { %3794 = vmatmul.f32.gmra.mxu1 %v3456_v23 }
 0x4a8   : > { %v3345_v35 = vpop.f32.mrf.mxu0 }
 0x4a9   : > { %v3346_v40 = vadd.f32 %v3345_v35, %v3297_v27  ;;  %3835 = vmatmul.f32.gmra.mxu2 %v9547_v63 }
 0x4ab   : > { %v3395_v55 = vadd.f32 %v3394_v47, %v3346_v40  ;;  %3732 = vmatmul.f32.gmra.mxu0 %v3459_v25 }
 0x4ac   : > { %v9550_v4 = vpop.f32.mrf.mxu2  ;;  %v3626_v43 = vpop.f32.mrf.mxu3 }
 0x4ad   : > { %v3460_v49 = vmax.f32 %v3395_v55, 0.0  ;;  %v3627_v44 = vadd.f32 %v3626_v43, %v9494_v18 }
 0x4af   : > { %3797 = vmatmul.f32.gmra.mxu1 %v3460_v49 }
 0x4b0   : > { %v3688_v46 = vpop.f32.mrf.mxu0 }
 0x4b1   : > { %3838 = vmatmul.f32.gmra.mxu2 %v9553_v58  ;;  %v3689_v12 = vadd.f32 %v3688_v46, %v3624_v3 }
 0x4b4   : > { %v9556_v52 = vpop.f32.mrf.mxu2  ;;  %v3753_v48 = vpop.f32.mrf.mxu1 }
 0x4b5   : > { %v3629_v6 = vpop.f32.mrf.mxu3  ;;  %v3754_v42 = vadd.f32 %v3753_v48, %v3689_v12 }
 0x4b6   : > { %v3630_v15 = vadd.f32 %v3629_v6, %v9506_v26 }
 0x4b8   : > { %v3691_v50 = vpop.f32.mrf.mxu0 }
 0x4b9   : > { %3841 = vmatmul.f32.gmra.mxu2 %v9559_v20  ;;  %v3692_v8 = vadd.f32 %v3691_v50, %v3627_v44 }
 0x4bc   : > { %v9562_v19 = vpop.f32.mrf.mxu2  ;;  %v3756_v51 = vpop.f32.mrf.mxu1 }
 0x4bd   : > { %v3632_v59 = vpop.f32.mrf.mxu3  ;;  %v3757_v23 = vadd.f32 %v3756_v51, %v3692_v8 }
 0x4be   : > { %v3633_v50 = vadd.f32 %v3632_v59, %v9518_v9 }
 0x4c0   : > { %v3694_v16 = vpop.f32.mrf.mxu0 }
 0x4c1   : > { %3844 = vmatmul.f32.gmra.mxu2 %v9565_v53  ;;  %v3695_v55 = vadd.f32 %v3694_v16, %v3630_v15 }
 0x4c4   : > { %v9568_v32 = vpop.f32.mrf.mxu2  ;;  %v3759_v5 = vpop.f32.mrf.mxu1 }
 0x4c5   : > { %v3635_v22 = vpop.f32.mrf.mxu3  ;;  %v3760_v33 = vadd.f32 %v3759_v5, %v3695_v55 }
 0x4c8   : > { %v3697_v0 = vpop.f32.mrf.mxu0 }
 0x4c9   : > { %3847 = vmatmul.f32.gmra.mxu2 %v9571_v1  ;;  %v3698_v6 = vadd.f32 %v3697_v0, %v3633_v50 }
 0x4cc   : > { %v9574_v11 = vpop.f32.mrf.mxu2  ;;  %v3762_v28 = vpop.f32.mrf.mxu1 }
 0x4cd   : > { %v3638_v25 = vpop.f32.mrf.mxu3  ;;  %v3763_v16 = vadd.f32 %v3762_v28, %v3698_v6 }
 0x4d0   : > { %v3700_v30 = vpop.f32.mrf.mxu0 }
 0x4d1   : > { %3850 = vmatmul.f32.gmra.mxu2 %v9577_v7 }
 0x4d4   : > { %v9580_v37 = vpop.f32.mrf.mxu2  ;;  %v3765_v36 = vpop.f32.mrf.mxu1 }
 0x4d5   : > { %v3641_v12 = vpop.f32.mrf.mxu3 }
 0x4d6   : > { %v3642_v50 = vadd.f32 %v3641_v12, %v9550_v4 }
 0x4d8   : > { %v3703_v18 = vpop.f32.mrf.mxu0 }
 0x4d9   : > { %3853 = vmatmul.f32.gmra.mxu2 %v9583_v41 }
 0x4dc   : > { %v9586_v31 = vpop.f32.mrf.mxu2  ;;  %v3768_v46 = vpop.f32.mrf.mxu1 }
 0x4e1   : > { %3856 = vmatmul.f32.gmra.mxu2 %v9589_v56 }
 0x4e4   : > { %v9592_v62 = vpop.f32.mrf.mxu2  ;;  %v3771_v44 = vpop.f32.mrf.mxu1 }
 0x4e9   : > { %3859 = vmatmul.f32.gmra.mxu2 %v9595_v14 }
 0x4ec   : > { %v9598_v13 = vpop.f32.mrf.mxu2  ;;  %v3774_v55 = vpop.f32.mrf.mxu1 }
 0x4f1   : > { %3862 = vmatmul.f32.gmra.mxu2 %v9601_v24 }
 0x4f4   : > { %v9604_v57 = vpop.f32.mrf.mxu2 }
 0x4fc   : > { %v3818_v39 = vpop.f32.mrf.mxu2 }
 0x4fd   : > { %v9607_v10 = vadd.f32 %v3818_v39, %v3754_v42  ;;  %v3706_v42 = vpop.f32.mrf.mxu0 }
 0x4ff   : > { %v3866_v54 = vmul.f32 0.5, %v9607_v10 }
 0x501   : > { %v3882_v2 = vmul.f32 1.442695, %v3866_v54  ;;  %v3636_v54 = vadd.f32 %v3635_v22, %v9530_v38 }
 0x503   : > { %6512 = vpow2.f32 %v3882_v2  ;;  %v3701_v59 = vadd.f32 %v3700_v30, %v3636_v54 }
 0x504   : > { %v3821_v27 = vpop.f32.mrf.mxu2 }
 0x505   : > { %v9611_v35 = vadd.f32 %v3821_v27, %v3757_v23  ;;  %v3766_v0 = vadd.f32 %v3765_v36, %v3701_v59  ;;  %v3644_v23 = vpop.f32.mrf.mxu3  ;;  %v3709_v15 = vpop.f32.mrf.mxu0 }
 0x507   : > { %v3867_v40 = vmul.f32 0.5, %v9611_v35 }
 0x509   : > { %v6513_v47 = vpop.eup %6512  ;;  %v3884_v49 = vmul.f32 1.442695, %v3867_v40  ;;  %v3639_v40 = vadd.f32 %v3638_v25, %v9541_v21  ;;  %v3707_v25 = vadd.f32 %v3706_v42, %v3642_v50 }
 0x50a   : > { %3930 = vrot.lane.b32.xlu0 %v6513_v47, %s6573_s14 }
 0x50b   : > { %6514 = vpow2.f32 %v3884_v49  ;;  %v3704_v22 = vadd.f32 %v3703_v18, %v3639_v40  ;;  %v3772_v18 = vadd.f32 %v3771_v44, %v3707_v25 }
 0x50c   : > { %v3824_v48 = vpop.f32.mrf.mxu2 }
 0x50d   : > { %v9616_v43 = vadd.f32 %v3824_v48, %v3760_v33  ;;  %v3769_v30 = vadd.f32 %v3768_v46, %v3704_v22  ;;  %v3647_v48 = vpop.f32.mrf.mxu3 }
 0x50f   : > { %v3868_v26 = vmul.f32 0.5, %v9616_v43 }
 0x511   : > { %v6515_v51 = vpop.eup %6514  ;;  %v3886_v3 = vmul.f32 1.442695, %v3868_v26 }
 0x512   : > { %3932 = vrot.lane.b32.xlu0 %v6515_v51, %s6573_s14  ;;  %v3712_v51 = vpop.f32.mrf.mxu0 }
 0x513   : > { %6516 = vpow2.f32 %v3886_v3  ;;  %v3777_v3 = vpop.f32.mrf.mxu1 }
 0x514   : > { %v3827_v39 = vpop.f32.mrf.mxu2 }
 0x515   : > { %v9621_v5 = vadd.f32 %v3827_v39, %v3763_v16  ;;  %v3645_v39 = vadd.f32 %v3644_v23, %v9556_v52 }
 0x517   : > { %v3869_v8 = vmul.f32 0.5, %v9621_v5  ;;  %v3710_v12 = vadd.f32 %v3709_v15, %v3645_v39 }
 0x519   : > { %v6517_v9 = vpop.eup %6516  ;;  %v3888_v2 = vmul.f32 1.442695, %v3869_v8  ;;  %v3650_v8 = vpop.f32.mrf.mxu3  ;;  %v3775_v42 = vadd.f32 %v3774_v55, %v3710_v12 }
 0x51a   : > { %3934 = vrot.lane.b32.xlu1 %v6517_v9, %s6573_s14  ;;  %v3715_v59 = vpop.f32.mrf.mxu0 }
 0x51b   : > { %6518 = vpow2.f32 %v3888_v2  ;;  %v3780_v2 = vpop.f32.mrf.mxu1 }
 0x51c   : > { %v3830_v27 = vpop.f32.mrf.mxu2 }
 0x51d   : > { %v9626_v28 = vadd.f32 %v3830_v27, %v3766_v0  ;;  %v3648_v27 = vadd.f32 %v3647_v48, %v9562_v19 }
 0x51f   : > { %v3870_v47 = vmul.f32 0.5, %v9626_v28  ;;  %v3713_v23 = vadd.f32 %v3712_v51, %v3648_v27 }
 0x521   : > { %v6519_v38 = vpop.eup %6518  ;;  %v3890_v49 = vmul.f32 1.442695, %v3870_v47  ;;  %v3778_v15 = vadd.f32 %v3777_v3, %v3713_v23 }
 0x522   : > { %3936 = vrot.lane.b32.xlu1 %v6519_v38, %s6573_s14  ;;  %v3653_v38 = vpop.f32.mrf.mxu3  ;;  %v3718_v22 = vpop.f32.mrf.mxu0 }
 0x523   : > { %6520 = vpow2.f32 %v3890_v49 }
 0x524   : > { %v3833_v33 = vpop.f32.mrf.mxu2 }
 0x525   : > { %v9631_v36 = vadd.f32 %v3833_v33, %v3769_v30  ;;  %v3783_v30 = vpop.f32.mrf.mxu1  ;;  %v3651_v33 = vadd.f32 %v3650_v8, %v9568_v32 }
 0x527   : > { %v3871_v26 = vmul.f32 0.5, %v9631_v36  ;;  %v3716_v48 = vadd.f32 %v3715_v59, %v3651_v33 }
 0x529   : > { %v6521_v21 = vpop.eup %6520  ;;  %v3892_v6 = vmul.f32 1.442695, %v3871_v26  ;;  %v3781_v51 = vadd.f32 %v3780_v2, %v3716_v48 }
 0x52a   : > { %3938 = vrot.lane.b32.xlu2 %v6521_v21, %s6573_s14  ;;  %v3656_v21 = vpop.f32.mrf.mxu3  ;;  %v3721_v3 = vpop.f32.mrf.mxu0 }
 0x52b   : > { %6522 = vpow2.f32 %v3892_v6 }
 0x52c   : > { %v3836_v16 = vpop.f32.mrf.mxu2 }
 0x52d   : > { %v9636_v46 = vadd.f32 %v3836_v16, %v3772_v18  ;;  %v3654_v18 = vadd.f32 %v3653_v38, %v9574_v11  ;;  %v3786_v39 = vpop.f32.mrf.mxu1 }
 0x52f   : > { %v3872_v54 = vmul.f32 0.5, %v9636_v46 }
 0x531   : > { %v6523_v4 = vpop.eup %6522  ;;  %v3894_v9 = vmul.f32 1.442695, %v3872_v54  ;;  %v3719_v54 = vadd.f32 %v3718_v22, %v3654_v18 }
 0x532   : > { %3940 = vrot.lane.b32.xlu2 %v6523_v4, %s6573_s14  ;;  %v3659_v59 = vpop.f32.mrf.mxu3 }
 0x533   : > { %6524 = vpow2.f32 %v3894_v9  ;;  %v3784_v4 = vadd.f32 %v3783_v30, %v3719_v54 }
 0x534   : > { %v3839_v0 = vpop.f32.mrf.mxu2 }
 0x535   : > { %v9641_v44 = vadd.f32 %v3839_v0, %v3775_v42  ;;  %v3657_v42 = vadd.f32 %v3656_v21, %v9580_v37  ;;  %v3724_v0 = vpop.f32.mrf.mxu0 }
 0x537   : > { %v3873_v40 = vmul.f32 0.5, %v9641_v44  ;;  %v3722_v27 = vadd.f32 %v3721_v3, %v3657_v42 }
 0x539   : > { %v6525_v52 = vpop.eup %6524  ;;  %v3896_v47 = vmul.f32 1.442695, %v3873_v40  ;;  %v3787_v23 = vadd.f32 %v3786_v39, %v3722_v27 }
 0x53a   : > { %3942 = vrot.lane.b32.xlu0 %v6525_v52, %s6573_s14  ;;  %v3789_v52 = vpop.f32.mrf.mxu1 }
 0x53b   : > { %6526 = vpow2.f32 %v3896_v47 }
 0x53c   : > { %v3842_v49 = vpop.f32.mrf.mxu2 }
 0x53d   : > { %v9646_v55 = vadd.f32 %v3842_v49, %v3778_v15  ;;  %v3660_v15 = vadd.f32 %v3659_v59, %v9586_v31  ;;  %v3662_v49 = vpop.f32.mrf.mxu3 }
 0x53e   : > { %v3663_v21 = vadd.f32 %v3662_v49, %v9592_v62 }
 0x53f   : > { %v3874_v50 = vmul.f32 0.5, %v9646_v55  ;;  %v3725_v30 = vadd.f32 %v3724_v0, %v3660_v15 }
 0x541   : > { %v6527_v19 = vpop.eup %6526  ;;  %v3898_v26 = vmul.f32 1.442695, %v3874_v50  ;;  %v3727_v50 = vpop.f32.mrf.mxu0 }
 0x542   : > { %3944 = vrot.lane.b32.xlu1 %v6527_v19, %s6573_s14  ;;  %v3790_v19 = vadd.f32 %v3789_v52, %v3725_v30  ;;  %v3792_v48 = vpop.f32.mrf.mxu1  ;;  %v3728_v3 = vadd.f32 %v3727_v50, %v3663_v21 }
 0x543   : > { %6528 = vpow2.f32 %v3898_v26 }
 0x544   : > { %v3845_v25 = vpop.f32.mrf.mxu2  ;;  %v3793_v39 = vadd.f32 %v3792_v48, %v3728_v3 }
 0x545   : > { %v9651_v6 = vadd.f32 %v3845_v25, %v3781_v51 }
 0x547   : > { %v3875_v16 = vmul.f32 0.5, %v9651_v6 }
 0x549   : > { %v6529_v32 = vpop.eup %6528  ;;  %v3900_v8 = vmul.f32 1.442695, %v3875_v16  ;;  %v3665_v16 = vpop.f32.mrf.mxu3 }
 0x54a   : > { %3946 = vrot.lane.b32.xlu2 %v6529_v32, %s6573_s14  ;;  %v3730_v32 = vpop.f32.mrf.mxu0 }
 0x54b   : > { %6530 = vpow2.f32 %v3900_v8 }
 0x54c   : > { %v3848_v12 = vpop.f32.mrf.mxu2 }
 0x54d   : > { %v9656_v9 = vadd.f32 %v3848_v12, %v3784_v4  ;;  %v3795_v4 = vpop.f32.mrf.mxu1  ;;  %v3666_v12 = vadd.f32 %v3665_v16, %v9598_v13 }
 0x54f   : > { %v3876_v2 = vmul.f32 0.5, %v9656_v9  ;;  %v3731_v42 = vadd.f32 %v3730_v32, %v3666_v12 }
 0x551   : > { %v6531_v11 = vpop.eup %6530  ;;  %v3902_v40 = vmul.f32 1.442695, %v3876_v2  ;;  %v3796_v0 = vadd.f32 %v3795_v4, %v3731_v42  ;;  %v6575_v42 = vmov 0  }
 0x552   : > { %3948 = vrot.lane.b32.xlu0 %v6531_v11, %s6573_s14  ;;  %v3668_v11 = vpop.f32.mrf.mxu3  ;;  %v3733_v52 = vpop.f32.mrf.mxu0  ;;  %6385 = vset.pattern.permute.xlu2 %v6575_v42 }
 0x553   : > { %6532 = vpow2.f32 %v3902_v40  ;;  %6387 = vset.pattern.permute.xlu0 %v6575_v42  ;;  %6389 = vset.pattern.permute.xlu1 %v6575_v42 }
 0x554   : > { %v3851_v47 = vpop.f32.mrf.mxu2 }
 0x555   : > { %v9661_v38 = vadd.f32 %v3851_v47, %v3787_v23  ;;  %v3669_v23 = vadd.f32 %v3668_v11, %v9604_v57  ;;  %v3798_v15 = vpop.f32.mrf.mxu1 }
 0x557   : > { %v3877_v22 = vmul.f32 0.5, %v9661_v38 }
 0x559   : > { %v6533_v37 = vpop.eup %6532  ;;  %v3904_v33 = vmul.f32 1.442695, %v3877_v22  ;;  %v3734_v22 = vadd.f32 %v3733_v52, %v3669_v23 }
 0x55a   : > { %3950 = vrot.lane.b32.xlu1 %v6533_v37, %s6573_s14 }
 0x55b   : > { %6534 = vpow2.f32 %v3904_v33  ;;  %v3799_v37 = vadd.f32 %v3798_v15, %v3734_v22 }
 0x55c   : > { %v3854_v26 = vpop.f32.mrf.mxu2 }
 0x55d   : > { %v9666_v51 = vadd.f32 %v3854_v26, %v3790_v19 }
 0x55f   : > { %v3878_v25 = vmul.f32 0.5, %v9666_v51 }
 0x561   : > { %v6535_v31 = vpop.eup %6534  ;;  %v3906_v18 = vmul.f32 1.442695, %v3878_v25 }
 0x562   : > { %3952 = vrot.lane.b32.xlu2 %v6535_v31, %s6573_s14 }
 0x563   : > { %6536 = vpow2.f32 %v3906_v18 }
 0x564   : > { %v3857_v54 = vpop.f32.mrf.mxu2 }
 0x565   : > { %v9671_v8 = vadd.f32 %v3857_v54, %v3793_v39 }
 0x567   : > { %v3879_v59 = vmul.f32 0.5, %v9671_v8 }
 0x569   : > { %v6537_v62 = vpop.eup %6536  ;;  %v3908_v2 = vmul.f32 1.442695, %v3879_v59 }
 0x56a   : > { %3954 = vrot.lane.b32.xlu0 %v6537_v62, %s6573_s14 }
 0x56b   : > { %6538 = vpow2.f32 %v3908_v2 }
 0x56c   : > { %v3860_v27 = vpop.f32.mrf.mxu2 }
 0x56d   : > { %v9676_v40 = vadd.f32 %v3860_v27, %v3796_v0 }
 0x56f   : > { %v3880_v47 = vmul.f32 0.5, %v9676_v40 }
 0x571   : > { %v6539_v13 = vpop.eup %6538  ;;  %v3910_v49 = vmul.f32 1.442695, %v3880_v47 }
 0x572   : > { %3956 = vrot.lane.b32.xlu1 %v6539_v13, %s6573_s14 }
 0x573   : > { %6540 = vpow2.f32 %v3910_v49 }
 0x574   : > { %v3863_v30 = vpop.f32.mrf.mxu2 }
 0x575   : > { %v9681_v33 = vadd.f32 %v3863_v30, %v3799_v37 }
 0x577   : > { %v3881_v50 = vmul.f32 0.5, %v9681_v33 }
 0x579   : > { %v6541_v19 = vpop.eup %6540  ;;  %v3912_v48 = vmul.f32 1.442695, %v3881_v50 }
 0x57a   : > { %3958 = vrot.lane.b32.xlu2 %v6541_v19, %s6573_s14 }
 0x57b   : > { %6542 = vpow2.f32 %v3912_v48 }
 0x57c   : > { %v3931_v57 = vpop.permute.xlu0 %3930 }
 0x57d   : > { %v3978_v26 = vmul.f32 %v9479_v29, %v3931_v57 }
 0x57f   : > { %4010 = vrot.lane.b32.xlu1 %v3978_v26, %s6574_s26 }
 0x581   : > { %v6543_v21 = vpop.eup %6542 }
 0x582   : > { %3960 = vrot.lane.b32.xlu0 %v6543_v21, %s6573_s14 }
 0x584   : > { %v3933_v25 = vpop.permute.xlu0 %3932  ;;  %v3939_v3 = vpop.permute.xlu2 %3938 }
 0x585   : > { %v3979_v31 = vmul.f32 %v9491_v34, %v3933_v25  ;;  %v3982_v16 = vmul.f32 %v9527_v45, %v3939_v3 }
 0x587   : > { %4012 = vrot.lane.b32.xlu2 %v3979_v31, %s6574_s26 }
 0x58c   : > { %v3935_v18 = vpop.permute.xlu1 %3934  ;;  %v3941_v29 = vpop.permute.xlu2 %3940 }
 0x58d   : > { %v3980_v39 = vmul.f32 %v9503_v60, %v3935_v18  ;;  %v3983_v54 = vmul.f32 %v9538_v61, %v3941_v29 }
 0x58f   : > { %4018 = vrot.lane.b32.xlu2 %v3982_v16, %s6574_s26  ;;  %4014 = vrot.lane.b32.xlu0 %v3980_v39, %s6574_s26 }
 0x594   : > { %v3937_v32 = vpop.permute.xlu1 %3936 }
 0x595   : > { %v3981_v4 = vmul.f32 %v9515_v17, %v3937_v32 }
 0x597   : > { %4016 = vrot.lane.b32.xlu1 %v3981_v4, %s6574_s26  ;;  %4020 = vrot.lane.b32.xlu0 %v3983_v54, %s6574_s26 }
 0x5a4   : > { %v3947_v34 = vpop.permute.xlu2 %3946 }
 0x5a5   : > { %v3986_v12 = vmul.f32 %v9559_v20, %v3947_v34 }
 0x5a7   : > { %4026 = vrot.lane.b32.xlu0 %v3986_v12, %s6574_s26 }
 0x5ac   : > { %v3943_v60 = vpop.permute.xlu0 %3942 }
 0x5ad   : > { %v3984_v45 = vmul.f32 %v9547_v63, %v3943_v60 }
 0x5af   : > { %4022 = vrot.lane.b32.xlu1 %v3984_v45, %s6574_s26 }
 0x5b4   : > { %v3945_v59 = vpop.permute.xlu1 %3944 }
 0x5b5   : > { %v3985_v62 = vmul.f32 %v9553_v58, %v3945_v59 }
 0x5b7   : > { %4024 = vrot.lane.b32.xlu2 %v3985_v62, %s6574_s26  ;;  %v9764_v62 = vld [vmem:[%s10281_s5] sm:$0xff] }
 0x5bc   : > { %v3953_v17 = vpop.permute.xlu2 %3952 }
 0x5bd   : > { %v3989_v61 = vmul.f32 %v9577_v7, %v3953_v17  ;;  %v9767_v17 = vperm.slane %v9764_v62, 2 }
 0x5bf   : > { %4032 = vrot.lane.b32.xlu0 %v3989_v61, %s6574_s26 }
 0x5c4   : > { %v3949_v20 = vpop.permute.xlu0 %3948 }
 0x5c5   : > { %v3987_v63 = vmul.f32 %v9565_v53, %v3949_v20 }
 0x5c7   : > { %4028 = vrot.lane.b32.xlu1 %v3987_v63, %s6574_s26 }
 0x5cc   : > { %v3951_v58 = vpop.permute.xlu1 %3950 }
 0x5cd   : > { %v3988_v2 = vmul.f32 %v9571_v1, %v3951_v58  ;;  %v6576_v1 = vmov 1   ;;  %v9774_v58 = vperm.slane %v9764_v62, 3 }
 0x5cf   : > { %4030 = vrot.lane.b32.xlu2 %v3988_v2, %s6574_s26 }
 0x5d4   : > { %v3959_v7 = vpop.permute.xlu2 %3958 }
 0x5d5   : > { %v3992_v0 = vmul.f32 %v9595_v14, %v3959_v7 }
 0x5d7   : > { %4038 = vrot.lane.b32.xlu0 %v3992_v0, %s6574_s26 }
 0x5dc   : > { %v3955_v11 = vpop.permute.xlu0 %3954 }
 0x5dd   : > { %v3990_v27 = vmul.f32 %v9583_v41, %v3955_v11 }
 0x5df   : > { %4034 = vrot.lane.b32.xlu1 %v3990_v27, %s6574_s26 }
 0x5e1   : > { %v4013_v52 = vpop.permute.xlu2 %4012 }
 0x5e2   : > { %v4059_v53 = vadd.f32 %v4013_v52, %v9611_v35 }
 0x5e4   : > { %v3957_v23 = vpop.permute.xlu1 %3956  ;;  %4081 = vperm.xlu0 %6387, %v4059_v53  }
 0x5e5   : > { %v3991_v47 = vmul.f32 %v9589_v56, %v3957_v23 }
 0x5e7   : > { %4036 = vrot.lane.b32.xlu2 %v3991_v47, %s6574_s26 }
 0x5ec   : > { %6388 = vset.pattern.permute.xlu0 %v6576_v1 }
 0x5ed   : > { %4256 = vperm.xlu0 %6388, %v4059_v53  }
 0x5f1   : > { %v4011_v14 = vpop.permute.xlu1 %4010 }
 0x5f2   : > { %v4058_v15 = vadd.f32 %v4011_v14, %v9607_v10 }
 0x5f4   : > { %4076 = vperm.xlu2 %6385, %v4058_v15   ;;  %v3961_v41 = vpop.permute.xlu0 %3960 }
 0x5f5   : > { %v3993_v13 = vmul.f32 %v9601_v24, %v3961_v41  ;;  %6397 = vset.pattern.permute.xlu0 %v6575_v42  ;;  %v4019_v24 = vpop.permute.xlu2 %4018 }
 0x5f6   : > { %v4062_v30 = vadd.f32 %v4019_v24, %v9626_v28 }
 0x5f7   : > { %4040 = vrot.lane.b32.xlu1 %v3993_v13, %s6574_s26 }
 0x5fc   : > { %6386 = vset.pattern.permute.xlu2 %v6576_v1 }
 0x5fd   : > { %4252 = vperm.xlu2 %6386, %v4058_v15  }
 0x601   : > { %v4015_v56 = vpop.permute.xlu0 %4014 }
 0x602   : > { %v4060_v22 = vadd.f32 %v4015_v56, %v9616_v43 }
 0x604   : > { %4086 = vperm.xlu1 %6389, %v4060_v22  }
 0x605   : > { %6391 = vset.pattern.permute.xlu2 %v6575_v42 }
 0x609   : > { %v4017_v49 = vpop.permute.xlu1 %4016  ;;  %v4021_v50 = vpop.permute.xlu0 %4020 }
 0x60a   : > { %v4061_v37 = vadd.f32 %v4017_v49, %v9621_v5  ;;  %v4063_v19 = vadd.f32 %v4021_v50, %v9631_v36 }
 0x60c   : > { %4091 = vperm.xlu2 %6391, %v4061_v37   ;;  %6390 = vset.pattern.permute.xlu1 %v6576_v1 }
 0x60d   : > { %4260 = vperm.xlu1 %6390, %v4060_v22  }
 0x611   : > { %v4025_v26 = vpop.permute.xlu2 %4024 }
 0x612   : > { %v4065_v21 = vadd.f32 %v4025_v26, %v9641_v44 }
 0x614   : > { %6392 = vset.pattern.permute.xlu2 %v6576_v1 }
 0x615   : > { %4264 = vperm.xlu2 %6392, %v4061_v37   ;;  %6393 = vset.pattern.permute.xlu1 %v6575_v42 }
 0x616   : > { %4096 = vperm.xlu1 %6393, %v4062_v30  }
 0x619   : > { %v4027_v25 = vpop.permute.xlu0 %4026 }
 0x61a   : > { %v4066_v31 = vadd.f32 %v4027_v25, %v9646_v55 }
 0x61d   : > { %6395 = vset.pattern.permute.xlu2 %v6575_v42 }
 0x61e   : > { %6394 = vset.pattern.permute.xlu1 %v6576_v1  ;;  %4101 = vperm.xlu2 %6395, %v4063_v19  }
 0x61f   : > { %4268 = vperm.xlu1 %6394, %v4062_v30  }
 0x621   : > { %v4023_v48 = vpop.permute.xlu1 %4022 }
 0x622   : > { %v4064_v57 = vadd.f32 %v4023_v48, %v9636_v46 }
 0x624   : > { %4106 = vperm.xlu0 %6397, %v4064_v57  }
 0x626   : > { %6396 = vset.pattern.permute.xlu2 %v6576_v1 }
 0x627   : > { %6399 = vset.pattern.permute.xlu1 %v6575_v42  ;;  %4272 = vperm.xlu2 %6396, %v4063_v19  }
 0x628   : > { %4111 = vperm.xlu1 %6399, %v4065_v21  }
 0x629   : > { %v4031_v3 = vpop.permute.xlu2 %4030 }
 0x62a   : > { %v4068_v18 = vadd.f32 %v4031_v3, %v9656_v9 }
 0x62c   : > { %6398 = vset.pattern.permute.xlu0 %v6576_v1 }
 0x62d   : > { %4276 = vperm.xlu0 %6398, %v4064_v57  }
 0x62f   : > { %6401 = vset.pattern.permute.xlu2 %v6575_v42 }
 0x630   : > { %6400 = vset.pattern.permute.xlu1 %v6576_v1  ;;  %4116 = vperm.xlu2 %6401, %v4066_v31  }
 0x631   : > { %4280 = vperm.xlu1 %6400, %v4065_v21   ;;  %v4033_v29 = vpop.permute.xlu0 %4032 }
 0x632   : > { %v4069_v32 = vadd.f32 %v4033_v29, %v9661_v38 }
 0x635   : > { %6403 = vset.pattern.permute.xlu0 %v6575_v42 }
 0x638   : > { %6402 = vset.pattern.permute.xlu2 %v6576_v1 }
 0x639   : > { %v4029_v16 = vpop.permute.xlu1 %4028  ;;  %6405 = vset.pattern.permute.xlu1 %v6575_v42  ;;  %4284 = vperm.xlu2 %6402, %v4066_v31  }
 0x63a   : > { %v4067_v39 = vadd.f32 %v4029_v16, %v9651_v6  ;;  %4126 = vperm.xlu1 %6405, %v4068_v18  }
 0x63c   : > { %4121 = vperm.xlu0 %6403, %v4067_v39  }
 0x641   : > { %6407 = vset.pattern.permute.xlu2 %v6575_v42  ;;  %v4037_v54 = vpop.permute.xlu2 %4036 }
 0x642   : > { %6406 = vset.pattern.permute.xlu1 %v6576_v1  ;;  %4131 = vperm.xlu2 %6407, %v4069_v32   ;;  %v4071_v4 = vadd.f32 %v4037_v54, %v9671_v8 }
 0x643   : > { %4292 = vperm.xlu1 %6406, %v4068_v18  }
 0x644   : > { %6404 = vset.pattern.permute.xlu0 %v6576_v1 }
 0x645   : > { %4288 = vperm.xlu0 %6404, %v4067_v39  }
 0x649   : > { %v4039_v34 = vpop.permute.xlu0 %4038 }
 0x64a   : > { %6408 = vset.pattern.permute.xlu2 %v6576_v1  ;;  %v4072_v45 = vadd.f32 %v4039_v34, %v9676_v40 }
 0x64b   : > { %6411 = vset.pattern.permute.xlu1 %v6575_v42  ;;  %4296 = vperm.xlu2 %6408, %v4069_v32  }
 0x64c   : > { %4141 = vperm.xlu1 %6411, %v4071_v4  }
 0x64d   : > { %6409 = vset.pattern.permute.xlu0 %v6575_v42 }
 0x64e   : > { %v4077_v59 = vpop.permute.xlu2 %4076 }
 0x64f   : > { %v4155_v61 = vmul.f32 %v9767_v17, %v4077_v59 }
 0x651   : > { %v4035_v12 = vpop.permute.xlu1 %4034 }
 0x652   : > { %v4070_v60 = vadd.f32 %v4035_v12, %v9666_v51 }
 0x653   : > { %6413 = vset.pattern.permute.xlu2 %v6575_v42 }
 0x654   : > { %4136 = vperm.xlu0 %6409, %v4070_v60   ;;  %6412 = vset.pattern.permute.xlu1 %v6576_v1 }
 0x655   : > { %4146 = vperm.xlu2 %6413, %v4072_v45   ;;  %4304 = vperm.xlu1 %6412, %v4071_v4  }
 0x656   : > { %v4082_v63 = vpop.permute.xlu0 %4081 }
 0x657   : > { %v4253_v20 = vpop.permute.xlu2 %4252  ;;  %v4156_v2 = vmul.f32 %v9767_v17, %v4082_v63 }
 0x658   : > { %v4316_v7 = vmul.f32 %v9774_v58, %v4253_v20 }
 0x65c   : > { %6410 = vset.pattern.permute.xlu0 %v6576_v1 }
 0x65d   : > { %6414 = vset.pattern.permute.xlu2 %v6576_v1  ;;  %4300 = vperm.xlu0 %6410, %v4070_v60  }
 0x65e   : > { %4187 = vrot.lane.b32.xlu1 %v4155_v61, %s6577_s30  ;;  %4308 = vperm.xlu2 %6414, %v4072_v45  }
 0x65f   : > { %v4257_v11 = vpop.permute.xlu0 %4256 }
 0x660   : > { %v4317_v53 = vmul.f32 %v9774_v58, %v4257_v11 }
 0x665   : > { %6415 = vset.pattern.permute.xlu0 %v6575_v42 }
 0x666   : > { %4348 = vrot.lane.b32.xlu1 %v4316_v7, %s6577_s30  ;;  %4189 = vrot.lane.b32.xlu2 %v4156_v2, %s6577_s30  ;;  %v4092_v0 = vpop.permute.xlu2 %4091 }
 0x667   : > { %v4158_v23 = vmul.f32 %v9767_v17, %v4092_v0 }
 0x669   : > { %v4041_v27 = vpop.permute.xlu1 %4040 }
 0x66a   : > { %v4073_v52 = vadd.f32 %v4041_v27, %v9681_v33 }
 0x66c   : > { %4151 = vperm.xlu0 %6415, %v4073_v52  }
 0x66e   : > { %4193 = vrot.lane.b32.xlu1 %v4158_v23, %s6577_s30  ;;  %4350 = vrot.lane.b32.xlu2 %v4317_v53, %s6577_s30  ;;  %v6579_v53 = vmov 4  }
 0x66f   : > { %v4265_v47 = vpop.permute.xlu2 %4264  ;;  %6417 = vset.pattern.permute.xlu2 %v6579_v53 }
 0x670   : > { %v4319_v14 = vmul.f32 %v9774_v58, %v4265_v47 }
 0x674   : > { %6416 = vset.pattern.permute.xlu0 %v6576_v1 }
 0x675   : > { %4312 = vperm.xlu0 %6416, %v4073_v52   ;;  %v6578_v52 = vmov 6  }
 0x676   : > { %4354 = vrot.lane.b32.xlu1 %v4319_v14, %s6577_s30  ;;  %v4087_v15 = vpop.permute.xlu1 %4086 }
 0x677   : > { %v4157_v13 = vmul.f32 %v9767_v17, %v4087_v15 }
 0x678   : > { %v4102_v41 = vpop.permute.xlu2 %4101 }
 0x679   : > { %v4160_v30 = vmul.f32 %v9767_v17, %v4102_v41 }
 0x67d   : > { %4191 = vrot.lane.b32.xlu0 %v4157_v13, %s6577_s30 }
 0x67e   : > { %6419 = vset.pattern.permute.xlu0 %v6578_v52 }
 0x67f   : > { %v4261_v56 = vpop.permute.xlu1 %4260 }
 0x680   : > { %v4318_v22 = vmul.f32 %v9774_v58, %v4261_v56 }
 0x681   : > { %v4273_v49 = vpop.permute.xlu2 %4272 }
 0x682   : > { %v4321_v57 = vmul.f32 %v9774_v58, %v4273_v49  ;;  %v6580_v49 = vmov 5  }
 0x683   : > { %6418 = vset.pattern.permute.xlu1 %v6580_v49 }
 0x685   : > { %4352 = vrot.lane.b32.xlu0 %v4318_v22, %s6577_s30 }
 0x688   : > { %v4097_v37 = vpop.permute.xlu1 %4096 }
 0x689   : > { %v4159_v24 = vmul.f32 %v9767_v17, %v4097_v37 }
 0x68a   : > { %v4117_v50 = vpop.permute.xlu2 %4116 }
 0x68b   : > { %4195 = vrot.lane.b32.xlu2 %v4159_v24, %s6577_s30  ;;  %v4163_v3 = vmul.f32 %v9767_v17, %v4117_v50 }
 0x68d   : > { %4197 = vrot.lane.b32.xlu0 %v4160_v30, %s6577_s30 }
 0x691   : > { %v4269_v19 = vpop.permute.xlu1 %4268 }
 0x692   : > { %v4320_v48 = vmul.f32 %v9774_v58, %v4269_v19 }
 0x693   : > { %v4285_v25 = vpop.permute.xlu2 %4284 }
 0x694   : > { %4356 = vrot.lane.b32.xlu2 %v4320_v48, %s6577_s30  ;;  %v4324_v32 = vmul.f32 %v9774_v58, %v4285_v25 }
 0x695   : > { %4358 = vrot.lane.b32.xlu0 %v4321_v57, %s6577_s30 }
 0x696   : > { %v4107_v26 = vpop.permute.xlu0 %4106 }
 0x697   : > { %v4161_v21 = vmul.f32 %v9767_v17, %v4107_v26 }
 0x699   : > { %4199 = vrot.lane.b32.xlu1 %v4161_v21, %s6577_s30 }
 0x69a   : > { %v4112_v31 = vpop.permute.xlu1 %4111 }
 0x69b   : > { %v4162_v18 = vmul.f32 %v9767_v17, %v4112_v31 }
 0x69c   : > { %v4132_v29 = vpop.permute.xlu2 %4131 }
 0x69d   : > { %4203 = vrot.lane.b32.xlu0 %v4163_v3, %s6577_s30  ;;  %4201 = vrot.lane.b32.xlu2 %v4162_v18, %s6577_s30  ;;  %v4166_v34 = vmul.f32 %v9767_v17, %v4132_v29 }
 0x69f   : > { %v4277_v16 = vpop.permute.xlu0 %4276 }
 0x6a0   : > { %v4322_v39 = vmul.f32 %v9774_v58, %v4277_v16 }
 0x6a2   : > { %4360 = vrot.lane.b32.xlu1 %v4322_v39, %s6577_s30  ;;  %v6581_v39 = vmov 7  }
 0x6a3   : > { %v4281_v54 = vpop.permute.xlu1 %4280 }
 0x6a4   : > { %v4323_v4 = vmul.f32 %v9774_v58, %v4281_v54 }
 0x6a5   : > { %4364 = vrot.lane.b32.xlu0 %v4324_v32, %s6577_s30  ;;  %v4297_v12 = vpop.permute.xlu2 %4296 }
 0x6a6   : > { %4362 = vrot.lane.b32.xlu2 %v4323_v4, %s6577_s30  ;;  %v4327_v20 = vmul.f32 %v9774_v58, %v4297_v12 }
 0x6ac   : > { %v4127_v60 = vpop.permute.xlu1 %4126 }
 0x6ad   : > { %v4165_v45 = vmul.f32 %v9767_v17, %v4127_v60  ;;  %4209 = vrot.lane.b32.xlu0 %v4166_v34, %s6577_s30 }
 0x6ae   : > { %v4122_v59 = vpop.permute.xlu0 %4121 }
 0x6af   : > { %v4164_v61 = vmul.f32 %v9767_v17, %v4122_v59  ;;  %4207 = vrot.lane.b32.xlu2 %v4165_v45, %s6577_s30  ;;  %v4147_v2 = vpop.permute.xlu2 %4146 }
 0x6b0   : > { %v4169_v27 = vmul.f32 %v9767_v17, %v4147_v2 }
 0x6b1   : > { %4205 = vrot.lane.b32.xlu1 %v4164_v61, %s6577_s30 }
 0x6b5   : > { %v4293_v63 = vpop.permute.xlu1 %4292  ;;  %4370 = vrot.lane.b32.xlu0 %v4327_v20, %s6577_s30 }
 0x6b6   : > { %v4326_v7 = vmul.f32 %v9774_v58, %v4293_v63 }
 0x6b7   : > { %v4289_v0 = vpop.permute.xlu0 %4288 }
 0x6b8   : > { %v4325_v11 = vmul.f32 %v9774_v58, %v4289_v0  ;;  %4368 = vrot.lane.b32.xlu2 %v4326_v7, %s6577_s30  ;;  %v4309_v14 = vpop.permute.xlu2 %4308 }
 0x6b9   : > { %v4330_v15 = vmul.f32 %v9774_v58, %v4309_v14 }
 0x6ba   : > { %4366 = vrot.lane.b32.xlu1 %v4325_v11, %s6577_s30 }
 0x6bd   : > { %4215 = vrot.lane.b32.xlu0 %v4169_v27, %s6577_s30 }
 0x6be   : > { %v4142_v23 = vpop.permute.xlu1 %4141 }
 0x6bf   : > { %v4168_v47 = vmul.f32 %v9767_v17, %v4142_v23 }
 0x6c0   : > { %v4190_v50 = vpop.permute.xlu2 %4189 }
 0x6c1   : > { %4213 = vrot.lane.b32.xlu2 %v4168_v47, %s6577_s30  ;;  %v4236_v25 = vadd.f32 %v4190_v50, %v9611_v35 }
 0x6c5   : > { %4376 = vrot.lane.b32.xlu0 %v4330_v15, %s6577_s30 }
 0x6c6   : > { %v4137_v41 = vpop.permute.xlu0 %4136 }
 0x6c7   : > { %v4167_v13 = vmul.f32 %v9767_v17, %v4137_v41  ;;  %v4305_v56 = vpop.permute.xlu1 %4304 }
 0x6c8   : > { %v4329_v22 = vmul.f32 %v9774_v58, %v4305_v56  ;;  %v4351_v21 = vpop.permute.xlu2 %4350 }
 0x6c9   : > { %4211 = vrot.lane.b32.xlu1 %v4167_v13, %s6577_s30  ;;  %v4397_v18 = vadd.f32 %v4351_v21, %v4236_v25 }
 0x6ca   : > { %4374 = vrot.lane.b32.xlu2 %v4329_v22, %s6577_s30 }
 0x6cb   : > { %v4413_v16 = vmax.f32 %v4397_v18, 0.0 }
 0x6cf   : > { %v4301_v37 = vpop.permute.xlu0 %4300 }
 0x6d0   : > { %v4188_v24 = vpop.permute.xlu1 %4187  ;;  %v4328_v30 = vmul.f32 %v9774_v58, %v4301_v37 }
 0x6d1   : > { %v4235_v19 = vadd.f32 %v4188_v24, %v9607_v10 }
 0x6d2   : > { %4372 = vrot.lane.b32.xlu1 %v4328_v30, %s6577_s30 }
 0x6d8   : > { %v4349_v48 = vpop.permute.xlu1 %4348 }
 0x6d9   : > { %v4396_v57 = vadd.f32 %v4349_v48, %v4235_v19 }
 0x6db   : > { %v4412_v26 = vmax.f32 %v4396_v57, 0.0 }
 0x6dd   : > { %4623 = vperm.xlu0 %6419, %v4412_v26   ;;  %4430 = vperm.xlu2 %6417, %v4412_v26  }
 0x6de   : > { %v4152_v31 = vpop.permute.xlu0 %4151 }
 0x6df   : > { %v4170_v3 = vmul.f32 %v9767_v17, %v4152_v31 }
 0x6e0   : > { %v4194_v32 = vpop.permute.xlu1 %4193 }
 0x6e1   : > { %4217 = vrot.lane.b32.xlu1 %v4170_v3, %s6577_s30  ;;  %v4238_v45 = vadd.f32 %v4194_v32, %v9621_v5 }
 0x6e5   : > { %6421 = vset.pattern.permute.xlu0 %v6579_v53  ;;  %6420 = vset.pattern.permute.xlu2 %v6581_v39  ;;  %v4196_v35 = vpop.permute.xlu2 %4195 }
 0x6e6   : > { %4720 = vperm.xlu2 %6420, %v4412_v26   ;;  %4435 = vperm.xlu0 %6421, %v4413_v16   ;;  %v4239_v5 = vadd.f32 %v4196_v35, %v9626_v28 }
 0x6e7   : > { %v4313_v10 = vpop.permute.xlu0 %4312 }
 0x6e8   : > { %v4331_v29 = vmul.f32 %v9774_v58, %v4313_v10  ;;  %v4355_v60 = vpop.permute.xlu1 %4354 }
 0x6e9   : > { %v4399_v59 = vadd.f32 %v4355_v60, %v4238_v45 }
 0x6ea   : > { %4378 = vrot.lane.b32.xlu1 %v4331_v29, %s6577_s30 }
 0x6eb   : > { %v4415_v63 = vmax.f32 %v4399_v59, 0.0 }
 0x6ee   : > { %6422 = vset.pattern.permute.xlu2 %v6580_v49  ;;  %6424 = vset.pattern.permute.xlu0 %v6581_v39  ;;  %v4357_v54 = vpop.permute.xlu2 %4356 }
 0x6ef   : > { %4530 = vperm.xlu2 %6422, %v4413_v16   ;;  %4724 = vperm.xlu0 %6424, %v4413_v16   ;;  %v4192_v17 = vpop.permute.xlu0 %4191  ;;  %v4400_v23 = vadd.f32 %v4357_v54, %v4239_v5 }
 0x6f0   : > { %v4237_v4 = vadd.f32 %v4192_v17, %v9616_v43 }
 0x6f2   : > { %4526 = vperm.xlu1 %6418, %v4412_v26  }
 0x6f7   : > { %v4353_v34 = vpop.permute.xlu0 %4352  ;;  %6427 = vset.pattern.permute.xlu2 %v6578_v52  ;;  %6426 = vset.pattern.permute.xlu0 %v6580_v49  ;;  %v4202_v20 = vpop.permute.xlu2 %4201 }
 0x6f8   : > { %v4398_v58 = vadd.f32 %v4353_v34, %v4237_v4 }
 0x6fa   : > { %v4414_v12 = vmax.f32 %v4398_v58, 0.0  ;;  %6423 = vset.pattern.permute.xlu1 %v6578_v52 }
 0x6fb   : > { %4627 = vperm.xlu1 %6423, %v4413_v16  }
 0x6fc   : > { %4631 = vperm.xlu2 %6427, %v4414_v12   ;;  %4534 = vperm.xlu0 %6426, %v4414_v12  }
 0x6ff   : > { %v4198_v61 = vpop.permute.xlu0 %4197 }
 0x700   : > { %v4240_v43 = vadd.f32 %v4198_v61, %v9631_v36  ;;  %v4363_v0 = vpop.permute.xlu2 %4362  ;;  %v4416_v36 = vmax.f32 %v4400_v23, 0.0 }
 0x703   : > { %6425 = vset.pattern.permute.xlu1 %v6579_v53 }
 0x704   : > { %6429 = vset.pattern.permute.xlu2 %v6579_v53  ;;  %4440 = vperm.xlu1 %6425, %v4414_v12  }
 0x705   : > { %4445 = vperm.xlu2 %6429, %v4415_v63   ;;  %6439 = vset.pattern.permute.xlu0 %v6578_v52 }
 0x707   : > { %v4359_v2 = vpop.permute.xlu0 %4358 }
 0x708   : > { %v4401_v7 = vadd.f32 %v4359_v2, %v4240_v43 }
 0x709   : > { %v4208_v14 = vpop.permute.xlu2 %4207 }
 0x70a   : > { %v4417_v11 = vmax.f32 %v4401_v7, 0.0  ;;  %v4245_v10 = vadd.f32 %v4208_v14, %v9656_v9 }
 0x70b   : > { %v4200_v27 = vpop.permute.xlu1 %4199 }
 0x70c   : > { %6428 = vset.pattern.permute.xlu1 %v6581_v39  ;;  %4643 = vperm.xlu0 %6439, %v4417_v11   ;;  %v4241_v47 = vadd.f32 %v4200_v27, %v9636_v46  ;;  %v4242_v46 = vadd.f32 %v4202_v20, %v9641_v44 }
 0x70d   : > { %6432 = vset.pattern.permute.xlu2 %v6581_v39  ;;  %4728 = vperm.xlu1 %6428, %v4414_v12  }
 0x70e   : > { %4732 = vperm.xlu2 %6432, %v4415_v63   ;;  %v4403_v22 = vadd.f32 %v4363_v0, %v4242_v46 }
 0x70f   : > { %v4204_v28 = vpop.permute.xlu0 %4203 }
 0x710   : > { %v4419_v24 = vmax.f32 %v4403_v22, 0.0  ;;  %v4243_v19 = vadd.f32 %v4204_v28, %v9646_v55 }
 0x712   : > { %v4369_v56 = vpop.permute.xlu2 %4368 }
 0x713   : > { %v4406_v29 = vadd.f32 %v4369_v56, %v4245_v10  ;;  %v9950_v56 = vperm.slane %v9764_v62, 5 }
 0x714   : > { %v4361_v15 = vpop.permute.xlu1 %4360  ;;  %6441 = vset.pattern.permute.xlu0 %v6579_v53 }
 0x715   : > { %v4402_v41 = vadd.f32 %v4361_v15, %v4241_v47  ;;  %6430 = vset.pattern.permute.xlu1 %v6580_v49  ;;  %v4422_v17 = vmax.f32 %v4406_v29, 0.0 }
 0x716   : > { %6434 = vset.pattern.permute.xlu2 %v6580_v49  ;;  %4538 = vperm.xlu1 %6430, %v4415_v63  }
 0x717   : > { %v4418_v13 = vmax.f32 %v4402_v41, 0.0  ;;  %4542 = vperm.xlu2 %6434, %v4416_v36   ;;  %v4365_v50 = vpop.permute.xlu0 %4364 }
 0x718   : > { %v4404_v48 = vadd.f32 %v4365_v50, %v4243_v19 }
 0x719   : > { %4460 = vperm.xlu0 %6441, %v4418_v13  }
 0x71a   : > { %v4420_v44 = vmax.f32 %v4404_v48, 0.0  ;;  %v9970_v48 = vperm.slane %v9764_v62, 7 }
 0x71b   : > { %v9871_v37 = vpop.permute.xlu2 %4213 }
 0x71c   : > { %v4248_v7 = vadd.f32 %v9871_v37, %v9671_v8 }
 0x71e   : > { %6431 = vset.pattern.permute.xlu1 %v6578_v52 }
 0x71f   : > { %6435 = vset.pattern.permute.xlu2 %v6578_v52  ;;  %4635 = vperm.xlu1 %6431, %v4415_v63   ;;  %v4210_v31 = vpop.permute.xlu0 %4209 }
 0x720   : > { %4639 = vperm.xlu2 %6435, %v4416_v36   ;;  %v4246_v4 = vadd.f32 %v4210_v31, %v9661_v38 }
 0x721   : > { %6444 = vset.pattern.permute.xlu0 %v6581_v39 }
 0x722   : > { %4744 = vperm.xlu0 %6444, %v4418_v13  }
 0x723   : > { %v4206_v30 = vpop.permute.xlu1 %4205 }
 0x724   : > { %v9878_v57 = vpop.permute.xlu2 %4374  ;;  %v4244_v21 = vadd.f32 %v4206_v30, %v9651_v6 }
 0x725   : > { %v4409_v0 = vadd.f32 %v9878_v57, %v4248_v7 }
 0x727   : > { %6433 = vset.pattern.permute.xlu1 %v6579_v53  ;;  %v4371_v16 = vpop.permute.xlu0 %4370  ;;  %v9928_v27 = vmax.f32 %v4409_v0, 0.0 }
 0x728   : > { %6437 = vset.pattern.permute.xlu2 %v6579_v53  ;;  %4450 = vperm.xlu1 %6433, %v4416_v36   ;;  %v4407_v34 = vadd.f32 %v4371_v16, %v4246_v4 }
 0x729   : > { %4455 = vperm.xlu2 %6437, %v4417_v11  }
 0x72a   : > { %6446 = vset.pattern.permute.xlu0 %v6580_v49  ;;  %v4423_v9 = vmax.f32 %v4407_v34, 0.0 }
 0x72b   : > { %4554 = vperm.xlu0 %6446, %v4419_v24  }
 0x72c   : > { %v4367_v26 = vpop.permute.xlu1 %4366 }
 0x72d   : > { %v4405_v25 = vadd.f32 %v4367_v26, %v4244_v21  ;;  %v9976_v21 = vld [vmem:[%s10281_s5 + $0x20] sm:$0xff] }
 0x72f   : > { %v4421_v3 = vmax.f32 %v4405_v25, 0.0  ;;  %v4216_v32 = vpop.permute.xlu0 %4215 }
 0x730   : > { %6436 = vset.pattern.permute.xlu1 %v6581_v39  ;;  %v4249_v8 = vadd.f32 %v4216_v32, %v9676_v40  ;;  %v9947_v40 = vperm.slane %v9764_v62, 4 }
 0x731   : > { %4736 = vperm.xlu1 %6436, %v4416_v36   ;;  %6440 = vset.pattern.permute.xlu2 %v6581_v39 }
 0x732   : > { %4740 = vperm.xlu2 %6440, %v4417_v11  }
 0x733   : > { %6451 = vset.pattern.permute.xlu0 %v6578_v52 }
 0x734   : > { %4655 = vperm.xlu0 %6451, %v4420_v44  }
 0x737   : > { %v9883_v55 = vpop.permute.xlu2 %4430  ;;  %v4377_v60 = vpop.permute.xlu0 %4376 }
 0x738   : > { %v4410_v47 = vadd.f32 %v4377_v60, %v4249_v8  ;;  %v4509_v37 = vmul.f32 %v9947_v40, %v9883_v55 }
 0x739   : > { %6438 = vset.pattern.permute.xlu1 %v6580_v49 }
 0x73a   : > { %4546 = vperm.xlu1 %6438, %v4417_v11   ;;  %6442 = vset.pattern.permute.xlu2 %v6580_v49  ;;  %v9939_v15 = vmax.f32 %v4410_v47, 0.0 }
 0x73b   : > { %4550 = vperm.xlu2 %6442, %v4418_v13   ;;  %v4212_v18 = vpop.permute.xlu1 %4211 }
 0x73c   : > { %6453 = vset.pattern.permute.xlu0 %v6579_v53  ;;  %v4247_v45 = vadd.f32 %v4212_v18, %v9666_v51  ;;  %v9990_v18 = vperm.slane %v9976_v21, 0 }
 0x73d   : > { %4475 = vperm.xlu0 %6453, %v4421_v3  }
 0x740   : > { %v9889_v6 = vpop.permute.xlu2 %4720 }
 0x741   : > { %v4784_v25 = vmul.f32 %v9970_v48, %v9889_v6 }
 0x742   : > { %6443 = vset.pattern.permute.xlu1 %v6578_v52 }
 0x743   : > { %4647 = vperm.xlu1 %6443, %v4418_v13   ;;  %6447 = vset.pattern.permute.xlu2 %v6578_v52 }
 0x744   : > { %4651 = vperm.xlu2 %6447, %v4419_v24   ;;  %v4373_v35 = vpop.permute.xlu1 %4372 }
 0x745   : > { %6456 = vset.pattern.permute.xlu0 %v6581_v39  ;;  %v4408_v59 = vadd.f32 %v4373_v35, %v4247_v45 }
 0x746   : > { %4756 = vperm.xlu0 %6456, %v4421_v3  }
 0x747   : > { %v9907_v38 = vmax.f32 %v4408_v59, 0.0 }
 0x749   : > { %v9895_v54 = vpop.permute.xlu2 %4530 }
 0x74a   : > { %v4591_v7 = vmul.f32 %v9950_v56, %v9895_v54 }
 0x74b   : > { %6445 = vset.pattern.permute.xlu1 %v6579_v53 }
 0x74c   : > { %4465 = vperm.xlu1 %6445, %v4419_v24   ;;  %6449 = vset.pattern.permute.xlu2 %v6579_v53 }
 0x74d   : > { %4470 = vperm.xlu2 %6449, %v4420_v44  }
 0x74e   : > { %6458 = vset.pattern.permute.xlu0 %v6580_v49 }
 0x74f   : > { %4566 = vperm.xlu0 %6458, %v4422_v17   ;;  %v4624_v20 = vpop.permute.xlu0 %4623 }
 0x753   : > { %v4218_v58 = vpop.permute.xlu1 %4217 }
 0x754   : > { %6448 = vset.pattern.permute.xlu1 %v6581_v39  ;;  %v4250_v13 = vadd.f32 %v4218_v58, %v9681_v33  ;;  %v9958_v33 = vperm.slane %v9764_v62, 6 }
 0x755   : > { %4748 = vperm.xlu1 %6448, %v4419_v24   ;;  %6452 = vset.pattern.permute.xlu2 %v6581_v39 }
 0x756   : > { %v9901_v12 = vpop.permute.xlu2 %4631  ;;  %4752 = vperm.xlu2 %6452, %v4420_v44  }
 0x757   : > { %6463 = vset.pattern.permute.xlu0 %v6578_v52  ;;  %v4689_v32 = vmul.f32 %v9958_v33, %v9901_v12 }
 0x758   : > { %4667 = vperm.xlu0 %6463, %v4423_v9   ;;  %v9917_v2 = vpop.permute.xlu0 %4435 }
 0x75c   : > { %v4379_v61 = vpop.permute.xlu1 %4378 }
 0x75d   : > { %6450 = vset.pattern.permute.xlu1 %v6580_v49  ;;  %v4411_v28 = vadd.f32 %v4379_v61, %v4250_v13 }
 0x75e   : > { %4558 = vperm.xlu1 %6450, %v4420_v44   ;;  %6454 = vset.pattern.permute.xlu2 %v6580_v49  ;;  %v4687_v44 = vmul.f32 %v9958_v33, %v4624_v20 }
 0x75f   : > { %v9909_v63 = vpop.permute.xlu2 %4445  ;;  %4562 = vperm.xlu2 %6454, %v4421_v3   ;;  %v9960_v24 = vmax.f32 %v4411_v28, 0.0 }
 0x760   : > { %6465 = vset.pattern.permute.xlu0 %v6579_v53  ;;  %v4512_v10 = vmul.f32 %v9947_v40, %v9909_v63 }
 0x761   : > { %4490 = vperm.xlu0 %6465, %v9907_v38   ;;  %v9933_v23 = vpop.permute.xlu0 %4724 }
 0x764   : > { %v4527_v43 = vpop.permute.xlu1 %4526 }
 0x765   : > { %v4590_v22 = vmul.f32 %v9950_v56, %v4527_v43 }
 0x766   : > { %6455 = vset.pattern.permute.xlu1 %v6578_v52 }
 0x767   : > { %4659 = vperm.xlu1 %6455, %v4421_v3   ;;  %6459 = vset.pattern.permute.xlu2 %v6578_v52  ;;  %v4606_v19 = vadd.f32 %v4590_v22, %v4509_v37 }
 0x768   : > { %v9915_v51 = vpop.permute.xlu2 %4732  ;;  %4663 = vperm.xlu2 %6459, %v4422_v17  }
 0x769   : > { %6468 = vset.pattern.permute.xlu0 %v6581_v39  ;;  %v4703_v26 = vadd.f32 %v4687_v44, %v4606_v19 }
 0x76a   : > { %4768 = vperm.xlu0 %6468, %v9907_v38  }
 0x76b   : > { %v4800_v3 = vadd.f32 %v4784_v25, %v4703_v26 }
 0x76d   : > { %v9924_v11 = vpop.permute.xlu1 %4627 }
 0x76e   : > { %v4535_v41 = vpop.permute.xlu0 %4534  ;;  %v4688_v0 = vmul.f32 %v9958_v33, %v9924_v11 }
 0x76f   : > { %6457 = vset.pattern.permute.xlu1 %v6579_v53  ;;  %v4592_v16 = vmul.f32 %v9950_v56, %v4535_v41 }
 0x770   : > { %4480 = vperm.xlu1 %6457, %v4422_v17   ;;  %6461 = vset.pattern.permute.xlu2 %v6579_v53 }
 0x771   : > { %v9930_v5 = vpop.permute.xlu2 %4542  ;;  %4485 = vperm.xlu2 %6461, %v4423_v9  }
 0x772   : > { %6470 = vset.pattern.permute.xlu0 %v6580_v49 }
 0x773   : > { %4578 = vperm.xlu0 %6470, %v9928_v27  }
 0x776   : > { %v4441_v14 = vpop.permute.xlu1 %4440 }
 0x777   : > { %v4511_v31 = vmul.f32 %v9947_v40, %v4441_v14 }
 0x778   : > { %6460 = vset.pattern.permute.xlu1 %v6581_v39 }
 0x779   : > { %4760 = vperm.xlu1 %6460, %v4422_v17   ;;  %6464 = vset.pattern.permute.xlu2 %v6581_v39  ;;  %v4608_v29 = vadd.f32 %v4592_v16, %v4511_v31  ;;  %v9999_v17 = vadd.f32 %v9990_v18, %v4800_v3 }
 0x77a   : > { %v9941_v36 = vpop.permute.xlu2 %4639  ;;  %4764 = vperm.xlu2 %6464, %v4423_v9  }
 0x77b   : > { %6475 = vset.pattern.permute.xlu0 %v6578_v52  ;;  %v4705_v60 = vadd.f32 %v4689_v32, %v4608_v29  ;;  %v4833_v12 = vmax.f32 %v9999_v17, 0.0 }
 0x77c   : > { %4679 = vperm.xlu0 %6475, %v9939_v15  }
 0x77e   : > { %v9962_v30 = vpop.permute.xlu0 %4643 }
 0x77f   : > { %v4729_v46 = vpop.permute.xlu1 %4728 }
 0x780   : > { %v4786_v4 = vmul.f32 %v9970_v48, %v4729_v46 }
 0x781   : > { %6462 = vset.pattern.permute.xlu1 %v6580_v49 }
 0x782   : > { %4570 = vperm.xlu1 %6462, %v4423_v9   ;;  %6466 = vset.pattern.permute.xlu2 %v6580_v49  ;;  %v4787_v9 = vmul.f32 %v9970_v48, %v9915_v51 }
 0x783   : > { %v9964_v50 = vpop.permute.xlu2 %4455  ;;  %4574 = vperm.xlu2 %6466, %v9907_v38  }
 0x784   : > { %6477 = vset.pattern.permute.xlu0 %v6579_v53 }
 0x785   : > { %4505 = vperm.xlu0 %6477, %v9960_v24  }
 0x788   : > { %v4539_v57 = vpop.permute.xlu1 %4538 }
 0x789   : > { %v4593_v6 = vmul.f32 %v9950_v56, %v4539_v57 }
 0x78a   : > { %6467 = vset.pattern.permute.xlu1 %v6578_v52 }
 0x78b   : > { %4671 = vperm.xlu1 %6467, %v9907_v38   ;;  %6471 = vset.pattern.permute.xlu2 %v6578_v52  ;;  %v9983_v62 = vpop.permute.xlu0 %4460  ;;  %v4609_v34 = vadd.f32 %v4593_v6, %v4512_v10  ;;  %v4802_v38 = vadd.f32 %v4786_v4, %v4705_v60 }
 0x78c   : > { %v9986_v55 = vpop.permute.xlu2 %4740  ;;  %4675 = vperm.xlu2 %6471, %v9928_v27  }
 0x78d   : > { %6480 = vset.pattern.permute.xlu0 %v6581_v39  ;;  %v4819_v63 = vadd.f32 %v9990_v18, %v4802_v38  ;;  %v4789_v57 = vmul.f32 %v9970_v48, %v9986_v55 }
 0x78e   : > { %4780 = vperm.xlu0 %6480, %v9960_v24  }
 0x78f   : > { %v4835_v8 = vmax.f32 %v4819_v63, 0.0 }
 0x791   : > { %v4636_v35 = vpop.permute.xlu1 %4635 }
 0x792   : > { %v4690_v58 = vmul.f32 %v9958_v33, %v4636_v35 }
 0x793   : > { %6469 = vset.pattern.permute.xlu1 %v6579_v53 }
 0x794   : > { %v4706_v45 = vadd.f32 %v4690_v58, %v4609_v34  ;;  %4495 = vperm.xlu1 %6469, %v9928_v27   ;;  %6473 = vset.pattern.permute.xlu2 %v6579_v53  ;;  %v10010_v59 = vpop.permute.xlu0 %4744  ;;  %v4510_v53 = vmul.f32 %v9947_v40, %v9917_v2  ;;  %v4515_v34 = vmul.f32 %v9947_v40, %v9983_v62 }
 0x795   : > { %v10012_v61 = vpop.permute.xlu2 %4550  ;;  %4500 = vperm.xlu2 %6473, %v9939_v15  }
 0x796   : > { %v10016_v20 = vadd.f32 %v4787_v9, %v4706_v45  ;;  %6482 = vset.pattern.permute.xlu0 %v6576_v1  ;;  %v4607_v2 = vadd.f32 %v4591_v7, %v4510_v53  ;;  %v4596_v35 = vmul.f32 %v9950_v56, %v10012_v61  ;;  %v4790_v53 = vmul.f32 %v9970_v48, %v10010_v59 }
 0x797   : > { %4947 = vperm.xlu0 %6482, %v4833_v12  }
 0x798   : > { %v4820_v45 = vadd.f32 %v9990_v18, %v10016_v20  ;;  %v4612_v61 = vadd.f32 %v4596_v35, %v4515_v34 }
 0x79a   : > { %v4451_v43 = vpop.permute.xlu1 %4450 }
 0x79c   : > { %6472 = vset.pattern.permute.xlu1 %v6581_v39 }
 0x79d   : > { %4772 = vperm.xlu1 %6472, %v9928_v27   ;;  %6476 = vset.pattern.permute.xlu2 %v6581_v39  ;;  %v10025_v51 = vpop.permute.xlu0 %4554  ;;  %v4704_v27 = vadd.f32 %v4688_v0, %v4607_v2  ;;  %v4785_v39 = vmul.f32 %v9970_v48, %v9933_v23  ;;  %v4514_v23 = vmul.f32 %v9947_v40, %v9964_v50 }
 0x79e   : > { %v10031_v47 = vpop.permute.xlu2 %4651  ;;  %4776 = vperm.xlu2 %6476, %v9939_v15   ;;  %v4594_v50 = vmul.f32 %v9950_v56, %v9930_v5  ;;  %v4597_v58 = vmul.f32 %v9950_v56, %v10025_v51 }
 0x79f   : > { %6485 = vset.pattern.permute.xlu0 %v6575_v42  ;;  %v4801_v54 = vadd.f32 %v4785_v39, %v4704_v27  ;;  %v4694_v38 = vmul.f32 %v9958_v33, %v10031_v47 }
 0x7a0   : > { %4861 = vperm.xlu0 %6485, %v4835_v8  }
 0x7a1   : > { %v4818_v13 = vadd.f32 %v9990_v18, %v4801_v54 }
 0x7a3   : > { %v4737_v14 = vpop.permute.xlu1 %4736  ;;  %v4834_v22 = vmax.f32 %v4818_v13, 0.0 }
 0x7a5   : > { %6474 = vset.pattern.permute.xlu1 %v6580_v49 }
 0x7a6   : > { %4582 = vperm.xlu1 %6474, %v9939_v15   ;;  %6478 = vset.pattern.permute.xlu2 %v6580_v49  ;;  %v10040_v11 = vpop.permute.xlu0 %4655  ;;  %v4513_v15 = vmul.f32 %v9947_v40, %v4451_v43  ;;  %v4692_v49 = vmul.f32 %v9958_v33, %v9962_v30  ;;  %v4691_v30 = vmul.f32 %v9958_v33, %v9941_v36  ;;  %v4836_v43 = vmax.f32 %v4820_v45, 0.0 }
 0x7a7   : > { %v10042_v41 = vpop.permute.xlu2 %4470  ;;  %4586 = vperm.xlu2 %6478, %v9960_v24  }
 0x7a8   : > { %6492 = vset.pattern.permute.xlu0 %v6576_v1  ;;  %v4610_v26 = vadd.f32 %v4594_v50, %v4513_v15  ;;  %v4517_v39 = vmul.f32 %v9947_v40, %v10042_v41 }
 0x7aa   : > { %v4707_v16 = vadd.f32 %v4691_v30, %v4610_v26 }
 0x7ac   : > { %v4547_v28 = vpop.permute.xlu1 %4546 }
 0x7ad   : > { %v4595_v46 = vmul.f32 %v9950_v56, %v4547_v28  ;;  %v4695_v28 = vmul.f32 %v9958_v33, %v10040_v11 }
 0x7ae   : > { %6479 = vset.pattern.permute.xlu1 %v6578_v52 }
 0x7af   : > { %v4611_v37 = vadd.f32 %v4595_v46, %v4514_v23  ;;  %4683 = vperm.xlu1 %6479, %v9960_v24   ;;  %6483 = vset.pattern.permute.xlu2 %v6575_v42  ;;  %v10056_v19 = vpop.permute.xlu0 %4475  ;;  %v4788_v24 = vmul.f32 %v9970_v48, %v4737_v14 }
 0x7b0   : > { %v10060_v44 = vpop.permute.xlu2 %4752  ;;  %4856 = vperm.xlu2 %6483, %v4834_v22   ;;  %v4518_v50 = vmul.f32 %v9947_v40, %v10056_v19 }
 0x7b1   : > { %v4708_v52 = vadd.f32 %v4692_v49, %v4611_v37  ;;  %v4804_v6 = vadd.f32 %v4788_v24, %v4707_v16  ;;  %v4792_v15 = vmul.f32 %v9970_v48, %v10060_v44 }
 0x7b3   : > { %v4805_v25 = vadd.f32 %v4789_v57, %v4708_v52  ;;  %v4821_v36 = vadd.f32 %v9990_v18, %v4804_v6 }
 0x7b5   : > { %v4648_v31 = vpop.permute.xlu1 %4647  ;;  %v10068_v3 = vadd.f32 %v9990_v18, %v4805_v25  ;;  %v4837_v17 = vmax.f32 %v4821_v36, 0.0 }
 0x7b6   : > { %v4693_v9 = vmul.f32 %v9958_v33, %v4648_v31 }
 0x7b7   : > { %6481 = vset.pattern.permute.xlu1 %v6575_v42  ;;  %v4838_v5 = vmax.f32 %v10068_v3, 0.0 }
 0x7b8   : > { %4851 = vperm.xlu1 %6481, %v4833_v12   ;;  %6486 = vset.pattern.permute.xlu2 %v6576_v1  ;;  %v10073_v55 = vpop.permute.xlu0 %4756  ;;  %v4709_v63 = vadd.f32 %v4693_v9, %v4612_v61 }
 0x7b9   : > { %v4563_v10 = vpop.permute.xlu2 %4562  ;;  %4955 = vperm.xlu2 %6486, %v4835_v8   ;;  %4967 = vperm.xlu0 %6492, %v4838_v5   ;;  %v4793_v44 = vmul.f32 %v9970_v48, %v10073_v55 }
 0x7ba   : > { %v4806_v0 = vadd.f32 %v4790_v53, %v4709_v63  ;;  %v4599_v49 = vmul.f32 %v9950_v56, %v4563_v10 }
 0x7bc   : > { %v4823_v27 = vadd.f32 %v9990_v18, %v4806_v0  ;;  %v4615_v52 = vadd.f32 %v4599_v49, %v4518_v50 }
 0x7be   : > { %v4466_v29 = vpop.permute.xlu1 %4465  ;;  %v4839_v13 = vmax.f32 %v4823_v27, 0.0 }
 0x7bf   : > { %v4516_v32 = vmul.f32 %v9947_v40, %v4466_v29 }
 0x7c0   : > { %6484 = vset.pattern.permute.xlu1 %v6576_v1 }
 0x7c1   : > { %4951 = vperm.xlu1 %6484, %v4834_v22   ;;  %6489 = vset.pattern.permute.xlu2 %v6575_v42  ;;  %v10083_v4 = vpop.permute.xlu0 %4566  ;;  %v4613_v12 = vadd.f32 %v4597_v58, %v4516_v32 }
 0x7c2   : > { %v10090_v60 = vpop.permute.xlu2 %4663  ;;  %4871 = vperm.xlu2 %6489, %v4837_v17   ;;  %6495 = vset.pattern.permute.xlu0 %v6575_v42 }
 0x7c3   : > { %v4710_v51 = vadd.f32 %v4694_v38, %v4613_v12  ;;  %v4697_v35 = vmul.f32 %v9958_v33, %v10090_v60 }
 0x7c7   : > { %v4749_v62 = vpop.permute.xlu1 %4748 }
 0x7c8   : > { %v4791_v7 = vmul.f32 %v9970_v48, %v4749_v62 }
 0x7c9   : > { %6487 = vset.pattern.permute.xlu1 %v6575_v42 }
 0x7ca   : > { %v4807_v8 = vadd.f32 %v4791_v7, %v4710_v51  ;;  %4866 = vperm.xlu1 %6487, %v4836_v43   ;;  %6490 = vset.pattern.permute.xlu2 %v6576_v1  ;;  %v10102_v20 = vpop.permute.xlu0 %4667 }
 0x7cb   : > { %v10104_v2 = vpop.permute.xlu2 %4485  ;;  %4963 = vperm.xlu2 %6490, %v4837_v17   ;;  %v4698_v63 = vmul.f32 %v9958_v33, %v10102_v20 }
 0x7cc   : > { %v4824_v47 = vadd.f32 %v9990_v18, %v4807_v8  ;;  %v4520_v60 = vmul.f32 %v9947_v40, %v10104_v2 }
 0x7ce   : > { %v4840_v59 = vmax.f32 %v4824_v47, 0.0 }
 0x7d0   : > { %v4559_v14 = vpop.permute.xlu1 %4558  ;;  %4886 = vperm.xlu0 %6495, %v4840_v59  }
 0x7d1   : > { %v4598_v54 = vmul.f32 %v9950_v56, %v4559_v14 }
 0x7d2   : > { %6488 = vset.pattern.permute.xlu1 %v6576_v1 }
 0x7d3   : > { %v4614_v23 = vadd.f32 %v4598_v54, %v4517_v39  ;;  %4959 = vperm.xlu1 %6488, %v4836_v43   ;;  %6493 = vset.pattern.permute.xlu2 %v6575_v42  ;;  %v10115_v46 = vpop.permute.xlu0 %4490 }
 0x7d4   : > { %v4765_v22 = vpop.permute.xlu2 %4764  ;;  %4881 = vperm.xlu2 %6493, %v4839_v13   ;;  %v4521_v2 = vmul.f32 %v9947_v40, %v10115_v46 }
 0x7d5   : > { %v4711_v41 = vadd.f32 %v4695_v28, %v4614_v23  ;;  %v4795_v51 = vmul.f32 %v9970_v48, %v4765_v22 }
 0x7d7   : > { %v4808_v37 = vadd.f32 %v4792_v15, %v4711_v41 }
 0x7d8   : > { %6498 = vset.pattern.permute.xlu0 %v6576_v1 }
 0x7d9   : > { %v4660_v11 = vpop.permute.xlu1 %4659  ;;  %v4825_v57 = vadd.f32 %v9990_v18, %v4808_v37 }
 0x7da   : > { %v4696_v26 = vmul.f32 %v9958_v33, %v4660_v11 }
 0x7db   : > { %6491 = vset.pattern.permute.xlu1 %v6575_v42  ;;  %v4841_v25 = vmax.f32 %v4825_v57, 0.0 }
 0x7dc   : > { %v4712_v30 = vadd.f32 %v4696_v26, %v4615_v52  ;;  %4876 = vperm.xlu1 %6491, %v4838_v5   ;;  %6496 = vset.pattern.permute.xlu2 %v6576_v1  ;;  %v4769_v19 = vpop.permute.xlu0 %4768  ;;  %v4600_v5 = vmul.f32 %v9950_v56, %v10083_v4 }
 0x7dd   : > { %v4575_v24 = vpop.permute.xlu2 %4574  ;;  %4975 = vperm.xlu2 %6496, %v4840_v59   ;;  %4979 = vperm.xlu0 %6498, %v4841_v25   ;;  %v4796_v39 = vmul.f32 %v9970_v48, %v4769_v19 }
 0x7de   : > { %v4809_v31 = vadd.f32 %v4793_v44, %v4712_v30  ;;  %v4602_v0 = vmul.f32 %v9950_v56, %v4575_v24  ;;  %v10176_v44 = vperm.slane %v9976_v21, 1  ;;  %v10179_v30 = vperm.slane %v9976_v21, 2 }
 0x7e0   : > { %v4826_v16 = vadd.f32 %v9990_v18, %v4809_v31  ;;  %v4618_v27 = vadd.f32 %v4602_v0, %v4521_v2 }
 0x7e2   : > { %v4481_v6 = vpop.permute.xlu1 %4480  ;;  %v4842_v10 = vmax.f32 %v4826_v16, 0.0 }
 0x7e3   : > { %v4519_v36 = vmul.f32 %v9947_v40, %v4481_v6 }
 0x7e4   : > { %6494 = vset.pattern.permute.xlu1 %v6576_v1 }
 0x7e5   : > { %4971 = vperm.xlu1 %6494, %v4839_v13   ;;  %6499 = vset.pattern.permute.xlu2 %v6575_v42  ;;  %v4579_v3 = vpop.permute.xlu0 %4578  ;;  %v4616_v29 = vadd.f32 %v4600_v5, %v4519_v36 }
 0x7e6   : > { %v4676_v55 = vpop.permute.xlu2 %4675  ;;  %4896 = vperm.xlu2 %6499, %v4842_v10   ;;  %6501 = vset.pattern.permute.xlu0 %v6575_v42  ;;  %v4603_v37 = vmul.f32 %v9950_v56, %v4579_v3 }
 0x7e7   : > { %v4713_v32 = vadd.f32 %v4697_v35, %v4616_v29  ;;  %v4700_v57 = vmul.f32 %v9958_v33, %v4676_v55 }
 0x7eb   : > { %v4761_v17 = vpop.permute.xlu1 %4760 }
 0x7ec   : > { %v4794_v34 = vmul.f32 %v9970_v48, %v4761_v17 }
 0x7ed   : > { %6497 = vset.pattern.permute.xlu1 %v6575_v42 }
 0x7ee   : > { %v4810_v58 = vadd.f32 %v4794_v34, %v4713_v32  ;;  %4891 = vperm.xlu1 %6497, %v4841_v25   ;;  %v10142_v9 = vpop.permute.xlu0 %4679  ;;  %6502 = vset.pattern.permute.xlu2 %v6576_v1 }
 0x7ef   : > { %v10145_v4 = vpop.permute.xlu2 %4500  ;;  %v4701_v35 = vmul.f32 %v9958_v33, %v10142_v9 }
 0x7f0   : > { %v4827_v45 = vadd.f32 %v9990_v18, %v4810_v58  ;;  %v4523_v29 = vmul.f32 %v9947_v40, %v10145_v4 }
 0x7f2   : > { %v4843_v61 = vmax.f32 %v4827_v45, 0.0 }
 0x7f4   : > { %v4571_v12 = vpop.permute.xlu1 %4570  ;;  %4987 = vperm.xlu2 %6502, %v4843_v61   ;;  %4901 = vperm.xlu0 %6501, %v4843_v61  }
 0x7f5   : > { %v4601_v38 = vmul.f32 %v9950_v56, %v4571_v12 }
 0x7f6   : > { %6500 = vset.pattern.permute.xlu1 %v6576_v1 }
 0x7f7   : > { %v4617_v62 = vadd.f32 %v4601_v38, %v4520_v60  ;;  %4983 = vperm.xlu1 %6500, %v4842_v10   ;;  %v10154_v43 = vpop.permute.xlu0 %4505  ;;  %v10186_v10 = vperm.slane %v9976_v21, 3 }
 0x7f8   : > { %v4777_v53 = vpop.permute.xlu2 %4776  ;;  %v4524_v12 = vmul.f32 %v9947_v40, %v10154_v43 }
 0x7f9   : > { %v4714_v7 = vadd.f32 %v4698_v63, %v4617_v62  ;;  %v4798_v34 = vmul.f32 %v9970_v48, %v4777_v53 }
 0x7fb   : > { %v4811_v8 = vadd.f32 %v4795_v51, %v4714_v7 }
 0x7fc   : > { %6504 = vset.pattern.permute.xlu0 %v6576_v1  ;;  %6505 = vset.pattern.permute.xlu2 %v6575_v42 }
 0x7fd   : > { %v4672_v47 = vpop.permute.xlu1 %4671  ;;  %v4828_v20 = vadd.f32 %v9990_v18, %v4811_v8 }
 0x7fe   : > { %v4699_v59 = vmul.f32 %v9958_v33, %v4672_v47 }
 0x7ff   : > { %6503 = vset.pattern.permute.xlu1 %v6575_v42  ;;  %v4844_v14 = vmax.f32 %v4828_v20, 0.0 }
 0x800   : > { %v4715_v54 = vadd.f32 %v4699_v59, %v4618_v27  ;;  %v4781_v13 = vpop.permute.xlu0 %4780 }
 0x801   : > { %v4587_v28 = vpop.permute.xlu2 %4586  ;;  %4991 = vperm.xlu0 %6504, %v4844_v14   ;;  %4906 = vperm.xlu1 %6503, %v4844_v14   ;;  %v4799_v62 = vmul.f32 %v9970_v48, %v4781_v13 }
 0x802   : > { %v4812_v23 = vadd.f32 %v4796_v39, %v4715_v54  ;;  %v4605_v45 = vmul.f32 %v9950_v56, %v4587_v28 }
 0x804   : > { %v4829_v46 = vadd.f32 %v9990_v18, %v4812_v23  ;;  %v4621_v38 = vadd.f32 %v4605_v45, %v4524_v12 }
 0x806   : > { %v4845_v22 = vmax.f32 %v4829_v46, 0.0  ;;  %v4496_v15 = vpop.permute.xlu1 %4495 }
 0x807   : > { %v4522_v41 = vmul.f32 %v9947_v40, %v4496_v15 }
 0x808   : > { %4911 = vperm.xlu2 %6505, %v4845_v22  }
 0x809   : > { %6506 = vset.pattern.permute.xlu1 %v6576_v1  ;;  %v4948_v49 = vpop.permute.xlu0 %4947  ;;  %6507 = vset.pattern.permute.xlu0 %v6575_v42  ;;  %v4619_v11 = vadd.f32 %v4603_v37, %v4522_v41 }
 0x80a   : > { %v10171_v50 = vpop.permute.xlu2 %4856  ;;  %4995 = vperm.xlu1 %6506, %v4845_v22   ;;  %v5011_v47 = vmul.f32 %v10179_v30, %v4948_v49 }
 0x80b   : > { %v4716_v26 = vadd.f32 %v4700_v57, %v4619_v11  ;;  %v4931_v59 = vmul.f32 %v10176_v44, %v10171_v50 }
 0x80f   : > { %v4773_v52 = vpop.permute.xlu1 %4772 }
 0x810   : > { %v4797_v25 = vmul.f32 %v9970_v48, %v4773_v52 }
 0x812   : > { %v4813_v19 = vadd.f32 %v4797_v25, %v4716_v26  ;;  %v4862_v24 = vpop.permute.xlu0 %4861  ;;  %6508 = vset.pattern.permute.xlu1 %v6575_v42 }
 0x813   : > { %v4932_v31 = vmul.f32 %v10176_v44, %v4862_v24  ;;  %v4956_v16 = vpop.permute.xlu2 %4955 }
 0x814   : > { %v4830_v6 = vadd.f32 %v9990_v18, %v4813_v19  ;;  %v5013_v36 = vmul.f32 %v10179_v30, %v4956_v16 }
 0x816   : > { %v4846_v3 = vmax.f32 %v4830_v6, 0.0  ;;  %v5029_v5 = vadd.f32 %v5013_v36, %v4932_v31 }
 0x818   : > { %v5046_v42 = vadd.f32 %v10186_v10, %v5029_v5  ;;  %v4583_v55 = vpop.permute.xlu1 %4582  ;;  %4916 = vperm.xlu0 %6507, %v4846_v3  }
 0x819   : > { %v4604_v21 = vmul.f32 %v9950_v56, %v4583_v55 }
 0x81a   : > { %5062 = vst [vmem:[%s10192_s12 + $0x10] sm:$0xff] %v5046_v42 }
 0x81b   : > { %v4620_v17 = vadd.f32 %v4604_v21, %v4523_v29 }
 0x81c   : > { %v4872_v32 = vpop.permute.xlu2 %4871 }
 0x81d   : > { %v4717_v58 = vadd.f32 %v4701_v35, %v4620_v17  ;;  %v4934_v56 = vmul.f32 %v10176_v44, %v4872_v32 }
 0x81f   : > { %v4814_v61 = vadd.f32 %v4798_v34, %v4717_v58 }
 0x820   : > { %6510 = vset.pattern.permute.xlu0 %v6576_v1 }
 0x821   : > { %v4684_v4 = vpop.permute.xlu1 %4683  ;;  %v4831_v60 = vadd.f32 %v9990_v18, %v4814_v61 }
 0x822   : > { %v4702_v63 = vmul.f32 %v9958_v33, %v4684_v4 }
 0x823   : > { %v4847_v9 = vmax.f32 %v4831_v60, 0.0 }
 0x824   : > { %v4718_v53 = vadd.f32 %v4702_v63, %v4621_v38 }
 0x825   : > { %v4964_v51 = vpop.permute.xlu2 %4963  ;;  %5003 = vperm.xlu0 %6510, %v4847_v9   ;;  %4921 = vperm.xlu1 %6508, %v4847_v9  }
 0x826   : > { %v4815_v40 = vadd.f32 %v4799_v62, %v4718_v53  ;;  %v5015_v43 = vmul.f32 %v10179_v30, %v4964_v51 }
 0x828   : > { %v4832_v7 = vadd.f32 %v9990_v18, %v4815_v40  ;;  %v5031_v0 = vadd.f32 %v5015_v43, %v4934_v56 }
 0x82a   : > { %v4848_v8 = vmax.f32 %v4832_v7, 0.0  ;;  %v5048_v33 = vadd.f32 %v10186_v10, %v5031_v0  ;;  %v4852_v2 = vpop.permute.xlu1 %4851 }
 0x82b   : > { %v4930_v48 = vmul.f32 %v10176_v44, %v4852_v2  ;;  %v4968_v28 = vpop.permute.xlu0 %4967 }
 0x82c   : > { %5064 = vst [vmem:[%s10192_s12 + $0x20] sm:$0xff] %v5048_v33  ;;  %4926 = vperm.xlu2 %6505, %v4848_v8   ;;  %v5016_v25 = vmul.f32 %v10179_v30, %v4968_v28 }
 0x82d   : > { %v5027_v20 = vadd.f32 %v5011_v47, %v4930_v48  ;;  %6511 = vset.pattern.permute.xlu1 %v6576_v1 }
 0x82e   : > { %5007 = vperm.xlu1 %6511, %v4848_v8   ;;  %v4882_v39 = vpop.permute.xlu2 %4881 }
 0x82f   : > { %v5044_v27 = vadd.f32 %v10186_v10, %v5027_v20  ;;  %v4936_v6 = vmul.f32 %v10176_v44, %v4882_v39 }
 0x831   : > { %5060 = vst [vmem:[%s10192_s12] sm:$0xff] %v5044_v27 }
 0x833   : > { %v4952_v18 = vpop.permute.xlu1 %4951 }
 0x834   : > { %v5012_v14 = vmul.f32 %v10179_v30, %v4952_v18  ;;  %6509 = vset.pattern.permute.xlu2 %v6576_v1 }
 0x835   : > { %4999 = vperm.xlu2 %6509, %v4846_v3  }
 0x836   : > { %v5028_v54 = vadd.f32 %v5012_v14, %v4931_v59 }
 0x837   : > { %v4976_v46 = vpop.permute.xlu2 %4975 }
 0x838   : > { %v5045_v13 = vadd.f32 %v10186_v10, %v5028_v54  ;;  %v5018_v15 = vmul.f32 %v10179_v30, %v4976_v46 }
 0x83a   : > { %5061 = vst [vmem:[%s10192_s12 + $0x8] sm:$0xff] %v5045_v13 }
 0x83c   : > { %v4867_v23 = vpop.permute.xlu1 %4866 }
 0x83d   : > { %v4933_v1 = vmul.f32 %v10176_v44, %v4867_v23 }
 0x840   : > { %v4897_v5 = vpop.permute.xlu2 %4896 }
 0x841   : > { %v4939_v60 = vmul.f32 %v10176_v44, %v4897_v5 }
 0x842   : > { %v4887_v22 = vpop.permute.xlu0 %4886 }
 0x843   : > { %v4937_v41 = vmul.f32 %v10176_v44, %v4887_v22 }
 0x845   : > { %v5034_v49 = vadd.f32 %v5018_v15, %v4937_v41  ;;  %v4960_v37 = vpop.permute.xlu1 %4959 }
 0x846   : > { %v5014_v50 = vmul.f32 %v10179_v30, %v4960_v37 }
 0x847   : > { %v5051_v11 = vadd.f32 %v10186_v10, %v5034_v49 }
 0x848   : > { %v5030_v57 = vadd.f32 %v5014_v50, %v4933_v1 }
 0x849   : > { %5067 = vst [vmem:[%s10192_s12 + $0x38] sm:$0xff] %v5051_v11 }
 0x84a   : > { %v5047_v52 = vadd.f32 %v10186_v10, %v5030_v57 }
 0x84c   : > { %5063 = vst [vmem:[%s10192_s12 + $0x18] sm:$0xff] %v5047_v52 }
 0x84e   : > { %v4877_v26 = vpop.permute.xlu1 %4876  ;;  %v4988_v32 = vpop.permute.xlu2 %4987 }
 0x84f   : > { %v4935_v19 = vmul.f32 %v10176_v44, %v4877_v26  ;;  %v4980_v55 = vpop.permute.xlu0 %4979  ;;  %v5021_v45 = vmul.f32 %v10179_v30, %v4988_v32 }
 0x850   : > { %v5019_v21 = vmul.f32 %v10179_v30, %v4980_v55 }
 0x851   : > { %v5032_v24 = vadd.f32 %v5016_v25, %v4935_v19 }
 0x853   : > { %v5049_v31 = vadd.f32 %v10186_v10, %v5032_v24 }
 0x855   : > { %5065 = vst [vmem:[%s10192_s12 + $0x28] sm:$0xff] %v5049_v31 }
 0x857   : > { %v4972_v16 = vpop.permute.xlu1 %4971 }
 0x858   : > { %v5017_v36 = vmul.f32 %v10179_v30, %v4972_v16 }
 0x85a   : > { %v5033_v3 = vadd.f32 %v5017_v36, %v4936_v6 }
 0x85c   : > { %v5050_v42 = vadd.f32 %v10186_v10, %v5033_v3 }
 0x85e   : > { %5066 = vst [vmem:[%s10192_s12 + $0x30] sm:$0xff] %v5050_v42 }
 0x860   : > { %v4892_v29 = vpop.permute.xlu1 %4891 }
 0x861   : > { %v4938_v35 = vmul.f32 %v10176_v44, %v4892_v29 }
 0x862   : > { %v4912_v0 = vpop.permute.xlu2 %4911 }
 0x863   : > { %v5035_v17 = vadd.f32 %v5019_v21, %v4938_v35  ;;  %v4942_v33 = vmul.f32 %v10176_v44, %v4912_v0 }
 0x865   : > { %v5052_v34 = vadd.f32 %v10186_v10, %v5035_v17 }
 0x866   : > { %v4902_v58 = vpop.permute.xlu0 %4901 }
 0x867   : > { %5068 = vst [vmem:[%s10192_s12 + $0x40] sm:$0xff] %v5052_v34  ;;  %v4940_v61 = vmul.f32 %v10176_v44, %v4902_v58 }
 0x869   : > { %v5037_v12 = vadd.f32 %v5021_v45, %v4940_v61  ;;  %v4984_v4 = vpop.permute.xlu1 %4983 }
 0x86a   : > { %v5020_v38 = vmul.f32 %v10179_v30, %v4984_v4 }
 0x86b   : > { %v5054_v63 = vadd.f32 %v10186_v10, %v5037_v12 }
 0x86c   : > { %v5036_v9 = vadd.f32 %v5020_v38, %v4939_v60 }
 0x86d   : > { %5070 = vst [vmem:[%s10192_s12 + $0x50] sm:$0xff] %v5054_v63 }
 0x86e   : > { %v5053_v62 = vadd.f32 %v10186_v10, %v5036_v9 }
 0x870   : > { %5069 = vst [vmem:[%s10192_s12 + $0x48] sm:$0xff] %v5053_v62 }
 0x873   : > { %v4907_v53 = vpop.permute.xlu1 %4906  ;;  %v4992_v51 = vpop.permute.xlu0 %4991 }
 0x874   : > { %v4941_v56 = vmul.f32 %v10176_v44, %v4907_v53  ;;  %v5022_v40 = vmul.f32 %v10179_v30, %v4992_v51 }
 0x876   : > { %v5038_v43 = vadd.f32 %v5022_v40, %v4941_v56 }
 0x878   : > { %v5055_v7 = vadd.f32 %v10186_v10, %v5038_v43 }
 0x87a   : > { %5071 = vst [vmem:[%s10192_s12 + $0x58] sm:$0xff] %v5055_v7 }
 0x87c   : > { %v4996_v8 = vpop.permute.xlu1 %4995 }
 0x87d   : > { %v5023_v2 = vmul.f32 %v10179_v30, %v4996_v8 }
 0x87f   : > { %v5039_v47 = vadd.f32 %v5023_v2, %v4942_v33 }
 0x881   : > { %v5056_v48 = vadd.f32 %v10186_v10, %v5039_v47 }
 0x883   : > { %5072 = vst [vmem:[%s10192_s12 + $0x60] sm:$0xff] %v5056_v48 }
 0x886   : > { %v4927_v20 = vpop.permute.xlu2 %4926 }
 0x887   : > { %v4945_v49 = vmul.f32 %v10176_v44, %v4927_v20 }
 0x88a   : > { %v4917_v27 = vpop.permute.xlu0 %4916 }
 0x88b   : > { %v4943_v59 = vmul.f32 %v10176_v44, %v4917_v27 }
 0x88f   : > { %v5000_v18 = vpop.permute.xlu2 %4999 }
 0x890   : > { %v5024_v14 = vmul.f32 %v10179_v30, %v5000_v18 }
 0x892   : > { %v5040_v39 = vadd.f32 %v5024_v14, %v4943_v59 }
 0x894   : > { %v5057_v54 = vadd.f32 %v10186_v10, %v5040_v39 }
 0x896   : > { %5073 = vst [vmem:[%s10192_s12 + $0x68] sm:$0xff] %v5057_v54 }
 0x897   : > { %v4922_v13 = vpop.permute.xlu1 %4921  ;;  %v5004_v28 = vpop.permute.xlu0 %5003 }
 0x898   : > { %v4944_v23 = vmul.f32 %v10176_v44, %v4922_v13  ;;  %v5025_v46 = vmul.f32 %v10179_v30, %v5004_v28 }
 0x89a   : > { %v5041_v22 = vadd.f32 %v5025_v46, %v4944_v23 }
 0x89c   : > { %v5058_v15 = vadd.f32 %v10186_v10, %v5041_v22 }
 0x89e   : > { %5074 = vst [vmem:[%s10192_s12 + $0x70] sm:$0xff] %v5058_v15 }
 0x8a0   : > { %v5008_v41 = vpop.permute.xlu1 %5007 }
 0x8a1   : > { %v5026_v37 = vmul.f32 %v10179_v30, %v5008_v41 }
 0x8a3   : > { %v5042_v1 = vadd.f32 %v5026_v37, %v4945_v49 }
 0x8a5   : > { %v5059_v50 = vadd.f32 %v10186_v10, %v5042_v1 }
 0x8a7   : > { %5075 = vst [vmem:[%s10192_s12 + $0x78] sm:$0xff] %v5059_v50 }
 0x8a8 PF: > { %s16_s21 = sadd.s32 1, %s6571_s21  }
 0x8a9   : > { %p13_p4 = scmp.ge.s32.totalorder %s16_s21, 4  }
 0x8ab   :  { %15 = sbr.rel (!%p13_p4) target bundleno = 1 (0x1), region = 74 }

</bundles_post_ra>
